<compile_context>
chip_gen: v6e
topology: v6e:2x2x1
jax: 0.10.0
libtpu: 0.0.40
codegen_flags: <defaults>
</compile_context>

<pallas_src>
import jax
import jax.numpy as jnp
from jax.experimental import pallas as pl
from jax.experimental.pallas import tpu as pltpu

KERNELS = (1, 3, 5, 7)
NB = len(KERNELS)            # number of multi-scale branches
KMAX = max(KERNELS)          # 7
HALO = KMAX // 2             # 3
TAU = 2.0                    # LIFNode tau
V_TH = 1.0                   # LIFNode v_threshold (v_reset = 0, hard reset)

# MXU input dtype for the conv path.  f32 keeps the LIF threshold comparison bit-exact vs
# the f32 reference; on v6e/v7x this can be set to jnp.bfloat16 (accumulation stays f32 via
# preferred_element_type; LIF / softmax / combine stay f32 — required on v5e anyway).
CONV_DTYPE = jnp.float32


# ----------------------------------------------------------------------------
# 1) Fused (4-branch conv + folded BN + LIF + spatial mean) kernel.
#    grid = (B, T): B parallel, T sequential (membrane carried in VMEM scratch).
# ----------------------------------------------------------------------------
def _fused_conv_lif_kernel(xc_ref, w_ref, b_ref, s_ref, p_ref, v_ref):
    # xc_ref : (1, 1, HW, 49*C)  im2col patches for one (b, t)
    # w_ref  : (49*C, 4*C)       combined 4-branch conv weight (BN folded), N = 128 lanes
    # b_ref  : (1, 4*C)          combined bias
    # s_ref  : (1, 1, HW, 4*C)   spikes out (lane-dense stores)
    # p_ref  : (1, T, 4*C)       per-timestep spatial means; VMEM-resident across T
    # v_ref  : (HW, 4*C)         membrane potential scratch, carried across timesteps
    t = pl.program_id(1)
    T = p_ref.shape[1]

    @pl.when(t == 0)
    def _():
        v_ref[...] = jnp.zeros_like(v_ref)
        p_ref[...] = jnp.zeros_like(p_ref)

    # all 4 branches and all 49 taps in one MXU matmul: (HW, 1568) @ (1568, 128)
    u = jnp.dot(xc_ref[0, 0], w_ref[...], preferred_element_type=jnp.float32)
    u = u + b_ref[...]

    v = v_ref[...] + (u - v_ref[...]) * (1.0 / TAU)      # LIF charge
    spike = (v >= V_TH).astype(jnp.float32)              # fire (Heaviside)
    v_ref[...] = v * (1.0 - spike)                       # hard reset to 0

    s_ref[0, 0] = spike

    # accumulate this timestep's spatial mean into the resident (T, 4C) block;
    # single dense HBM writeback happens when the b-block changes / grid ends.
    pooled = jnp.mean(spike, axis=0, keepdims=True)                      # (1, 4C)
    row = jax.lax.broadcasted_iota(jnp.int32, (T, 1), 0)                 # (T, 1)
    p_ref[...] = p_ref[...] + jnp.where(row == t, pooled, 0.0)[None]


def make_fused_conv_lif(B, T, HW, C):
    KK = KMAX * KMAX
    C4 = NB * C
    return pl.pallas_call(
        _fused_conv_lif_kernel,
        out_shape=(jax.ShapeDtypeStruct((B, T, HW, C4), jnp.float32),
                   jax.ShapeDtypeStruct((B, T, C4), jnp.float32)),
        grid_spec=pltpu.PrefetchScalarGridSpec(
            num_scalar_prefetch=0,
            grid=(B, T),
            in_specs=[
                pl.BlockSpec((1, 1, HW, KK * C), lambda b, t: (b, t, 0, 0)),
                pl.BlockSpec((KK * C, C4), lambda b, t: (0, 0)),
                pl.BlockSpec((1, C4), lambda b, t: (0, 0)),
            ],
            out_specs=(
                pl.BlockSpec((1, 1, HW, C4), lambda b, t: (b, t, 0, 0)),
                pl.BlockSpec((1, T, C4), lambda b, t: (b, 0, 0)),
            ),
            scratch_shapes=[pltpu.VMEM((HW, C4), jnp.float32)],
        ),
        compiler_params=pltpu.CompilerParams(
            dimension_semantics=("parallel", "arbitrary")),
    )


# ----------------------------------------------------------------------------
# 2) Combine kernel: weighted sum over the 4 branches with precomputed
#    softmax(C-attn) * softmax(T-attn) weights.  Lane-dense (4*C = 128) loads,
#    several (b, t) slabs per grid step.
# ----------------------------------------------------------------------------
def make_combine(BT, HW, C, TBB):
    C4 = NB * C

    def combine_kernel(sp_ref, w_ref, o_ref):
        sp = sp_ref[...]                        # (TBB, HW, 4C)
        w = w_ref[...]                          # (TBB, 4C)
        weighted = sp * w[:, None, :]
        acc = weighted[:, :, 0:C]
        for s in range(1, NB):
            acc = acc + weighted[:, :, s * C:(s + 1) * C]
        o_ref[...] = acc

    return pl.pallas_call(
        combine_kernel,
        out_shape=jax.ShapeDtypeStruct((BT, HW, C), jnp.float32),
        grid_spec=pltpu.PrefetchScalarGridSpec(
            num_scalar_prefetch=0,
            grid=(BT // TBB,),
            in_specs=[
                pl.BlockSpec((TBB, HW, C4), lambda i: (i, 0, 0)),
                pl.BlockSpec((TBB, C4), lambda i: (i, 0)),
            ],
            out_specs=pl.BlockSpec((TBB, HW, C), lambda i: (i, 0, 0)),
        ),
        compiler_params=pltpu.CompilerParams(dimension_semantics=("parallel",)),
    )


# ----------------------------------------------------------------------------
# Parameters (deterministic synthetic init; BatchNorm folded into conv, eval mode)
# ----------------------------------------------------------------------------
def init_params(key, C, T, c_reduction=16, t_reduction=4):
    Cr = max(C // c_reduction, 1)
    To = max(T // t_reduction, 1)
    keys = iter(jax.random.split(key, 64))
    nxt = lambda: next(keys)

    p = {'conv_w_hwio': [], 'conv_b': []}
    KK = KMAX * KMAX
    w_comb = jnp.zeros((KK, C, NB * C), jnp.float32)
    b_comb = jnp.zeros((NB * C,), jnp.float32)
    for s, k in enumerate(KERNELS):
        w = 0.1 * jax.random.normal(nxt(), (C, C, k, k), jnp.float32)   # OIHW (PyTorch)
        b = 0.1 * jax.random.normal(nxt(), (C,), jnp.float32)
        gamma = 1.0 + 0.1 * jax.random.normal(nxt(), (C,), jnp.float32)
        beta = 0.1 * jax.random.normal(nxt(), (C,), jnp.float32)
        rmean = 0.1 * jax.random.normal(nxt(), (C,), jnp.float32)
        rvar = jax.random.uniform(nxt(), (C,), jnp.float32, 0.5, 1.5)
        scale = gamma / jnp.sqrt(rvar + 1e-5)
        w_eff = w * scale[:, None, None, None]            # folded BN (eval mode)
        b_eff = (b - rmean) * scale + beta
        w_hwio = jnp.transpose(w_eff, (2, 3, 1, 0))       # (k, k, Cin, Cout)
        p['conv_w_hwio'].append(w_hwio)
        p['conv_b'].append(b_eff)
        # embed the k*k taps of branch s into the 7x7 tap grid (shared halo = 3)
        off = HALO - k // 2
        for kh in range(k):
            for kw in range(k):
                tap = (kh + off) * KMAX + (kw + off)
                w_comb = w_comb.at[tap, :, s * C:(s + 1) * C].set(w_hwio[kh, kw])
        b_comb = b_comb.at[s * C:(s + 1) * C].set(b_eff)
    p['w_comb'] = w_comb.reshape(KK * C, NB * C).astype(CONV_DTYPE)
    p['b_comb'] = b_comb.reshape(1, NB * C)

    # channel attention (1x1 convs over C)
    p['c_w1'] = (0.1 * jax.random.normal(nxt(), (Cr, C), jnp.float32)).T        # (C, Cr)
    p['c_b1'] = 0.1 * jax.random.normal(nxt(), (Cr,), jnp.float32)
    p['c_w2'] = jnp.stack([(0.1 * jax.random.normal(nxt(), (C, Cr), jnp.float32)).T
                           for _ in KERNELS], 0)                                # (4, Cr, C)
    p['c_b2'] = jnp.stack([0.1 * jax.random.normal(nxt(), (C,), jnp.float32)
                           for _ in KERNELS], 0)                                # (4, C)

    # temporal attention (1x1x1 Conv3d over T-as-channels)
    p['t_w1'] = (0.1 * jax.random.normal(nxt(), (To, T), jnp.float32)).T        # (T, To)
    p['t_b1'] = 0.1 * jax.random.normal(nxt(), (To,), jnp.float32)
    p['t_w2'] = jnp.stack([(0.1 * jax.random.normal(nxt(), (T, To), jnp.float32)).T
                           for _ in KERNELS], 0)                                # (4, To, T)
    p['t_b2'] = jnp.stack([0.1 * jax.random.normal(nxt(), (T,), jnp.float32)
                           for _ in KERNELS], 0)                                # (4, T)
    return p


# ----------------------------------------------------------------------------
# Full SMA forward (2 Pallas kernels + thin JAX glue).  Input/output: (T,B,C,H,W)
# ----------------------------------------------------------------------------
def sma_forward(x_tbchw, params):
    T, B, C, H, W = x_tbchw.shape
    HW = H * W
    BT = B * T
    C4 = NB * C
    KK = KMAX * KMAX

    # (T,B,C,H,W) -> (B,T,H,W,C): channel-last, batch-major so the leading grid
    # axis (B) is the parallel one (v7x megacore), T stays sequential for the LIF.
    x = jnp.transpose(x_tbchw, (1, 0, 3, 4, 2))

    # pad ONCE with the largest halo (k=7); every branch reads an offset window via w_comb
    xp = jnp.pad(x, ((0, 0), (0, 0), (HALO, HALO), (HALO, HALO), (0, 0)))

    # im2col (done once by XLA): (B, T, HW, 49*C) patch matrices -> one big-K matmul/step
    cols = [xp[:, :, kh:kh + H, kw:kw + W, :]
            for kh in range(KMAX) for kw in range(KMAX)]
    xcol = jnp.concatenate(cols, axis=-1).reshape(B, T, HW, KK * C).astype(CONV_DTYPE)

    spikes, pools = make_fused_conv_lif(B, T, HW, C)(
        xcol, params['w_comb'], params['b_comb'])
    # spikes: (B, T, HW, 4C) ; pools: (B, T, 4C) = per-branch spatial means

    # feature_map = mean_{H,W}( sum_k spike_k )  -> (B, T, C)
    fm = pools.reshape(B, T, NB, C).sum(axis=2)

    # ---- tiny attention MLPs in plain jnp (below one MXU granule; XLA fuses them) ----
    fm_flat = fm.reshape(BT, C)
    mid = jnp.maximum(fm_flat @ params['c_w1'] + params['c_b1'], 0.0)
    c_logits = jnp.einsum('nr,src->snc', mid, params['c_w2']) + params['c_b2'][:, None, :]

    fm_bt = jnp.mean(fm, axis=2)                                  # (B, T)
    midt = jnp.maximum(fm_bt @ params['t_w1'] + params['t_b1'], 0.0)
    t_logits = jnp.einsum('br,srt->sbt', midt, params['t_w2']) + params['t_b2'][:, None, :]

    cw = jax.nn.softmax(c_logits, axis=0)                         # (4, BT, C)
    tw = jax.nn.softmax(t_logits, axis=0).reshape(NB, BT, 1)      # (4, BT, 1)
    w_mix = jnp.transpose(cw * tw, (1, 0, 2)).reshape(BT, C4)     # (BT, 4C) lane-dense

    TBB = 8 if BT % 8 == 0 else BT
    out = make_combine(BT, HW, C, TBB)(spikes.reshape(BT, HW, C4), w_mix)   # (BT, HW, C)

    return jnp.transpose(out.reshape(B, T, H, W, C), (1, 0, 4, 2, 3))       # (T,B,C,H,W)


# ----------------------------------------------------------------------------
# Pure-JAX reference (for correctness check)
# ----------------------------------------------------------------------------
def sma_reference(x_tbchw, params):
    T, B, C, H, W = x_tbchw.shape
    HW, TB = H * W, T * B
    x = jnp.transpose(x_tbchw, (0, 1, 3, 4, 2)).reshape(TB, H, W, C)

    spikes, pools = [], []
    for s, k in enumerate(KERNELS):
        u = jax.lax.conv_general_dilated(
            x, params['conv_w_hwio'][s], (1, 1), [(k // 2, k // 2)] * 2,
            dimension_numbers=('NHWC', 'HWIO', 'NHWC')) + params['conv_b'][s][None, None, None, :]
        u = u.reshape(T, B, HW, C)

        def step(v, ut):
            v = v + (ut - v) * (1.0 / TAU)
            sp = (v >= V_TH).astype(jnp.float32)
            return v * (1.0 - sp), sp

        _, sp = jax.lax.scan(step, jnp.zeros((B, HW, C), jnp.float32), u)
        spikes.append(sp)
        pools.append(jnp.mean(sp, axis=2))

    fm = sum(pools)                                                       # (T, B, C)
    mid = jnp.maximum(fm.reshape(TB, C) @ params['c_w1'] + params['c_b1'], 0.0)
    c_logits = jnp.stack([mid @ params['c_w2'][i] + params['c_b2'][i]
                          for i in range(NB)], 0)                         # (4, TB, C)
    fm_bt = jnp.mean(fm, axis=2).T
    midt = jnp.maximum(fm_bt @ params['t_w1'] + params['t_b1'], 0.0)
    t_logits = jnp.stack([midt @ params['t_w2'][i] + params['t_b2'][i]
                          for i in range(NB)], 0)                         # (4, B, T)
    t_logits = jnp.transpose(t_logits, (0, 2, 1)).reshape(NB, TB)

    cw = jax.nn.softmax(c_logits, axis=0)
    tw = jax.nn.softmax(t_logits, axis=0)
    sp = jnp.stack([s.reshape(TB, HW, C) for s in spikes], 0)
    out = jnp.sum(tw[:, :, None, None] * cw[:, :, None, :] * sp, axis=0)
    return jnp.transpose(out.reshape(T, B, H, W, C), (0, 1, 4, 2, 3))


if __name__ == "__main__":
    # small but consistent shapes: channel=32, time=8, C_reduction=16, T_reduction=4
    T, B, C, H, W = 8, 2, 32, 8, 8
    key = jax.random.PRNGKey(0)
    kx, kp = jax.random.split(key)
    x = jax.random.normal(kx, (T, B, C, H, W), jnp.float32)
    params = init_params(kp, C, T, 16, 4)

    out = jax.block_until_ready(jax.jit(sma_forward)(x, params))
    ref = jax.block_until_ready(sma_reference(x, params))

    assert out.shape == (T, B, C, H, W)
    err = float(jnp.mean(jnp.abs(out - ref)))
    assert err < 5e-3, err
    print("KERNEL_OK")
</pallas_src>

<mosaic_0001>
module attributes {stable_mosaic.version = 11 : i64} {
  func.func @_fused_conv_lif_kernel(%arg0: i32, %arg1: i32, %arg2: memref<1x1x64x1568xf32, #tpu.memory_space<vmem>>, %arg3: memref<1568x128xf32, #tpu.memory_space<vmem>>, %arg4: memref<1x128xf32, #tpu.memory_space<vmem>>, %arg5: memref<1x1x64x128xf32, #tpu.memory_space<vmem>>, %arg6: memref<1x8x128xf32, #tpu.memory_space<vmem>>, %arg7: memref<64x128xf32, #tpu.memory_space<vmem>>) attributes {dimension_semantics = [#tpu.dimension_semantics<parallel>, #tpu.dimension_semantics<arbitrary>], iteration_bounds = array<i64: 2, 8>, scalar_prefetch = 0 : i64, scratch_operands = 1 : i64, tpu.core_type = #tpu.core_type<tc>, window_params = [{transform_indices = @transform_0, window_bounds = array<i64: 1, 1, 64, 1568>}, {pipeline_mode = #tpu.pipeline_mode<synchronous>, transform_indices = @transform_1, window_bounds = array<i64: 1568, 128>}, {pipeline_mode = #tpu.pipeline_mode<synchronous>, transform_indices = @transform_2, window_bounds = array<i64: 1, 128>}, {transform_indices = @transform_3, window_bounds = array<i64: 1, 1, 64, 128>}, {transform_indices = @transform_4, window_bounds = array<i64: 1, 8, 128>}]} {
    %c0_i32 = arith.constant 0 : i32
    %0 = arith.cmpi eq, %arg1, %c0_i32 : i32
    %1 = arith.extui %0 : i1 to i32
    %c0_i32_0 = arith.constant 0 : i32
    %2 = arith.cmpi ne, %1, %c0_i32_0 : i32
    scf.if %2 {
      %cst_30 = arith.constant 0.000000e+00 : f32
      %44 = vector.broadcast %cst_30 : f32 to vector<64x128xf32>
      %c0_31 = arith.constant 0 : index
      %c0_32 = arith.constant 0 : index
      %45 = vector.load %arg7[%c0_31, %c0_32] : memref<64x128xf32, #tpu.memory_space<vmem>>, vector<64x128xf32>
      tpu.vector_store %arg7[%c0_31, %c0_32], %44 {strides = array<i32>} : memref<64x128xf32, #tpu.memory_space<vmem>>, vector<64x128xf32>,
      %cst_33 = arith.constant 0.000000e+00 : f32
      %46 = vector.broadcast %cst_33 : f32 to vector<1x8x128xf32>
      %c0_34 = arith.constant 0 : index
      %c0_35 = arith.constant 0 : index
      %c0_36 = arith.constant 0 : index
      %47 = vector.load %arg6[%c0_34, %c0_35, %c0_36] : memref<1x8x128xf32, #tpu.memory_space<vmem>>, vector<1x8x128xf32>
      tpu.vector_store %arg6[%c0_34, %c0_35, %c0_36], %46 {strides = array<i32>} : memref<1x8x128xf32, #tpu.memory_space<vmem>>, vector<1x8x128xf32>,
    } else {
    }
    %c0 = arith.constant 0 : index
    %c0_1 = arith.constant 0 : index
    %c0_2 = arith.constant 0 : index
    %c0_3 = arith.constant 0 : index
    %3 = vector.load %arg2[%c0, %c0_1, %c0_2, %c0_3] : memref<1x1x64x1568xf32, #tpu.memory_space<vmem>>, vector<1x1x64x1568xf32>
    %4 = vector.shape_cast %3 : vector<1x1x64x1568xf32> to vector<64x1568xf32>
    %c0_4 = arith.constant 0 : index
    %c0_5 = arith.constant 0 : index
    %5 = vector.load %arg3[%c0_4, %c0_5] : memref<1568x128xf32, #tpu.memory_space<vmem>>, vector<1568x128xf32>
    %cst = arith.constant dense<0.000000e+00> : vector<64x128xf32>
    %6 = tpu.matmul %4, %5, %cst {dimension_numbers = #tpu.dot_dimension_numbers<[1], [0], [0], [1], [0, 0, 1, 1], [], []>} : vector<64x1568xf32>, vector<1568x128xf32>, vector<64x128xf32> -> vector<64x128xf32>
    %c0_6 = arith.constant 0 : index
    %c0_7 = arith.constant 0 : index
    %7 = vector.load %arg4[%c0_6, %c0_7] : memref<1x128xf32, #tpu.memory_space<vmem>>, vector<1x128xf32>
    %8 = vector.broadcast %7 : vector<1x128xf32> to vector<64x128xf32>
    %9 = arith.addf %6, %8 : vector<64x128xf32>
    %c0_8 = arith.constant 0 : index
    %c0_9 = arith.constant 0 : index
    %10 = vector.load %arg7[%c0_8, %c0_9] : memref<64x128xf32, #tpu.memory_space<vmem>>, vector<64x128xf32>
    %c0_10 = arith.constant 0 : index
    %c0_11 = arith.constant 0 : index
    %11 = vector.load %arg7[%c0_10, %c0_11] : memref<64x128xf32, #tpu.memory_space<vmem>>, vector<64x128xf32>
    %12 = arith.subf %9, %11 : vector<64x128xf32>
    %cst_12 = arith.constant 5.000000e-01 : f32
    %13 = vector.broadcast %cst_12 : f32 to vector<64x128xf32>
    %14 = arith.mulf %12, %13 : vector<64x128xf32>
    %15 = arith.addf %10, %14 : vector<64x128xf32>
    %cst_13 = arith.constant 1.000000e+00 : f32
    %16 = vector.broadcast %cst_13 : f32 to vector<64x128xf32>
    %17 = arith.cmpf oge, %15, %16 : vector<64x128xf32>
    %18 = arith.extui %17 : vector<64x128xi1> to vector<64x128xi32>
    %19 = arith.sitofp %18 : vector<64x128xi32> to vector<64x128xf32>
    %cst_14 = arith.constant 1.000000e+00 : f32
    %20 = vector.broadcast %cst_14 : f32 to vector<64x128xf32>
    %21 = arith.subf %20, %19 : vector<64x128xf32>
    %22 = arith.mulf %15, %21 : vector<64x128xf32>
    %c0_15 = arith.constant 0 : index
    %c0_16 = arith.constant 0 : index
    %23 = vector.load %arg7[%c0_15, %c0_16] : memref<64x128xf32, #tpu.memory_space<vmem>>, vector<64x128xf32>
    tpu.vector_store %arg7[%c0_15, %c0_16], %22 {strides = array<i32>} : memref<64x128xf32, #tpu.memory_space<vmem>>, vector<64x128xf32>,
    %c0_17 = arith.constant 0 : index
    %c0_18 = arith.constant 0 : index
    %c0_19 = arith.constant 0 : index
    %c0_20 = arith.constant 0 : index
    %24 = vector.load %arg5[%c0_17, %c0_18, %c0_19, %c0_20] : memref<1x1x64x128xf32, #tpu.memory_space<vmem>>, vector<1x1x64x128xf32>
    %25 = vector.shape_cast %24 : vector<1x1x64x128xf32> to vector<64x128xf32>
    %26 = vector.shape_cast %19 : vector<64x128xf32> to vector<1x1x64x128xf32>
    tpu.vector_store %arg5[%c0_17, %c0_18, %c0_19, %c0_20], %26 {strides = array<i32>} : memref<1x1x64x128xf32, #tpu.memory_space<vmem>>, vector<1x1x64x128xf32>,
    %cst_21 = arith.constant dense<0.000000e+00> : vector<128xf32>
    %27 = vector.multi_reduction <add>, %19, %cst_21 [0] : vector<64x128xf32> to vector<128xf32>
    %28 = vector.shape_cast %27 : vector<128xf32> to vector<1x128xf32>
    %cst_22 = arith.constant 6.400000e+01 : f32
    %29 = vector.broadcast %cst_22 : f32 to vector<1x128xf32>
    %30 = arith.divf %28, %29 : vector<1x128xf32>
    %31 = tpu.iota {dimensions = array<i32: 0>} : vector<8x1xi32>
    %c0_23 = arith.constant 0 : index
    %c0_24 = arith.constant 0 : index
    %c0_25 = arith.constant 0 : index
    %32 = vector.load %arg6[%c0_23, %c0_24, %c0_25] : memref<1x8x128xf32, #tpu.memory_space<vmem>>, vector<1x8x128xf32>
    %33 = vector.broadcast %arg1 : i32 to vector<8x1xi32>
    %34 = arith.cmpi eq, %31, %33 : vector<8x1xi32>
    %cst_26 = arith.constant 0.000000e+00 : f32
    %35 = vector.shape_cast %34 : vector<8x1xi1> to vector<8x1xi1>
    %36 = vector.broadcast %35 : vector<8x1xi1> to vector<8x128xi1>
    %37 = vector.shape_cast %30 : vector<1x128xf32> to vector<1x128xf32>
    %38 = vector.broadcast %37 : vector<1x128xf32> to vector<8x128xf32>
    %39 = vector.broadcast %cst_26 : f32 to vector<8x128xf32>
    %40 = arith.select %36, %38, %39 : vector<8x128xi1>, vector<8x128xf32>
    %41 = vector.shape_cast %40 : vector<8x128xf32> to vector<1x8x128xf32>
    %42 = arith.addf %32, %41 : vector<1x8x128xf32>
    %c0_27 = arith.constant 0 : index
    %c0_28 = arith.constant 0 : index
    %c0_29 = arith.constant 0 : index
    %43 = vector.load %arg6[%c0_27, %c0_28, %c0_29] : memref<1x8x128xf32, #tpu.memory_space<vmem>>, vector<1x8x128xf32>
    tpu.vector_store %arg6[%c0_27, %c0_28, %c0_29], %42 {strides = array<i32>} : memref<1x8x128xf32, #tpu.memory_space<vmem>>, vector<1x8x128xf32>,
    return
  }
  func.func @transform_0(%arg0: i32, %arg1: i32) -> (i32, i32, i32, i32) {
    %c0_i32 = arith.constant 0 : i32
    %c0_i32_0 = arith.constant 0 : i32
    %c0_i32_1 = arith.constant 0 : i32
    return %arg0, %arg1, %c0_i32, %c0_i32_0 : i32, i32, i32, i32
  }
  func.func @transform_1(%arg0: i32, %arg1: i32) -> (i32, i32) {
    %c0_i32 = arith.constant 0 : i32
    %c0_i32_0 = arith.constant 0 : i32
    %c0_i32_1 = arith.constant 0 : i32
    return %c0_i32, %c0_i32_0 : i32, i32
  }
  func.func @transform_2(%arg0: i32, %arg1: i32) -> (i32, i32) {
    %c0_i32 = arith.constant 0 : i32
    %c0_i32_0 = arith.constant 0 : i32
    %c0_i32_1 = arith.constant 0 : i32
    return %c0_i32, %c0_i32_0 : i32, i32
  }
  func.func @transform_3(%arg0: i32, %arg1: i32) -> (i32, i32, i32, i32) {
    %c0_i32 = arith.constant 0 : i32
    %c0_i32_0 = arith.constant 0 : i32
    %c0_i32_1 = arith.constant 0 : i32
    return %arg0, %arg1, %c0_i32, %c0_i32_0 : i32, i32, i32, i32
  }
  func.func @transform_4(%arg0: i32, %arg1: i32) -> (i32, i32, i32) {
    %c0_i32 = arith.constant 0 : i32
    %c0_i32_0 = arith.constant 0 : i32
    %c0_i32_1 = arith.constant 0 : i32
    return %arg0, %c0_i32, %c0_i32_0 : i32, i32, i32
  }
}

module attributes {stable_mosaic.version = 11 : i64} {
  func.func @combine_kernel(%arg0: i32, %arg1: memref<8x64x128xf32, #tpu.memory_space<vmem>>, %arg2: memref<8x128xf32, #tpu.memory_space<vmem>>, %arg3: memref<8x64x32xf32, #tpu.memory_space<vmem>>) attributes {dimension_semantics = [#tpu.dimension_semantics<parallel>], iteration_bounds = array<i64: 2>, scalar_prefetch = 0 : i64, scratch_operands = 0 : i64, tpu.core_type = #tpu.core_type<tc>, window_params = [{transform_indices = @transform_0, window_bounds = array<i64: 8, 64, 128>}, {transform_indices = @transform_1, window_bounds = array<i64: 8, 128>}, {transform_indices = @transform_2, window_bounds = array<i64: 8, 64, 32>}]} {
    %c0 = arith.constant 0 : index
    %c0_0 = arith.constant 0 : index
    %c0_1 = arith.constant 0 : index
    %0 = vector.load %arg1[%c0, %c0_0, %c0_1] : memref<8x64x128xf32, #tpu.memory_space<vmem>>, vector<8x64x128xf32>
    %c0_2 = arith.constant 0 : index
    %c0_3 = arith.constant 0 : index
    %1 = vector.load %arg2[%c0_2, %c0_3] : memref<8x128xf32, #tpu.memory_space<vmem>>, vector<8x128xf32>
    %2 = vector.shape_cast %1 : vector<8x128xf32> to vector<8x1x128xf32>
    %3 = vector.broadcast %2 : vector<8x1x128xf32> to vector<8x64x128xf32>
    %4 = arith.mulf %0, %3 : vector<8x64x128xf32>
    %5 = vector.extract_strided_slice %4 {offsets = [0, 0, 0], sizes = [8, 64, 32], strides = [1, 1, 1]} : vector<8x64x128xf32> to vector<8x64x32xf32>
    %6 = vector.extract_strided_slice %4 {offsets = [0, 0, 32], sizes = [8, 64, 32], strides = [1, 1, 1]} : vector<8x64x128xf32> to vector<8x64x32xf32>
    %7 = arith.addf %5, %6 : vector<8x64x32xf32>
    %8 = vector.extract_strided_slice %4 {offsets = [0, 0, 64], sizes = [8, 64, 32], strides = [1, 1, 1]} : vector<8x64x128xf32> to vector<8x64x32xf32>
    %9 = arith.addf %7, %8 : vector<8x64x32xf32>
    %10 = vector.extract_strided_slice %4 {offsets = [0, 0, 96], sizes = [8, 64, 32], strides = [1, 1, 1]} : vector<8x64x128xf32> to vector<8x64x32xf32>
    %11 = arith.addf %9, %10 : vector<8x64x32xf32>
    %c0_4 = arith.constant 0 : index
    %c0_5 = arith.constant 0 : index
    %c0_6 = arith.constant 0 : index
    %12 = vector.load %arg3[%c0_4, %c0_5, %c0_6] : memref<8x64x32xf32, #tpu.memory_space<vmem>>, vector<8x64x32xf32>
    tpu.vector_store %arg3[%c0_4, %c0_5, %c0_6], %11 {strides = array<i32>} : memref<8x64x32xf32, #tpu.memory_space<vmem>>, vector<8x64x32xf32>,
    return
  }
  func.func @transform_0(%arg0: i32) -> (i32, i32, i32) {
    %c0_i32 = arith.constant 0 : i32
    %c0_i32_0 = arith.constant 0 : i32
    %c0_i32_1 = arith.constant 0 : i32
    return %arg0, %c0_i32, %c0_i32_0 : i32, i32, i32
  }
  func.func @transform_1(%arg0: i32) -> (i32, i32) {
    %c0_i32 = arith.constant 0 : i32
    %c0_i32_0 = arith.constant 0 : i32
    return %arg0, %c0_i32 : i32, i32
  }
  func.func @transform_2(%arg0: i32) -> (i32, i32, i32) {
    %c0_i32 = arith.constant 0 : i32
    %c0_i32_0 = arith.constant 0 : i32
    %c0_i32_1 = arith.constant 0 : i32
    return %arg0, %c0_i32, %c0_i32_0 : i32, i32, i32
  }
}

</mosaic_0001>

<bundles_post_ra>
// kernel: mul.5
= control target key start
LH: loop header
LB: loop body
LE: loop exit
PB: predicated region body
PF: predicated region fallthrough
CT: control target
= control target key end

     0   :  { %vm22_vm0 = vcmask 64512   ;;  %vm28_vm1 = vcmask 130112   ;;  %s70_s0 = inlined_call_operand.vmem [shape: f32[4,2,8], index: 0, kind: input, shape index: {}]   ;;  %s71_s1 = inlined_call_operand.vmem [shape: f32[4,16], index: 1, kind: output, shape index: {}]  }
   0x1   :  { %v40_v0 = vld [vmem:[%s70_s0 + $0x6] sm:$0x3]  ;;  %v41_v1 = vld [vmem:[%s70_s0 + $0x4] sm:$0x3]  ;;  %v42_v2 = vld [vmem:[%s70_s0 + $0x2] sm:$0x3] }
   0x2   :  { %9 = vst [vmem:[#allocation1 + $0x18] sm:$0x3] %v40_v0  ;;  %14 = vst [vmem:[#allocation1 + $0x10] sm:$0x3] %v41_v1  ;;  %v19_v3 = vld [vmem:[%s70_s0] sm:$0x3] }
   0x3   :  { %18 = vst [vmem:[#allocation1 + $0x8] sm:$0x3] %v42_v2  ;;  %20 = vst [vmem:[#allocation1] sm:$0x3] %v19_v3  ;;  %s44_s0 = smov 8  }
   0xa   :  { %v25_v4 = vld [vmem:[#allocation1 + $0x1] ss:$8 sm:$0xf]   ;;  %v21_v5 = vld [vmem:[#allocation1] ss:$8 sm:$0xf]  }
   0xb   :  { %26 = vrot.lane.b32.xlu0 %v25_v4, %s44_s0  ;;  %23 = vst.msk [vmem:[#allocation0] sm:$0xf] %vm22_vm0, %v21_v5  }
  0x7d   :  { %v27_v6 = vpop.permute.xlu0 %26  }
  0x7e   :  { %29 = vst.msk [vmem:[#allocation0] sm:$0xf] %vm28_vm1, %v27_v6  }
  0x85   :  { %v34_v7 = vld [vmem:[#allocation0] sm:$0xf] }
  0x86   :  { %37 = vst [vmem:[%s71_s1] sm:$0xf] %v34_v7 }

// kernel: sma_forward.2
= control target key start
LH: loop header
LB: loop body
LE: loop exit
PB: predicated region body
PF: predicated region fallthrough
CT: control target
= control target key end

     0   :  { %s2081_s15 = smov 0   ;;  %s2083_s16 = smov 0   ;;  %s2949_s0 = inlined_call_operand.vmem [shape: f32[2,8,64,1568], index: 0, kind: input, shape index: {}]   ;;  %s2950_s1 = inlined_call_operand.vmem [shape: f32[1568,128], index: 1, kind: input, shape index: {}]   ;;  %s2951_s2 = inlined_call_operand.vmem [shape: f32[1,128], index: 2, kind: input, shape index: {}]   ;;  %s2952_s3 = inlined_call_operand.vmem [shape: f32[2,8,64,128], index: 3, kind: output, shape index: {0}]   ;;  %s2953_s4 = inlined_call_operand.vmem [shape: f32[2,8,128], index: 4, kind: output, shape index: {1}]  }
   0x1   :  { %s2085_s17 = smov 0   ;;  %s2087_s18 = smov 0  }
   0x2   :  { %s2089_s19 = smov 0  }
   0x3 LB: > { %s24_s20 = sadd.s32 1, %s2044_s17  ;;  %s27_s21 = sadd.s32 1, %s2048_s18  ;;  %s2052_s19 = sphi %s2089_s19, %s15_s19   ;;  %s2048_s18 = sphi %s2087_s18, %s2981_s18   ;;  %s2044_s17 = sphi %s2085_s17, %s2980_s17   ;;  %s2040_s16 = sphi %s2083_s16, %s2979_s16   ;;  %s2036_s15 = sphi %s2081_s15, %s2978_s15  }
   0x4   : > { %p25_p0 = scmp.ge.s32.totalorder %s24_s20, 8  ;;  %p1568_p1 = scmp.ge.s32.totalorder %s2052_s19, 1 }
   0x5   : > { %p185_p2 = scmp.lt.s32.totalorder %s2052_s19, 17 }
   0x6   : > { %s2983_s20 = smov (%p25_p0, %s24_s20), 0  ;;  %s2985_s21 = smov (!%p25_p0, %s27_s21), %s2048_s18 }
   0x7   : > { %p186_p3 = pnand %p1568_p1, %p185_p2  ;;  %p29_p4 = scmp.ge.s32.totalorder %s2985_s21, 2 }
   0x9   : > { %s2987_s21 = smov (%p29_p4, %s2985_s21), 0  ;;  %189 = sbr.rel (%p186_p3) target bundleno = 442 (0x1ba), region = 32 }
   0xe   : > { %p223_p5 = scmp.lt.s32.totalorder %s2040_s16, 1  ;;  %p225_p6 = scmp.lt.s32.totalorder %s2036_s15, 7 }
   0xf   : > { %p1574_p7 = scmp.ne.s32.totalorder %s2036_s15, 0 }
  0x10   : > { %s2989_s16 = smov (!%p223_p5, %s2040_s16), 1 }
  0x11   : > { %s226_s22 = scalar_select %p225_p6, %s2036_s15, 7 }
  0x12   : > { %s1971_s23 = smul.u32 832, %s2989_s16  ;;  %s1571_s24 = sshll.u32 %s2989_s16, 6 }
  0x13   : > { %s1970_s25 = smul.u32 104, %s226_s22  ;;  %s1570_s26 = sshll.u32 %s226_s22, 3 }
  0x14   : > { %s238_s27 = sadd.s32 %s1571_s24, %s1570_s26  ;;  %s1573_s28 = sshll.u32 %s2989_s16, 3 }
  0x15   : > { %s229_s29 = sadd.s32 %s1971_s23, %s1970_s25  ;;  %s1572_s30 = sshll.u32 %s238_s27, 3 }
  0x16   : > { %s1569_s5 = sshll.u32 %s229_s29, 3  ;;  %s2118_s8 = scalar_lea.vmem %s2952_s3, %s1572_s30 }
  0x17   : > { %s2123_s11 = scalar_lea.vmem %s2949_s0, %s1569_s5  ;;  %s2128_s14 = scalar_lea.vmem %s2953_s4, %s1573_s28 }
  0x18   : > { %248 = sbr.rel (%p1574_p7) target bundleno = 35 (0x23), region = 36 }
  0x1d   : > { %v2054_v0 = vmov 0.0  }
  0x1e   : > { %249 = vst [vmem:[#allocation2 + $0x30] sm:$0xff] %v2054_v0  ;;  %250 = vst [vmem:[#allocation2] sm:$0xff] %v2054_v0 }
  0x1f   : > { %251 = vst [vmem:[#allocation2 + $0x18] sm:$0xff] %v2054_v0  ;;  %252 = vst [vmem:[#allocation2 + $0x10] sm:$0xff] %v2054_v0 }
  0x20   : > { %253 = vst [vmem:[#allocation2 + $0x8] sm:$0xff] %v2054_v0  ;;  %254 = vst [vmem:[#allocation2 + $0x20] sm:$0xff] %v2054_v0 }
  0x21   : > { %255 = vst [vmem:[#allocation2 + $0x28] sm:$0xff] %v2054_v0  ;;  %256 = vst [vmem:[#allocation2 + $0x38] sm:$0xff] %v2054_v0 }
  0x22   : > { %257 = vst [vmem:[%s2128_s14] sm:$0xff] %v2054_v0 }
  0x23 PF: > { %v393_v1 = vld [vmem:[%s2950_s1 + $0xf8] sm:$0xff]  ;;  %v392_v5 = vld [vmem:[%s2950_s1 + $0xf0] sm:$0xff]  ;;  %v391_v9 = vld [vmem:[%s2950_s1 + $0xe8] sm:$0xff]  ;;  %vm565_vm0 = vcmask 261120  }
  0x24   : > { %v425_v2 = vld [vmem:[%s2950_s1 + $0x1f8] sm:$0xff]  ;;  %1594 = vmatprep.subr.mxu0 %v393_v1  ;;  %v424_v6 = vld [vmem:[%s2950_s1 + $0x1f0] sm:$0xff]  ;;  %v423_v10 = vld [vmem:[%s2950_s1 + $0x1e8] sm:$0xff] }
  0x25   : > { %v377_v3 = vld [vmem:[%s2950_s1 + $0x78] sm:$0xff]  ;;  %1650 = vmatprep.subr.mxu1 %v425_v2  ;;  %v376_v7 = vld [vmem:[%s2950_s1 + $0x70] sm:$0xff]  ;;  %v375_v11 = vld [vmem:[%s2950_s1 + $0x68] sm:$0xff] }
  0x26   : > { %v409_v4 = vld [vmem:[%s2950_s1 + $0x178] sm:$0xff]  ;;  %1595 = vmatpush3.msra.mxu0 %v377_v3  ;;  %v408_v8 = vld [vmem:[%s2950_s1 + $0x170] sm:$0xff]  ;;  %v407_v12 = vld [vmem:[%s2950_s1 + $0x168] sm:$0xff] }
  0x27   : > { %1651 = vmatpush3.msra.mxu1 %v409_v4  ;;  %1596 = vmatprep.subr.mxu0 %v392_v5  ;;  %v390_v13 = vld [vmem:[%s2950_s1 + $0xe0] sm:$0xff]  ;;  %v389_v17 = vld [vmem:[%s2950_s1 + $0xd8] sm:$0xff]  ;;  %v388_v21 = vld [vmem:[%s2950_s1 + $0xd0] sm:$0xff] }
  0x28   : > { %1652 = vmatprep.subr.mxu1 %v424_v6  ;;  %1597 = vmatpush3.msra.mxu0 %v376_v7  ;;  %v422_v14 = vld [vmem:[%s2950_s1 + $0x1e0] sm:$0xff]  ;;  %v421_v18 = vld [vmem:[%s2950_s1 + $0x1d8] sm:$0xff]  ;;  %v420_v22 = vld [vmem:[%s2950_s1 + $0x1d0] sm:$0xff] }
  0x29   : > { %1653 = vmatpush3.msra.mxu1 %v408_v8  ;;  %1598 = vmatprep.subr.mxu0 %v391_v9  ;;  %v374_v15 = vld [vmem:[%s2950_s1 + $0x60] sm:$0xff]  ;;  %v373_v19 = vld [vmem:[%s2950_s1 + $0x58] sm:$0xff]  ;;  %v372_v23 = vld [vmem:[%s2950_s1 + $0x50] sm:$0xff] }
  0x2a   : > { %1654 = vmatprep.subr.mxu1 %v423_v10  ;;  %v406_v16 = vld [vmem:[%s2950_s1 + $0x160] sm:$0xff]  ;;  %1599 = vmatpush3.msra.mxu0 %v375_v11  ;;  %v405_v20 = vld [vmem:[%s2950_s1 + $0x158] sm:$0xff]  ;;  %v404_v24 = vld [vmem:[%s2950_s1 + $0x150] sm:$0xff] }
  0x2b   : > { %1655 = vmatpush3.msra.mxu1 %v407_v12  ;;  %1600 = vmatprep.subr.mxu0 %v390_v13  ;;  %v387_v25 = vld [vmem:[%s2950_s1 + $0xc8] sm:$0xff]  ;;  %v386_v29 = vld [vmem:[%s2950_s1 + $0xc0] sm:$0xff]  ;;  %v385_v33 = vld [vmem:[%s2950_s1 + $0xb8] sm:$0xff] }
  0x2c   : > { %1656 = vmatprep.subr.mxu1 %v422_v14  ;;  %1601 = vmatpush3.msra.mxu0 %v374_v15  ;;  %v419_v26 = vld [vmem:[%s2950_s1 + $0x1c8] sm:$0xff]  ;;  %v418_v30 = vld [vmem:[%s2950_s1 + $0x1c0] sm:$0xff]  ;;  %v417_v34 = vld [vmem:[%s2950_s1 + $0x1b8] sm:$0xff] }
  0x2d   : > { %1657 = vmatpush3.msra.mxu1 %v406_v16  ;;  %1602 = vmatprep.subr.mxu0 %v389_v17  ;;  %v371_v27 = vld [vmem:[%s2950_s1 + $0x48] sm:$0xff]  ;;  %v370_v31 = vld [vmem:[%s2950_s1 + $0x40] sm:$0xff]  ;;  %v369_v35 = vld [vmem:[%s2950_s1 + $0x38] sm:$0xff] }
  0x2e   : > { %1658 = vmatprep.subr.mxu1 %v421_v18  ;;  %1603 = vmatpush3.msra.mxu0 %v373_v19  ;;  %v403_v28 = vld [vmem:[%s2950_s1 + $0x148] sm:$0xff]  ;;  %v402_v32 = vld [vmem:[%s2950_s1 + $0x140] sm:$0xff]  ;;  %v401_v36 = vld [vmem:[%s2950_s1 + $0x138] sm:$0xff] }
  0x2f   : > { %1659 = vmatpush3.msra.mxu1 %v405_v20  ;;  %1604 = vmatprep.subr.mxu0 %v388_v21  ;;  %v384_v37 = vld [vmem:[%s2950_s1 + $0xb0] sm:$0xff]  ;;  %v383_v41 = vld [vmem:[%s2950_s1 + $0xa8] sm:$0xff]  ;;  %v382_v45 = vld [vmem:[%s2950_s1 + $0xa0] sm:$0xff] }
  0x30   : > { %1660 = vmatprep.subr.mxu1 %v420_v22  ;;  %1605 = vmatpush3.msra.mxu0 %v372_v23  ;;  %v416_v38 = vld [vmem:[%s2950_s1 + $0x1b0] sm:$0xff]  ;;  %v415_v42 = vld [vmem:[%s2950_s1 + $0x1a8] sm:$0xff]  ;;  %v414_v46 = vld [vmem:[%s2950_s1 + $0x1a0] sm:$0xff] }
  0x31   : > { %1661 = vmatpush3.msra.mxu1 %v404_v24  ;;  %1606 = vmatprep.subr.mxu0 %v387_v25  ;;  %v368_v39 = vld [vmem:[%s2950_s1 + $0x30] sm:$0xff]  ;;  %v367_v43 = vld [vmem:[%s2950_s1 + $0x28] sm:$0xff]  ;;  %v366_v47 = vld [vmem:[%s2950_s1 + $0x20] sm:$0xff] }
  0x32   : > { %1662 = vmatprep.subr.mxu1 %v419_v26  ;;  %1607 = vmatpush3.msra.mxu0 %v371_v27  ;;  %v400_v40 = vld [vmem:[%s2950_s1 + $0x130] sm:$0xff]  ;;  %v399_v44 = vld [vmem:[%s2950_s1 + $0x128] sm:$0xff]  ;;  %v398_v48 = vld [vmem:[%s2950_s1 + $0x120] sm:$0xff] }
  0x33   : > { %1663 = vmatpush3.msra.mxu1 %v403_v28  ;;  %1608 = vmatprep.subr.mxu0 %v386_v29  ;;  %v381_v49 = vld [vmem:[%s2950_s1 + $0x98] sm:$0xff]  ;;  %v380_v53 = vld [vmem:[%s2950_s1 + $0x90] sm:$0xff]  ;;  %v379_v57 = vld [vmem:[%s2950_s1 + $0x88] sm:$0xff] }
  0x34   : > { %1664 = vmatprep.subr.mxu1 %v418_v30  ;;  %1609 = vmatpush3.msra.mxu0 %v370_v31  ;;  %v413_v50 = vld [vmem:[%s2950_s1 + $0x198] sm:$0xff]  ;;  %v412_v54 = vld [vmem:[%s2950_s1 + $0x190] sm:$0xff]  ;;  %v411_v58 = vld [vmem:[%s2950_s1 + $0x188] sm:$0xff] }
  0x35   : > { %1665 = vmatpush3.msra.mxu1 %v402_v32  ;;  %1610 = vmatprep.subr.mxu0 %v385_v33  ;;  %v365_v51 = vld [vmem:[%s2950_s1 + $0x18] sm:$0xff]  ;;  %v364_v55 = vld [vmem:[%s2950_s1 + $0x10] sm:$0xff]  ;;  %v363_v59 = vld [vmem:[%s2950_s1 + $0x8] sm:$0xff] }
  0x36   : > { %1666 = vmatprep.subr.mxu1 %v417_v34  ;;  %1611 = vmatpush3.msra.mxu0 %v369_v35  ;;  %v397_v52 = vld [vmem:[%s2950_s1 + $0x118] sm:$0xff]  ;;  %v396_v56 = vld [vmem:[%s2950_s1 + $0x110] sm:$0xff]  ;;  %v395_v60 = vld [vmem:[%s2950_s1 + $0x108] sm:$0xff] }
  0x37   : > { %1667 = vmatpush3.msra.mxu1 %v401_v36  ;;  %1612 = vmatprep.subr.mxu0 %v384_v37  ;;  %v378_v61 = vld [vmem:[%s2950_s1 + $0x80] sm:$0xff]  ;;  %v259_v0 = vld [vmem:[%s2123_s11 + $0x8] sm:$0xff]  ;;  %v261_v2 = vld [vmem:[%s2123_s11 + $0x18] sm:$0xff] }
  0x38   : > { %1668 = vmatprep.subr.mxu1 %v416_v38  ;;  %1613 = vmatpush3.msra.mxu0 %v368_v39  ;;  %v410_v62 = vld [vmem:[%s2950_s1 + $0x180] sm:$0xff]  ;;  %v260_v4 = vld [vmem:[%s2123_s11 + $0x10] sm:$0xff]  ;;  %v457_v5 = vld [vmem:[%s2950_s1 + $0x2f8] sm:$0xff] }
  0x39   : > { %1669 = vmatpush3.msra.mxu1 %v400_v40  ;;  %1614 = vmatprep.subr.mxu0 %v383_v41  ;;  %v362_v63 = vld [vmem:[%s2950_s1] sm:$0xff]  ;;  %v489_v6 = vld [vmem:[%s2950_s1 + $0x3f8] sm:$0xff]  ;;  %v456_v9 = vld [vmem:[%s2950_s1 + $0x2f0] sm:$0xff] }
  0x3a   : > { %1670 = vmatprep.subr.mxu1 %v415_v42  ;;  %1615 = vmatpush3.msra.mxu0 %v367_v43  ;;  %v394_v1 = vld [vmem:[%s2950_s1 + $0x100] sm:$0xff]  ;;  %v441_v7 = vld [vmem:[%s2950_s1 + $0x278] sm:$0xff]  ;;  %v488_v10 = vld [vmem:[%s2950_s1 + $0x3f0] sm:$0xff] }
  0x3b   : > { %1671 = vmatpush3.msra.mxu1 %v399_v44  ;;  %1616 = vmatprep.subr.mxu0 %v382_v45  ;;  %v258_v3 = vld [vmem:[%s2123_s11] sm:$0xff]  ;;  %v473_v8 = vld [vmem:[%s2950_s1 + $0x378] sm:$0xff]  ;;  %v272_v11 = vld [vmem:[%s2123_s11 + $0x70] sm:$0xff] }
  0x3c   : > { %1672 = vmatprep.subr.mxu1 %v414_v46  ;;  %1617 = vmatpush3.msra.mxu0 %v366_v47  ;;  %v274_v12 = vld [vmem:[%s2123_s11 + $0x80] sm:$0xff]  ;;  %v440_v13 = vld [vmem:[%s2950_s1 + $0x270] sm:$0xff]  ;;  %v271_v15 = vld [vmem:[%s2123_s11 + $0x68] sm:$0xff] }
  0x3d   : > { %1673 = vmatpush3.msra.mxu1 %v398_v48  ;;  %1618 = vmatprep.subr.mxu0 %v381_v49  ;;  %v472_v14 = vld [vmem:[%s2950_s1 + $0x370] sm:$0xff]  ;;  %v273_v16 = vld [vmem:[%s2123_s11 + $0x78] sm:$0xff]  ;;  %v455_v17 = vld [vmem:[%s2950_s1 + $0x2e8] sm:$0xff] }
  0x3e   : > { %1674 = vmatprep.subr.mxu1 %v413_v50  ;;  %1619 = vmatpush3.msra.mxu0 %v365_v51  ;;  %v487_v18 = vld [vmem:[%s2950_s1 + $0x3e8] sm:$0xff]  ;;  %v454_v21 = vld [vmem:[%s2950_s1 + $0x2e0] sm:$0xff]  ;;  %v285_v23 = vld [vmem:[%s2123_s11 + $0xd8] sm:$0xff] }
  0x3f   : > { %1675 = vmatpush3.msra.mxu1 %v397_v52  ;;  %1620 = vmatprep.subr.mxu0 %v380_v53  ;;  %v439_v19 = vld [vmem:[%s2950_s1 + $0x268] sm:$0xff]  ;;  %v486_v22 = vld [vmem:[%s2950_s1 + $0x3e0] sm:$0xff]  ;;  %v284_v27 = vld [vmem:[%s2123_s11 + $0xd0] sm:$0xff] }
  0x40   : > { %1676 = vmatprep.subr.mxu1 %v412_v54  ;;  %1621 = vmatpush3.msra.mxu0 %v364_v55  ;;  %v471_v20 = vld [vmem:[%s2950_s1 + $0x368] sm:$0xff]  ;;  %v438_v25 = vld [vmem:[%s2950_s1 + $0x260] sm:$0xff]  ;;  %v453_v29 = vld [vmem:[%s2950_s1 + $0x2d8] sm:$0xff] }
  0x41   : > { %1677 = vmatpush3.msra.mxu1 %v396_v56  ;;  %1622 = vmatprep.subr.mxu0 %v379_v57  ;;  %v287_v24 = vld [vmem:[%s2123_s11 + $0xe8] sm:$0xff]  ;;  %v470_v26 = vld [vmem:[%s2950_s1 + $0x360] sm:$0xff]  ;;  %v485_v30 = vld [vmem:[%s2950_s1 + $0x3d8] sm:$0xff] }
  0x42   : > { %1678 = vmatprep.subr.mxu1 %v411_v58  ;;  %1623 = vmatpush3.msra.mxu0 %v363_v59  ;;  %v286_v28 = vld [vmem:[%s2123_s11 + $0xe0] sm:$0xff]  ;;  %v437_v31 = vld [vmem:[%s2950_s1 + $0x258] sm:$0xff]  ;;  %v452_v33 = vld [vmem:[%s2950_s1 + $0x2d0] sm:$0xff] }
  0x43   : > { %1679 = vmatpush3.msra.mxu1 %v395_v60  ;;  %1624 = vmatprep.subr.mxu0 %v378_v61  ;;  %v469_v32 = vld [vmem:[%s2950_s1 + $0x358] sm:$0xff]  ;;  %v484_v34 = vld [vmem:[%s2950_s1 + $0x3d0] sm:$0xff]  ;;  %v298_v35 = vld [vmem:[%s2123_s11 + $0x140] sm:$0xff] }
  0x44   : > { %1680 = vmatprep.subr.mxu1 %v410_v62  ;;  %1625 = vmatpush3.msra.mxu0 %v362_v63  ;;  %v300_v36 = vld [vmem:[%s2123_s11 + $0x150] sm:$0xff]  ;;  %v297_v39 = vld [vmem:[%s2123_s11 + $0x138] sm:$0xff]  ;;  %v299_v40 = vld [vmem:[%s2123_s11 + $0x148] sm:$0xff] }
  0x45   : > { %654 = vmatprep.mubr.f32.mxu0 %v259_v0  ;;  %1681 = vmatpush3.msra.mxu1 %v394_v1  ;;  %v436_v37 = vld [vmem:[%s2950_s1 + $0x250] sm:$0xff]  ;;  %v451_v41 = vld [vmem:[%s2950_s1 + $0x2c8] sm:$0xff]  ;;  %v450_v45 = vld [vmem:[%s2950_s1 + $0x2c0] sm:$0xff] }
  0x46   : > { %759 = vmatprep.mubr.f32.mxu1 %v261_v2  ;;  %655 = vmatmul.mubr.f32.vlgmr.msra.gmra.mxu0 %v258_v3  ;;  %v468_v38 = vld [vmem:[%s2950_s1 + $0x350] sm:$0xff]  ;;  %v483_v42 = vld [vmem:[%s2950_s1 + $0x3c8] sm:$0xff]  ;;  %v482_v46 = vld [vmem:[%s2950_s1 + $0x3c0] sm:$0xff] }
  0x47   : > { %760 = vmatmul.mubr.f32.vlgmr.msra.gmra.mxu1 %v260_v4  ;;  %1706 = vmatprep.subr.mxu0 %v457_v5  ;;  %v435_v43 = vld [vmem:[%s2950_s1 + $0x248] sm:$0xff]  ;;  %v313_v48 = vld [vmem:[%s2123_s11 + $0x1b8] sm:$0xff]  ;;  %v434_v49 = vld [vmem:[%s2950_s1 + $0x240] sm:$0xff] }
  0x48   : > { %1762 = vmatprep.subr.mxu1 %v489_v6  ;;  %1707 = vmatpush3.msra.mxu0 %v441_v7  ;;  %v467_v44 = vld [vmem:[%s2950_s1 + $0x348] sm:$0xff]  ;;  %v466_v50 = vld [vmem:[%s2950_s1 + $0x340] sm:$0xff]  ;;  %v312_v52 = vld [vmem:[%s2123_s11 + $0x1b0] sm:$0xff] }
  0x49   : > { %1763 = vmatpush3.msra.mxu1 %v473_v8  ;;  %1708 = vmatprep.subr.mxu0 %v456_v9  ;;  %v311_v47 = vld [vmem:[%s2123_s11 + $0x1a8] sm:$0xff]  ;;  %v310_v51 = vld [vmem:[%s2123_s11 + $0x1a0] sm:$0xff]  ;;  %v449_v53 = vld [vmem:[%s2950_s1 + $0x2b8] sm:$0xff] }
  0x4a   : > { %1764 = vmatprep.subr.mxu1 %v488_v10  ;;  %659 = vmatprep.mubr.f32.mxu0 %v272_v11  ;;  %v481_v54 = vld [vmem:[%s2950_s1 + $0x3b8] sm:$0xff]  ;;  %v448_v57 = vld [vmem:[%s2950_s1 + $0x2b0] sm:$0xff]  ;;  %v326_v60 = vld [vmem:[%s2123_s11 + $0x220] sm:$0xff] }
  0x4b   : > { %764 = vmatprep.mubr.f32.mxu1 %v274_v12  ;;  %1709 = vmatpush3.msra.mxu0 %v440_v13  ;;  %v433_v55 = vld [vmem:[%s2950_s1 + $0x238] sm:$0xff]  ;;  %v480_v58 = vld [vmem:[%s2950_s1 + $0x3b0] sm:$0xff]  ;;  %v323_v63 = vld [vmem:[%s2123_s11 + $0x208] sm:$0xff] }
  0x4c   : > { %1765 = vmatpush3.msra.mxu1 %v472_v14  ;;  %660 = vmatmul.mubr.f32.gmra.mxu0 %v271_v15  ;;  %v465_v56 = vld [vmem:[%s2950_s1 + $0x338] sm:$0xff]  ;;  %v324_v59 = vld [vmem:[%s2123_s11 + $0x210] sm:$0xff]  ;;  %v447_v1 = vld [vmem:[%s2950_s1 + $0x2a8] sm:$0xff] }
  0x4d   : > { %765 = vmatmul.mubr.f32.gmra.mxu1 %v273_v16  ;;  %1710 = vmatprep.subr.mxu0 %v455_v17  ;;  %v432_v61 = vld [vmem:[%s2950_s1 + $0x230] sm:$0xff]  ;;  %v325_v0 = vld [vmem:[%s2123_s11 + $0x218] sm:$0xff]  ;;  %v479_v2 = vld [vmem:[%s2950_s1 + $0x3a8] sm:$0xff] }
  0x4e   : > { %1766 = vmatprep.subr.mxu1 %v487_v18  ;;  %1711 = vmatpush3.msra.mxu0 %v439_v19  ;;  %v464_v62 = vld [vmem:[%s2950_s1 + $0x330] sm:$0xff]  ;;  %v431_v3 = vld [vmem:[%s2950_s1 + $0x228] sm:$0xff]  ;;  %v446_v5 = vld [vmem:[%s2950_s1 + $0x2a0] sm:$0xff] }
  0x4f   : > { %1767 = vmatpush3.msra.mxu1 %v471_v20  ;;  %1712 = vmatprep.subr.mxu0 %v454_v21  ;;  %v463_v4 = vld [vmem:[%s2950_s1 + $0x328] sm:$0xff]  ;;  %v478_v6 = vld [vmem:[%s2950_s1 + $0x3a0] sm:$0xff]  ;;  %v337_v7 = vld [vmem:[%s2123_s11 + $0x278] sm:$0xff] }
  0x50   : > { %1768 = vmatprep.subr.mxu1 %v486_v22  ;;  %664 = vmatprep.mubr.f32.mxu0 %v285_v23  ;;  %v339_v8 = vld [vmem:[%s2123_s11 + $0x288] sm:$0xff]  ;;  %v430_v9 = vld [vmem:[%s2950_s1 + $0x220] sm:$0xff]  ;;  %v336_v11 = vld [vmem:[%s2123_s11 + $0x270] sm:$0xff] }
  0x51   : > { %769 = vmatprep.mubr.f32.mxu1 %v287_v24  ;;  %1713 = vmatpush3.msra.mxu0 %v438_v25  ;;  %v462_v10 = vld [vmem:[%s2950_s1 + $0x320] sm:$0xff]  ;;  %v445_v13 = vld [vmem:[%s2950_s1 + $0x298] sm:$0xff]  ;;  %v444_v17 = vld [vmem:[%s2950_s1 + $0x290] sm:$0xff] }
  0x52   : > { %1769 = vmatpush3.msra.mxu1 %v470_v26  ;;  %665 = vmatmul.mubr.f32.gmra.mxu0 %v284_v27  ;;  %v338_v12 = vld [vmem:[%s2123_s11 + $0x280] sm:$0xff]  ;;  %v477_v14 = vld [vmem:[%s2950_s1 + $0x398] sm:$0xff]  ;;  %v476_v18 = vld [vmem:[%s2950_s1 + $0x390] sm:$0xff] }
  0x53   : > { %770 = vmatmul.mubr.f32.gmra.mxu1 %v286_v28  ;;  %1714 = vmatprep.subr.mxu0 %v453_v29  ;;  %v429_v15 = vld [vmem:[%s2950_s1 + $0x218] sm:$0xff]  ;;  %v350_v19 = vld [vmem:[%s2123_s11 + $0x2e0] sm:$0xff]  ;;  %v352_v20 = vld [vmem:[%s2123_s11 + $0x2f0] sm:$0xff] }
  0x54   : > { %1770 = vmatprep.subr.mxu1 %v485_v30  ;;  %1715 = vmatpush3.msra.mxu0 %v437_v31  ;;  %v461_v16 = vld [vmem:[%s2950_s1 + $0x318] sm:$0xff]  ;;  %v428_v21 = vld [vmem:[%s2950_s1 + $0x210] sm:$0xff]  ;;  %v351_v24 = vld [vmem:[%s2123_s11 + $0x2e8] sm:$0xff] }
  0x55   : > { %1771 = vmatpush3.msra.mxu1 %v469_v32  ;;  %1716 = vmatprep.subr.mxu0 %v452_v33  ;;  %v460_v22 = vld [vmem:[%s2950_s1 + $0x310] sm:$0xff]  ;;  %v349_v23 = vld [vmem:[%s2123_s11 + $0x2d8] sm:$0xff]  ;;  %v443_v25 = vld [vmem:[%s2950_s1 + $0x288] sm:$0xff] }
  0x56   : > { %1772 = vmatprep.subr.mxu1 %v484_v34  ;;  %669 = vmatprep.mubr.f32.mxu0 %v298_v35  ;;  %v475_v26 = vld [vmem:[%s2950_s1 + $0x388] sm:$0xff]  ;;  %v442_v29 = vld [vmem:[%s2950_s1 + $0x280] sm:$0xff]  ;;  %v265_v34 = vld [vmem:[%s2123_s11 + $0x38] sm:$0xff] }
  0x57   : > { %774 = vmatprep.mubr.f32.mxu1 %v300_v36  ;;  %1717 = vmatpush3.msra.mxu0 %v436_v37  ;;  %v427_v27 = vld [vmem:[%s2950_s1 + $0x208] sm:$0xff]  ;;  %v474_v30 = vld [vmem:[%s2950_s1 + $0x380] sm:$0xff]  ;;  %v264_v36 = vld [vmem:[%s2123_s11 + $0x30] sm:$0xff] }
  0x58   : > { %1773 = vmatpush3.msra.mxu1 %v468_v38  ;;  %670 = vmatmul.mubr.f32.gmra.mxu0 %v297_v39  ;;  %v459_v28 = vld [vmem:[%s2950_s1 + $0x308] sm:$0xff]  ;;  %v426_v31 = vld [vmem:[%s2950_s1 + $0x200] sm:$0xff]  ;;  %v521_v37 = vld [vmem:[%s2950_s1 + $0x4f8] sm:$0xff] }
  0x59   : > { %775 = vmatmul.mubr.f32.gmra.mxu1 %v299_v40  ;;  %1718 = vmatprep.subr.mxu0 %v451_v41  ;;  %v263_v32 = vld [vmem:[%s2123_s11 + $0x28] sm:$0xff]  ;;  %v458_v33 = vld [vmem:[%s2950_s1 + $0x300] sm:$0xff]  ;;  %v553_v38 = vld [vmem:[%s2950_s1 + $0x5f8] sm:$0xff] }
  0x5a   : > { %1774 = vmatprep.subr.mxu1 %v483_v42  ;;  %1719 = vmatpush3.msra.mxu0 %v435_v43  ;;  %v262_v35 = vld [vmem:[%s2123_s11 + $0x20] sm:$0xff]  ;;  %v505_v39 = vld [vmem:[%s2950_s1 + $0x478] sm:$0xff]  ;;  %v520_v41 = vld [vmem:[%s2950_s1 + $0x4f0] sm:$0xff] }
  0x5b   : > { %1775 = vmatpush3.msra.mxu1 %v467_v44  ;;  %1720 = vmatprep.subr.mxu0 %v450_v45  ;;  %v537_v40 = vld [vmem:[%s2950_s1 + $0x578] sm:$0xff]  ;;  %v552_v42 = vld [vmem:[%s2950_s1 + $0x5f0] sm:$0xff]  ;;  %v278_v44 = vld [vmem:[%s2123_s11 + $0xa0] sm:$0xff] }
  0x5c   : > { %1776 = vmatprep.subr.mxu1 %v482_v46  ;;  %674 = vmatprep.mubr.f32.mxu0 %v311_v47  ;;  %v276_v43 = vld [vmem:[%s2123_s11 + $0x90] sm:$0xff]  ;;  %v275_v47 = vld [vmem:[%s2123_s11 + $0x88] sm:$0xff] }
  0x5d   : > { %779 = vmatprep.mubr.f32.mxu1 %v313_v48  ;;  %1721 = vmatpush3.msra.mxu0 %v434_v49  ;;  %v504_v45 = vld [vmem:[%s2950_s1 + $0x470] sm:$0xff]  ;;  %v277_v48 = vld [vmem:[%s2123_s11 + $0x98] sm:$0xff]  ;;  %v519_v49 = vld [vmem:[%s2950_s1 + $0x4e8] sm:$0xff] }
  0x5e   : > { %1777 = vmatpush3.msra.mxu1 %v466_v50  ;;  %675 = vmatmul.mubr.f32.gmra.mxu0 %v310_v51  ;;  %v536_v46 = vld [vmem:[%s2950_s1 + $0x570] sm:$0xff]  ;;  %v551_v50 = vld [vmem:[%s2950_s1 + $0x5e8] sm:$0xff] }
  0x5f   : > { %780 = vmatmul.mubr.f32.gmra.mxu1 %v312_v52  ;;  %1722 = vmatprep.subr.mxu0 %v449_v53  ;;  %v503_v51 = vld [vmem:[%s2950_s1 + $0x468] sm:$0xff]  ;;  %v518_v53 = vld [vmem:[%s2950_s1 + $0x4e0] sm:$0xff] }
  0x60   : > { %1778 = vmatprep.subr.mxu1 %v481_v54  ;;  %1723 = vmatpush3.msra.mxu0 %v433_v55  ;;  %v535_v52 = vld [vmem:[%s2950_s1 + $0x568] sm:$0xff]  ;;  %v550_v54 = vld [vmem:[%s2950_s1 + $0x5e0] sm:$0xff]  ;;  %v289_v55 = vld [vmem:[%s2123_s11 + $0xf8] sm:$0xff] }
  0x61   : > { %1779 = vmatpush3.msra.mxu1 %v465_v56  ;;  %1724 = vmatprep.subr.mxu0 %v448_v57  ;;  %v291_v56 = vld [vmem:[%s2123_s11 + $0x108] sm:$0xff]  ;;  %v502_v57 = vld [vmem:[%s2950_s1 + $0x460] sm:$0xff] }
  0x62   : > { %1780 = vmatprep.subr.mxu1 %v480_v58  ;;  %679 = vmatprep.mubr.f32.mxu0 %v324_v59  ;;  %v534_v58 = vld [vmem:[%s2950_s1 + $0x560] sm:$0xff]  ;;  %v288_v59 = vld [vmem:[%s2123_s11 + $0xf0] sm:$0xff] }
  0x63   : > { %784 = vmatprep.mubr.f32.mxu1 %v326_v60  ;;  %1725 = vmatpush3.msra.mxu0 %v432_v61  ;;  %v290_v60 = vld [vmem:[%s2123_s11 + $0x100] sm:$0xff]  ;;  %v517_v61 = vld [vmem:[%s2950_s1 + $0x4d8] sm:$0xff] }
  0x64   : > { %1781 = vmatpush3.msra.mxu1 %v464_v62  ;;  %680 = vmatmul.mubr.f32.gmra.mxu0 %v323_v63  ;;  %v549_v62 = vld [vmem:[%s2950_s1 + $0x5d8] sm:$0xff] }
  0x65   : > { %785 = vmatmul.mubr.f32.gmra.mxu1 %v325_v0  ;;  %1726 = vmatprep.subr.mxu0 %v447_v1  ;;  %v501_v63 = vld [vmem:[%s2950_s1 + $0x458] sm:$0xff]  ;;  %v516_v1 = vld [vmem:[%s2950_s1 + $0x4d0] sm:$0xff] }
  0x66   : > { %1782 = vmatprep.subr.mxu1 %v479_v2  ;;  %1727 = vmatpush3.msra.mxu0 %v431_v3  ;;  %v533_v0 = vld [vmem:[%s2950_s1 + $0x558] sm:$0xff]  ;;  %v548_v2 = vld [vmem:[%s2950_s1 + $0x5d0] sm:$0xff]  ;;  %v302_v3 = vld [vmem:[%s2123_s11 + $0x160] sm:$0xff] }
  0x67   : > { %1783 = vmatpush3.msra.mxu1 %v463_v4  ;;  %1728 = vmatprep.subr.mxu0 %v446_v5  ;;  %v304_v4 = vld [vmem:[%s2123_s11 + $0x170] sm:$0xff] }
  0x68   : > { %1784 = vmatprep.subr.mxu1 %v478_v6  ;;  %684 = vmatprep.mubr.f32.mxu0 %v337_v7  ;;  %v500_v5 = vld [vmem:[%s2950_s1 + $0x450] sm:$0xff]  ;;  %v301_v7 = vld [vmem:[%s2123_s11 + $0x158] sm:$0xff] }
  0x69   : > { %789 = vmatprep.mubr.f32.mxu1 %v339_v8  ;;  %1729 = vmatpush3.msra.mxu0 %v430_v9  ;;  %v532_v6 = vld [vmem:[%s2950_s1 + $0x550] sm:$0xff]  ;;  %v303_v8 = vld [vmem:[%s2123_s11 + $0x168] sm:$0xff] }
  0x6a   : > { %1785 = vmatpush3.msra.mxu1 %v462_v10  ;;  %685 = vmatmul.mubr.f32.gmra.mxu0 %v336_v11  ;;  %v515_v9 = vld [vmem:[%s2950_s1 + $0x4c8] sm:$0xff] }
  0x6b   : > { %790 = vmatmul.mubr.f32.gmra.mxu1 %v338_v12  ;;  %1730 = vmatprep.subr.mxu0 %v445_v13  ;;  %v547_v10 = vld [vmem:[%s2950_s1 + $0x5c8] sm:$0xff]  ;;  %v514_v13 = vld [vmem:[%s2950_s1 + $0x4c0] sm:$0xff] }
  0x6c   : > { %1786 = vmatprep.subr.mxu1 %v477_v14  ;;  %1731 = vmatpush3.msra.mxu0 %v429_v15  ;;  %v499_v11 = vld [vmem:[%s2950_s1 + $0x448] sm:$0xff]  ;;  %v546_v14 = vld [vmem:[%s2950_s1 + $0x5c0] sm:$0xff] }
  0x6d   : > { %1787 = vmatpush3.msra.mxu1 %v461_v16  ;;  %1732 = vmatprep.subr.mxu0 %v444_v17  ;;  %v531_v12 = vld [vmem:[%s2950_s1 + $0x548] sm:$0xff]  ;;  %v317_v16 = vld [vmem:[%s2123_s11 + $0x1d8] sm:$0xff]  ;;  %v498_v17 = vld [vmem:[%s2950_s1 + $0x440] sm:$0xff] }
  0x6e   : > { %1788 = vmatprep.subr.mxu1 %v476_v18  ;;  %689 = vmatprep.mubr.f32.mxu0 %v350_v19  ;;  %v315_v15 = vld [vmem:[%s2123_s11 + $0x1c8] sm:$0xff]  ;;  %v530_v18 = vld [vmem:[%s2950_s1 + $0x540] sm:$0xff] }
  0x6f   : > { %794 = vmatprep.mubr.f32.mxu1 %v352_v20  ;;  %1733 = vmatpush3.msra.mxu0 %v428_v21  ;;  %v314_v19 = vld [vmem:[%s2123_s11 + $0x1c0] sm:$0xff]  ;;  %v316_v20 = vld [vmem:[%s2123_s11 + $0x1d0] sm:$0xff]  ;;  %v513_v21 = vld [vmem:[%s2950_s1 + $0x4b8] sm:$0xff] }
  0x70   : > { %1789 = vmatpush3.msra.mxu1 %v460_v22  ;;  %690 = vmatmul.mubr.f32.gmra.mxu0 %v349_v23  ;;  %v545_v22 = vld [vmem:[%s2950_s1 + $0x5b8] sm:$0xff] }
  0x71   : > { %795 = vmatmul.mubr.f32.gmra.mxu1 %v351_v24  ;;  %1734 = vmatprep.subr.mxu0 %v443_v25  ;;  %v497_v23 = vld [vmem:[%s2950_s1 + $0x438] sm:$0xff]  ;;  %v512_v25 = vld [vmem:[%s2950_s1 + $0x4b0] sm:$0xff] }
  0x72   : > { %1790 = vmatprep.subr.mxu1 %v475_v26  ;;  %1735 = vmatpush3.msra.mxu0 %v427_v27  ;;  %v529_v24 = vld [vmem:[%s2950_s1 + $0x538] sm:$0xff]  ;;  %v544_v26 = vld [vmem:[%s2950_s1 + $0x5b0] sm:$0xff] }
  0x73   : > { %1791 = vmatpush3.msra.mxu1 %v459_v28  ;;  %1736 = vmatprep.subr.mxu0 %v442_v29  ;;  %v328_v27 = vld [vmem:[%s2123_s11 + $0x230] sm:$0xff]  ;;  %v330_v28 = vld [vmem:[%s2123_s11 + $0x240] sm:$0xff] }
  0x74   : > { %1792 = vmatprep.subr.mxu1 %v474_v30  ;;  %1737 = vmatpush3.msra.mxu0 %v426_v31  ;;  %v496_v29 = vld [vmem:[%s2950_s1 + $0x430] sm:$0xff]  ;;  %v327_v31 = vld [vmem:[%s2123_s11 + $0x228] sm:$0xff] }
  0x75   : > { %864 = vmatprep.mubr.f32.mxu0 %v263_v32  ;;  %1793 = vmatpush3.msra.mxu1 %v458_v33  ;;  %v528_v30 = vld [vmem:[%s2950_s1 + $0x530] sm:$0xff]  ;;  %v329_v32 = vld [vmem:[%s2123_s11 + $0x238] sm:$0xff]  ;;  %v511_v33 = vld [vmem:[%s2950_s1 + $0x4a8] sm:$0xff] }
  0x76   : > { %969 = vmatprep.mubr.f32.mxu1 %v265_v34  ;;  %865 = vmatmul.mubr.f32.vlgmr.msra.gmra.mxu0 %v262_v35  ;;  %v543_v34 = vld [vmem:[%s2950_s1 + $0x5a8] sm:$0xff] }
  0x77   : > { %970 = vmatmul.mubr.f32.vlgmr.msra.gmra.mxu1 %v264_v36  ;;  %1818 = vmatprep.subr.mxu0 %v521_v37  ;;  %v495_v35 = vld [vmem:[%s2950_s1 + $0x428] sm:$0xff]  ;;  %v510_v37 = vld [vmem:[%s2950_s1 + $0x4a0] sm:$0xff] }
  0x78   : > { %1874 = vmatprep.subr.mxu1 %v553_v38  ;;  %1819 = vmatpush3.msra.mxu0 %v505_v39  ;;  %v527_v36 = vld [vmem:[%s2950_s1 + $0x528] sm:$0xff]  ;;  %v542_v38 = vld [vmem:[%s2950_s1 + $0x5a0] sm:$0xff]  ;;  %v341_v39 = vld [vmem:[%s2123_s11 + $0x298] sm:$0xff] }
  0x79   : > { %1875 = vmatpush3.msra.mxu1 %v537_v40  ;;  %1820 = vmatprep.subr.mxu0 %v520_v41  ;;  %v343_v40 = vld [vmem:[%s2123_s11 + $0x2a8] sm:$0xff]  ;;  %v494_v41 = vld [vmem:[%s2950_s1 + $0x420] sm:$0xff] }
  0x7a   : > { %1876 = vmatprep.subr.mxu1 %v552_v42  ;;  %869 = vmatprep.mubr.f32.mxu0 %v276_v43  ;;  %v526_v42 = vld [vmem:[%s2950_s1 + $0x520] sm:$0xff]  ;;  %v340_v43 = vld [vmem:[%s2123_s11 + $0x290] sm:$0xff] }
  0x7b   : > { %974 = vmatprep.mubr.f32.mxu1 %v278_v44  ;;  %1821 = vmatpush3.msra.mxu0 %v504_v45  ;;  %v342_v44 = vld [vmem:[%s2123_s11 + $0x2a0] sm:$0xff]  ;;  %v509_v45 = vld [vmem:[%s2950_s1 + $0x498] sm:$0xff] }
  0x7c   : > { %1877 = vmatpush3.msra.mxu1 %v536_v46  ;;  %870 = vmatmul.mubr.f32.gmra.mxu0 %v275_v47  ;;  %v541_v46 = vld [vmem:[%s2950_s1 + $0x598] sm:$0xff] }
  0x7d   : > { %975 = vmatmul.mubr.f32.gmra.mxu1 %v277_v48  ;;  %1822 = vmatprep.subr.mxu0 %v519_v49  ;;  %v493_v47 = vld [vmem:[%s2950_s1 + $0x418] sm:$0xff]  ;;  %v508_v49 = vld [vmem:[%s2950_s1 + $0x490] sm:$0xff] }
  0x7e   : > { %1878 = vmatprep.subr.mxu1 %v551_v50  ;;  %1823 = vmatpush3.msra.mxu0 %v503_v51  ;;  %v525_v48 = vld [vmem:[%s2950_s1 + $0x518] sm:$0xff]  ;;  %v540_v50 = vld [vmem:[%s2950_s1 + $0x590] sm:$0xff]  ;;  %v354_v51 = vld [vmem:[%s2123_s11 + $0x300] sm:$0xff] }
  0x7f   : > { %1879 = vmatpush3.msra.mxu1 %v535_v52  ;;  %1824 = vmatprep.subr.mxu0 %v518_v53  ;;  %v356_v52 = vld [vmem:[%s2123_s11 + $0x310] sm:$0xff] }
  0x80   : > { %1880 = vmatprep.subr.mxu1 %v550_v54  ;;  %874 = vmatprep.mubr.f32.mxu0 %v289_v55  ;;  %v492_v53 = vld [vmem:[%s2950_s1 + $0x410] sm:$0xff]  ;;  %v353_v55 = vld [vmem:[%s2123_s11 + $0x2f8] sm:$0xff] }
  0x81   : > { %979 = vmatprep.mubr.f32.mxu1 %v291_v56  ;;  %1825 = vmatpush3.msra.mxu0 %v502_v57  ;;  %v524_v54 = vld [vmem:[%s2950_s1 + $0x510] sm:$0xff]  ;;  %v355_v56 = vld [vmem:[%s2123_s11 + $0x308] sm:$0xff] }
  0x82   : > { %1881 = vmatpush3.msra.mxu1 %v534_v58  ;;  %875 = vmatmul.mubr.f32.gmra.mxu0 %v288_v59  ;;  %v507_v57 = vld [vmem:[%s2950_s1 + $0x488] sm:$0xff] }
  0x83   : > { %980 = vmatmul.mubr.f32.gmra.mxu1 %v290_v60  ;;  %1826 = vmatprep.subr.mxu0 %v517_v61  ;;  %v539_v58 = vld [vmem:[%s2950_s1 + $0x588] sm:$0xff]  ;;  %v506_v61 = vld [vmem:[%s2950_s1 + $0x480] sm:$0xff] }
  0x84   : > { %1882 = vmatprep.subr.mxu1 %v549_v62  ;;  %1827 = vmatpush3.msra.mxu0 %v501_v63  ;;  %v491_v59 = vld [vmem:[%s2950_s1 + $0x408] sm:$0xff]  ;;  %v538_v62 = vld [vmem:[%s2950_s1 + $0x580] sm:$0xff] }
  0x85   : > { %1883 = vmatpush3.msra.mxu1 %v533_v0  ;;  %1828 = vmatprep.subr.mxu0 %v516_v1  ;;  %v523_v60 = vld [vmem:[%s2950_s1 + $0x508] sm:$0xff]  ;;  %v490_v63 = vld [vmem:[%s2950_s1 + $0x400] sm:$0xff] }
  0x86   : > { %1884 = vmatprep.subr.mxu1 %v548_v2  ;;  %879 = vmatprep.mubr.f32.mxu0 %v302_v3  ;;  %v267_v0 = vld [vmem:[%s2123_s11 + $0x48] sm:$0xff]  ;;  %v522_v1 = vld [vmem:[%s2950_s1 + $0x500] sm:$0xff]  ;;  %v269_v2 = vld [vmem:[%s2123_s11 + $0x58] sm:$0xff] }
  0x87   : > { %984 = vmatprep.mubr.f32.mxu1 %v304_v4  ;;  %1829 = vmatpush3.msra.mxu0 %v500_v5  ;;  %v266_v3 = vld [vmem:[%s2123_s11 + $0x40] sm:$0xff]  ;;  %v268_v4 = vld [vmem:[%s2123_s11 + $0x50] sm:$0xff]  ;;  %v557_v5 = vld [vmem:[%s2950_s1 + $0x618] sm:$0xff] }
  0x88   : > { %1885 = vmatpush3.msra.mxu1 %v532_v6  ;;  %880 = vmatmul.mubr.f32.gmra.mxu0 %v301_v7  ;;  %v280_v6 = vld [vmem:[%s2123_s11 + $0xb0] sm:$0xff]  ;;  %v282_v7 = vld [vmem:[%s2123_s11 + $0xc0] sm:$0xff] }
  0x89   : > { %985 = vmatmul.mubr.f32.gmra.mxu1 %v303_v8  ;;  %1830 = vmatprep.subr.mxu0 %v515_v9  ;;  %v556_v8 = vld [vmem:[%s2950_s1 + $0x610] sm:$0xff]  ;;  %v279_v9 = vld [vmem:[%s2123_s11 + $0xa8] sm:$0xff] }
  0x8a   : > { %1886 = vmatprep.subr.mxu1 %v547_v10  ;;  %1831 = vmatpush3.msra.mxu0 %v499_v11  ;;  %v281_v10 = vld [vmem:[%s2123_s11 + $0xb8] sm:$0xff] }
  0x8b   : > { %1887 = vmatpush3.msra.mxu1 %v531_v12  ;;  %1832 = vmatprep.subr.mxu0 %v514_v13  ;;  %v293_v11 = vld [vmem:[%s2123_s11 + $0x118] sm:$0xff]  ;;  %v295_v12 = vld [vmem:[%s2123_s11 + $0x128] sm:$0xff] }
  0x8c   : > { %1888 = vmatprep.subr.mxu1 %v546_v14  ;;  %884 = vmatprep.mubr.f32.mxu0 %v315_v15  ;;  %v555_v13 = vld [vmem:[%s2950_s1 + $0x608] sm:$0xff]  ;;  %v292_v14 = vld [vmem:[%s2123_s11 + $0x110] sm:$0xff]  ;;  %v294_v15 = vld [vmem:[%s2123_s11 + $0x120] sm:$0xff] }
  0x8d   : > { %989 = vmatprep.mubr.f32.mxu1 %v317_v16  ;;  %1833 = vmatpush3.msra.mxu0 %v498_v17  ;;  %v306_v16 = vld [vmem:[%s2123_s11 + $0x180] sm:$0xff]  ;;  %v308_v17 = vld [vmem:[%s2123_s11 + $0x190] sm:$0xff] }
  0x8e   : > { %1889 = vmatpush3.msra.mxu1 %v530_v18  ;;  %885 = vmatmul.mubr.f32.gmra.mxu0 %v314_v19  ;;  %v554_v18 = vld [vmem:[%s2950_s1 + $0x600] sm:$0xff]  ;;  %v305_v19 = vld [vmem:[%s2123_s11 + $0x178] sm:$0xff] }
  0x8f   : > { %990 = vmatmul.mubr.f32.gmra.mxu1 %v316_v20  ;;  %1834 = vmatprep.subr.mxu0 %v513_v21  ;;  %v307_v20 = vld [vmem:[%s2123_s11 + $0x188] sm:$0xff] }
  0x90   : > { %1890 = vmatprep.subr.mxu1 %v545_v22  ;;  %1835 = vmatpush3.msra.mxu0 %v497_v23  ;;  %v319_v21 = vld [vmem:[%s2123_s11 + $0x1e8] sm:$0xff]  ;;  %v321_v22 = vld [vmem:[%s2123_s11 + $0x1f8] sm:$0xff]  ;;  %v318_v23 = vld [vmem:[%s2123_s11 + $0x1e0] sm:$0xff] }
  0x91   : > { %1891 = vmatpush3.msra.mxu1 %v529_v24  ;;  %1836 = vmatprep.subr.mxu0 %v512_v25  ;;  %v320_v24 = vld [vmem:[%s2123_s11 + $0x1f0] sm:$0xff] }
  0x92   : > { %1892 = vmatprep.subr.mxu1 %v544_v26  ;;  %889 = vmatprep.mubr.f32.mxu0 %v328_v27  ;;  %v332_v25 = vld [vmem:[%s2123_s11 + $0x250] sm:$0xff]  ;;  %v334_v26 = vld [vmem:[%s2123_s11 + $0x260] sm:$0xff]  ;;  %v331_v27 = vld [vmem:[%s2123_s11 + $0x248] sm:$0xff] }
  0x93   : > { %994 = vmatprep.mubr.f32.mxu1 %v330_v28  ;;  %1837 = vmatpush3.msra.mxu0 %v496_v29  ;;  %v333_v28 = vld [vmem:[%s2123_s11 + $0x258] sm:$0xff] }
  0x94   : > { %1893 = vmatpush3.msra.mxu1 %v528_v30  ;;  %890 = vmatmul.mubr.f32.gmra.mxu0 %v327_v31  ;;  %v345_v29 = vld [vmem:[%s2123_s11 + $0x2b8] sm:$0xff]  ;;  %v347_v30 = vld [vmem:[%s2123_s11 + $0x2c8] sm:$0xff]  ;;  %v344_v31 = vld [vmem:[%s2123_s11 + $0x2b0] sm:$0xff] }
  0x95   : > { %995 = vmatmul.mubr.f32.gmra.mxu1 %v329_v32  ;;  %1838 = vmatprep.subr.mxu0 %v511_v33  ;;  %v346_v32 = vld [vmem:[%s2123_s11 + $0x2c0] sm:$0xff] }
  0x96   : > { %1894 = vmatprep.subr.mxu1 %v543_v34  ;;  %1839 = vmatpush3.msra.mxu0 %v495_v35  ;;  %v358_v33 = vld [vmem:[%s2123_s11 + $0x320] sm:$0xff]  ;;  %v360_v34 = vld [vmem:[%s2123_s11 + $0x330] sm:$0xff]  ;;  %v357_v35 = vld [vmem:[%s2123_s11 + $0x318] sm:$0xff] }
  0x97   : > { %1895 = vmatpush3.msra.mxu1 %v527_v36  ;;  %1840 = vmatprep.subr.mxu0 %v510_v37  ;;  %v359_v36 = vld [vmem:[%s2123_s11 + $0x328] sm:$0xff]  ;;  %v270_v37 = vld [vmem:[%s2123_s11 + $0x60] sm:$0xff] }
  0x98   : > { %1896 = vmatprep.subr.mxu1 %v542_v38  ;;  %894 = vmatprep.mubr.f32.mxu0 %v341_v39  ;;  %v322_v38 = vld [vmem:[%s2123_s11 + $0x200] sm:$0xff]  ;;  %v283_v39 = vld [vmem:[%s2123_s11 + $0xc8] sm:$0xff] }
  0x99   : > { %999 = vmatprep.mubr.f32.mxu1 %v343_v40  ;;  %1841 = vmatpush3.msra.mxu0 %v494_v41  ;;  %v335_v40 = vld [vmem:[%s2123_s11 + $0x268] sm:$0xff]  ;;  %v296_v41 = vld [vmem:[%s2123_s11 + $0x130] sm:$0xff] }
  0x9a   : > { %1897 = vmatpush3.msra.mxu1 %v526_v42  ;;  %895 = vmatmul.mubr.f32.gmra.mxu0 %v340_v43  ;;  %v348_v42 = vld [vmem:[%s2123_s11 + $0x2d0] sm:$0xff]  ;;  %v309_v43 = vld [vmem:[%s2123_s11 + $0x198] sm:$0xff] }
  0x9b   : > { %1000 = vmatmul.mubr.f32.gmra.mxu1 %v342_v44  ;;  %1842 = vmatprep.subr.mxu0 %v509_v45  ;;  %v361_v44 = vld [vmem:[%s2123_s11 + $0x338] sm:$0xff] }
  0x9c   : > { %1898 = vmatprep.subr.mxu1 %v541_v46  ;;  %1843 = vmatpush3.msra.mxu0 %v493_v47  ;;  %v2835_v47 = vld [vmem:[%s2951_s2] ss:$0 sm:$0xff] }
  0x9d   : > { %1899 = vmatpush3.msra.mxu1 %v525_v48  ;;  %1844 = vmatprep.subr.mxu0 %v508_v49 }
  0x9e   : > { %1900 = vmatprep.subr.mxu1 %v540_v50  ;;  %899 = vmatprep.mubr.f32.mxu0 %v354_v51 }
  0x9f   : > { %1004 = vmatprep.mubr.f32.mxu1 %v356_v52  ;;  %1845 = vmatpush3.msra.mxu0 %v492_v53 }
  0xa0   : > { %1901 = vmatpush3.msra.mxu1 %v524_v54  ;;  %900 = vmatmul.mubr.f32.gmra.mxu0 %v353_v55 }
  0xa1   : > { %1005 = vmatmul.mubr.f32.gmra.mxu1 %v355_v56  ;;  %1846 = vmatprep.subr.mxu0 %v507_v57 }
  0xa2   : > { %1902 = vmatprep.subr.mxu1 %v539_v58  ;;  %1847 = vmatpush3.msra.mxu0 %v491_v59 }
  0xa3   : > { %1903 = vmatpush3.msra.mxu1 %v523_v60  ;;  %1848 = vmatprep.subr.mxu0 %v506_v61 }
  0xa4   : > { %1904 = vmatprep.subr.mxu1 %v538_v62  ;;  %1849 = vmatpush3.msra.mxu0 %v490_v63 }
  0xa5   : > { %1074 = vmatprep.mubr.f32.mxu0 %v267_v0  ;;  %1905 = vmatpush3.msra.mxu1 %v522_v1 }
  0xa6   : > { %1179 = vmatprep.mubr.f32.mxu1 %v269_v2  ;;  %1075 = vmatmul.mubr.f32.vlgmr.msra.gmra.mxu0 %v266_v3 }
  0xa7   : > { %1180 = vmatmul.mubr.f32.vlgmr.msra.gmra.mxu1 %v268_v4  ;;  %1942 = vmatprep.subr.mxu0 %v557_v5 }
  0xa8   : > { %1079 = vmatprep.mubr.f32.mxu0 %v280_v6  ;;  %1943 = vmatpush3.msra.mxu0 %v557_v5 }
  0xa9   : > { %1184 = vmatprep.mubr.f32.mxu1 %v282_v7  ;;  %1962 = vmatprep.subr.mxu1 %v557_v5 }
  0xaa   : > { %1944 = vmatprep.subr.mxu0 %v556_v8  ;;  %1080 = vmatmul.mubr.f32.gmra.mxu0 %v279_v9 }
  0xab   : > { %1185 = vmatmul.mubr.f32.gmra.mxu1 %v281_v10  ;;  %1084 = vmatprep.mubr.f32.mxu0 %v293_v11 }
  0xac   : > { %1189 = vmatprep.mubr.f32.mxu1 %v295_v12  ;;  %1966 = vmatpush3.msra.mxu1 %v557_v5 }
  0xad   : > { %1945 = vmatpush3.msra.mxu0 %v556_v8  ;;  %1963 = vmatprep.subr.mxu1 %v556_v8 }
  0xae   : > { %1946 = vmatprep.subr.mxu0 %v555_v13  ;;  %1085 = vmatmul.mubr.f32.gmra.mxu0 %v292_v14 }
  0xaf   : > { %1190 = vmatmul.mubr.f32.gmra.mxu1 %v294_v15  ;;  %1089 = vmatprep.mubr.f32.mxu0 %v306_v16 }
  0xb0   : > { %1194 = vmatprep.mubr.f32.mxu1 %v308_v17  ;;  %1967 = vmatpush3.msra.mxu1 %v556_v8 }
  0xb1   : > { %1947 = vmatpush3.msra.mxu0 %v555_v13  ;;  %1964 = vmatprep.subr.mxu1 %v555_v13 }
  0xb2   : > { %1948 = vmatprep.subr.mxu0 %v554_v18  ;;  %1090 = vmatmul.mubr.f32.gmra.mxu0 %v305_v19 }
  0xb3   : > { %1195 = vmatmul.mubr.f32.gmra.mxu1 %v307_v20  ;;  %1094 = vmatprep.mubr.f32.mxu0 %v319_v21 }
  0xb4   : > { %1199 = vmatprep.mubr.f32.mxu1 %v321_v22  ;;  %1968 = vmatpush3.msra.mxu1 %v555_v13 }
  0xb5   : > { %1949 = vmatpush3.msra.mxu0 %v554_v18  ;;  %1965 = vmatprep.subr.mxu1 %v554_v18 }
  0xb6   : > { %1095 = vmatmul.mubr.f32.gmra.mxu0 %v318_v23  ;;  %1969 = vmatpush3.msra.mxu1 %v554_v18 }
  0xb7   : > { %1200 = vmatmul.mubr.f32.gmra.mxu1 %v320_v24  ;;  %1099 = vmatprep.mubr.f32.mxu0 %v332_v25 }
  0xb8   : > { %1204 = vmatprep.mubr.f32.mxu1 %v334_v26 }
  0xba   : > { %1100 = vmatmul.mubr.f32.gmra.mxu0 %v331_v27 }
  0xbb   : > { %1205 = vmatmul.mubr.f32.gmra.mxu1 %v333_v28  ;;  %1104 = vmatprep.mubr.f32.mxu0 %v345_v29 }
  0xbc   : > { %1209 = vmatprep.mubr.f32.mxu1 %v347_v30 }
  0xbe   : > { %1105 = vmatmul.mubr.f32.gmra.mxu0 %v344_v31 }
  0xbf   : > { %1210 = vmatmul.mubr.f32.gmra.mxu1 %v346_v32  ;;  %1109 = vmatprep.mubr.f32.mxu0 %v358_v33 }
  0xc0   : > { %1214 = vmatprep.mubr.f32.mxu1 %v360_v34 }
  0xc2   : > { %1110 = vmatmul.mubr.f32.gmra.mxu0 %v357_v35 }
  0xc3   : > { %1215 = vmatmul.mubr.f32.gmra.mxu1 %v359_v36  ;;  %1950 = vmatprep.mubr.msk.f32.mxu0 %vm565_vm0, %v270_v37 }
  0xc4   : > { %1956 = vmatprep.mubr.msk.f32.mxu1 %vm565_vm0, %v322_v38 }
  0xc6   : > { %1951 = vmatmul.mubr.msk.f32.vlgmr.msra.gmra.mxu0 %vm565_vm0, %v283_v39 }
  0xc7   : > { %1957 = vmatmul.mubr.msk.f32.vlgmr.msra.gmra.mxu1 %vm565_vm0, %v335_v40  ;;  %1953 = vmatprep.mubr.msk.f32.mxu0 %vm565_vm0, %v296_v41 }
  0xc8   : > { %1959 = vmatprep.mubr.msk.f32.mxu1 %vm565_vm0, %v348_v42 }
  0xca   : > { %1954 = vmatmul.mubr.msk.f32.gmra.mxu0 %vm565_vm0, %v309_v43 }
  0xcb   : > { %1960 = vmatmul.mubr.msk.f32.gmra.mxu1 %vm565_vm0, %v361_v44 }
 0x106   : > { %v1626_v45 = vpop.f32.mrf.mxu0 }
 0x107   : > { %v1682_v46 = vpop.f32.mrf.mxu1 }
 0x108   : > { %v1627_v48 = vpop.f32.mrf.mxu0 }
 0x109   : > { %v1683_v49 = vpop.f32.mrf.mxu1  ;;  %v1628_v50 = vadd.f32 %v1627_v48, %v1626_v45 }
 0x10a   : > { %v1684_v51 = vadd.f32 %v1683_v49, %v1682_v46 }
 0x10b   : > { %v657_v52 = vadd.f32 %v1628_v50, %v2835_v47 }
 0x10c   : > { %v1629_v53 = vpop.f32.mrf.mxu0 }
 0x10d   : > { %v1685_v54 = vpop.f32.mrf.mxu1  ;;  %v2838_v55 = vadd.f32 %v1684_v51, %v657_v52 }
 0x10e   : > { %v1630_v56 = vpop.f32.mrf.mxu0 }
 0x10f   : > { %v1686_v57 = vpop.f32.mrf.mxu1  ;;  %v1631_v58 = vadd.f32 %v1630_v56, %v1629_v53 }
 0x110   : > { %v1687_v59 = vadd.f32 %v1686_v57, %v1685_v54 }
 0x111   : > { %v662_v60 = vadd.f32 %v1631_v58, %v2835_v47 }
 0x112   : > { %v1632_v61 = vpop.f32.mrf.mxu0 }
 0x113   : > { %v1688_v62 = vpop.f32.mrf.mxu1  ;;  %v2841_v63 = vadd.f32 %v1687_v59, %v662_v60 }
 0x114   : > { %v1633_v0 = vpop.f32.mrf.mxu0 }
 0x115   : > { %v1689_v1 = vpop.f32.mrf.mxu1  ;;  %v1634_v2 = vadd.f32 %v1633_v0, %v1632_v61 }
 0x116   : > { %v1690_v3 = vadd.f32 %v1689_v1, %v1688_v62 }
 0x117   : > { %v667_v4 = vadd.f32 %v1634_v2, %v2835_v47 }
 0x118   : > { %v1635_v5 = vpop.f32.mrf.mxu0 }
 0x119   : > { %v1691_v6 = vpop.f32.mrf.mxu1  ;;  %v2844_v7 = vadd.f32 %v1690_v3, %v667_v4 }
 0x11a   : > { %v1636_v8 = vpop.f32.mrf.mxu0 }
 0x11b   : > { %v1692_v9 = vpop.f32.mrf.mxu1  ;;  %v1637_v10 = vadd.f32 %v1636_v8, %v1635_v5 }
 0x11c   : > { %v1693_v11 = vadd.f32 %v1692_v9, %v1691_v6 }
 0x11d   : > { %v672_v12 = vadd.f32 %v1637_v10, %v2835_v47 }
 0x11e   : > { %v1638_v13 = vpop.f32.mrf.mxu0 }
 0x11f   : > { %v1694_v14 = vpop.f32.mrf.mxu1  ;;  %v2847_v15 = vadd.f32 %v1693_v11, %v672_v12 }
 0x120   : > { %v1639_v16 = vpop.f32.mrf.mxu0 }
 0x121   : > { %v1695_v17 = vpop.f32.mrf.mxu1  ;;  %v1640_v18 = vadd.f32 %v1639_v16, %v1638_v13 }
 0x122   : > { %v1696_v19 = vadd.f32 %v1695_v17, %v1694_v14 }
 0x123   : > { %v677_v20 = vadd.f32 %v1640_v18, %v2835_v47 }
 0x124   : > { %v1641_v21 = vpop.f32.mrf.mxu0 }
 0x125   : > { %v2850_v22 = vpop.f32.mrf.mxu1  ;;  %v2852_v23 = vadd.f32 %v1696_v19, %v677_v20 }
 0x126   : > { %v1642_v24 = vpop.f32.mrf.mxu0 }
 0x127   : > { %v1698_v25 = vpop.f32.mrf.mxu1 }
 0x12a   : > { %v1644_v26 = vpop.f32.mrf.mxu0 }
 0x12b   : > { %v1700_v27 = vpop.f32.mrf.mxu1 }
 0x12c   : > { %v1645_v28 = vpop.f32.mrf.mxu0 }
 0x12d   : > { %v1701_v29 = vpop.f32.mrf.mxu1  ;;  %v1646_v30 = vadd.f32 %v1645_v28, %v1644_v26  ;;  %v1643_v26 = vadd.f32 %v1642_v24, %v1641_v21 }
 0x12e   : > { %v1702_v31 = vadd.f32 %v1701_v29, %v1700_v27 }
 0x12f   : > { %v687_v32 = vadd.f32 %v1646_v30, %v2835_v47 }
 0x130   : > { %v1647_v33 = vpop.f32.mrf.mxu0 }
 0x131   : > { %v2855_v34 = vpop.f32.mrf.mxu1  ;;  %v2857_v35 = vadd.f32 %v1702_v31, %v687_v32  ;;  %v682_v31 = vadd.f32 %v1643_v26, %v2835_v47  ;;  %v1699_v32 = vadd.f32 %v1698_v25, %v2850_v22 }
 0x132   : > { %v1648_v36 = vpop.f32.mrf.mxu0 }
 0x133   : > { %v1704_v37 = vpop.f32.mrf.mxu1 }
 0x136   : > { %v1738_v38 = vpop.f32.mrf.mxu0 }
 0x137   : > { %v2859_v39 = vpop.f32.mrf.mxu1 }
 0x138   : > { %v1739_v40 = vpop.f32.mrf.mxu0 }
 0x139   : > { %v1795_v41 = vpop.f32.mrf.mxu1 }
 0x13a   : > { %v1796_v22 = vadd.f32 %v1795_v41, %v2859_v39 }
 0x13c   : > { %v1741_v42 = vpop.f32.mrf.mxu0 }
 0x13d   : > { %v1797_v43 = vpop.f32.mrf.mxu1 }
 0x13e   : > { %v1742_v44 = vpop.f32.mrf.mxu0 }
 0x13f   : > { %v1798_v45 = vpop.f32.mrf.mxu1 }
 0x142   : > { %v1744_v46 = vpop.f32.mrf.mxu0 }
 0x143   : > { %v2861_v48 = vpop.f32.mrf.mxu1 }
 0x144   : > { %v1745_v49 = vpop.f32.mrf.mxu0 }
 0x145   : > { %v2863_v50 = vpop.f32.mrf.mxu1 }
 0x148   : > { %v1747_v51 = vpop.f32.mrf.mxu0 }
 0x149   : > { %v2865_v52 = vpop.f32.mrf.mxu1 }
 0x14a   : > { %v1748_v53 = vpop.f32.mrf.mxu0 }
 0x14b   : > { %v2867_v54 = vpop.f32.mrf.mxu1 }
 0x14e   : > { %v1750_v56 = vpop.f32.mrf.mxu0 }
 0x14f   : > { %v1806_v57 = vpop.f32.mrf.mxu1 }
 0x150   : > { %v1751_v58 = vpop.f32.mrf.mxu0 }
 0x151   : > { %v1807_v59 = vpop.f32.mrf.mxu1  ;;  %v1752_v21 = vadd.f32 %v1751_v58, %v1750_v56 }
 0x152   : > { %v1808_v56 = vadd.f32 %v1807_v59, %v1806_v57 }
 0x154   : > { %v1753_v60 = vpop.f32.mrf.mxu0 }
 0x155   : > { %v1809_v61 = vpop.f32.mrf.mxu1 }
 0x156   : > { %v1754_v62 = vpop.f32.mrf.mxu0 }
 0x157   : > { %v1810_v0 = vpop.f32.mrf.mxu1  ;;  %v1755_v24 = vadd.f32 %v1754_v62, %v1753_v60 }
 0x15a   : > { %v1756_v1 = vpop.f32.mrf.mxu0 }
 0x15b   : > { %v2869_v2 = vpop.f32.mrf.mxu1 }
 0x15c   : > { %2954 = vst [vmem:[#allocation3_spill] sm:$0xff] %v2869_v2  ;;  %v1757_v3 = vpop.f32.mrf.mxu0 }
 0x15d   : > { %v2871_v4 = vpop.f32.mrf.mxu1 }
 0x15e   : > { %2955 = vst [vmem:[#allocation4_spill] sm:$0xff] %v2871_v4  ;;  %v1705_v4 = vadd.f32 %v1704_v37, %v2855_v34  ;;  %v1758_v34 = vadd.f32 %v1757_v3, %v1756_v1 }
 0x160   : > { %v1759_v5 = vpop.f32.mrf.mxu0 }
 0x161   : > { %v2873_v6 = vpop.f32.mrf.mxu1 }
 0x162   : > { %2956 = vst [vmem:[#allocation5_spill] sm:$0xff] %v2873_v6  ;;  %v1760_v8 = vpop.f32.mrf.mxu0 }
 0x163   : > { %v2875_v9 = vpop.f32.mrf.mxu1  ;;  %v1761_v37 = vadd.f32 %v1760_v8, %v1759_v5 }
 0x164   : > { %2957 = vst [vmem:[#allocation6_spill] sm:$0xff] %v2875_v9  ;;  %v1740_v9 = vadd.f32 %v1739_v40, %v1738_v38  ;;  %v1749_v38 = vadd.f32 %v1748_v53, %v1747_v51 }
 0x165   : > { %v2967_v1 = vld [vmem:[#allocation4_spill] sm:$0xff] }
 0x166   : > { %v1850_v10 = vpop.f32.mrf.mxu0  ;;  %v867_v26 = vadd.f32 %v1740_v9, %v2838_v55  ;;  %v882_v51 = vadd.f32 %v1749_v38, %v2847_v15 }
 0x167   : > { %v2877_v11 = vpop.f32.mrf.mxu1 }
 0x168   : > { %2958 = vst [vmem:[#allocation7_spill] sm:$0xff] %v2877_v11  ;;  %v1851_v12 = vpop.f32.mrf.mxu0  ;;  %v972_v55 = vadd.f32 %v1796_v22, %v867_v26 }
 0x169   : > { %v2879_v13 = vpop.f32.mrf.mxu1 }
 0x16a   : > { %2959 = vst [vmem:[#allocation8_spill] sm:$0xff] %v2879_v13  ;;  %v1853_v14 = vpop.f32.mrf.mxu0  ;;  %v1649_v13 = vadd.f32 %v1648_v36, %v1647_v33  ;;  %v1799_v33 = vadd.f32 %v1798_v45, %v1797_v43  ;;  %v1746_v36 = vadd.f32 %v1745_v49, %v1744_v46  ;;  %v1802_v43 = vadd.f32 %v2863_v50, %v2861_v48 }
 0x16b   : > { %v2881_v16 = vpop.f32.mrf.mxu1  ;;  %v1852_v45 = vadd.f32 %v1851_v12, %v1850_v10  ;;  %v2969_v5 = vld [vmem:[#allocation6_spill] sm:$0xff] }
 0x16c   : > { %2960 = vst [vmem:[#allocation9_spill] sm:$0xff] %v2881_v16  ;;  %v1854_v17 = vpop.f32.mrf.mxu0 }
 0x16d   : > { %v1910_v18 = vpop.f32.mrf.mxu1  ;;  %v1855_v39 = vadd.f32 %v1854_v17, %v1853_v14  ;;  %v1077_v15 = vadd.f32 %v1852_v45, %v972_v55 }
 0x16e   : > { %v2883_v19 = vpop.f32.mrf.mxu0 }
 0x16f   : > { %2961 = vst [vmem:[#allocation10_spill] sm:$0xff] %v2883_v19  ;;  %v2885_v20 = vpop.f32.mrf.mxu1  ;;  %v1743_v19 = vadd.f32 %v1742_v44, %v1741_v42  ;;  %v887_v44 = vadd.f32 %v1752_v21, %v2852_v23  ;;  %v1805_v23 = vadd.f32 %v2867_v54, %v2865_v52  ;;  %v2971_v17 = vld [vmem:[#allocation7_spill] sm:$0xff] }
 0x170   : > { %2962 = vst [vmem:[#allocation11_spill] sm:$0xff] %v2885_v20  ;;  %v2887_v27 = vpop.f32.mrf.mxu0 }
 0x171   : > { %2963 = vst [vmem:[#allocation12_spill] sm:$0xff] %v2887_v27  ;;  %v2889_v28 = vpop.f32.mrf.mxu1  ;;  %v787_v27 = vadd.f32 %v1699_v32, %v682_v31  ;;  %v872_v25 = vadd.f32 %v1743_v19, %v2841_v63  ;;  %v877_v63 = vadd.f32 %v1746_v36, %v2844_v7  ;;  %v992_v53 = vadd.f32 %v1808_v56, %v887_v44  ;;  %v2972_v19 = vld [vmem:[#allocation8_spill] sm:$0xff] }
 0x172   : > { %2964 = vst [vmem:[#allocation13_spill] sm:$0xff] %v2889_v28  ;;  %v1859_v29 = vpop.f32.mrf.mxu0  ;;  %v692_v28 = vadd.f32 %v1649_v13, %v2835_v47  ;;  %v1811_v47 = vadd.f32 %v1810_v0, %v1809_v61  ;;  %v897_v61 = vadd.f32 %v1758_v34, %v2857_v35  ;;  %v2966_v0 = vld [vmem:[#allocation3_spill] sm:$0xff]  ;;  %v987_v21 = vadd.f32 %v1805_v23, %v882_v51 }
 0x173   : > { %v2891_v30 = vpop.f32.mrf.mxu1  ;;  %v892_v58 = vadd.f32 %v1755_v24, %v787_v27  ;;  %v977_v9 = vadd.f32 %v1799_v33, %v872_v25  ;;  %v1814_v3 = vadd.f32 %v2967_v1, %v2966_v0  ;;  %v2970_v54 = vld [vmem:[#allocation9_spill] sm:$0xff] }
 0x174   : > { %2965 = vst [vmem:[#allocation14_spill] sm:$0xff] %v2891_v30  ;;  %v1860_v11 = vpop.f32.mrf.mxu0  ;;  %v797_v60 = vadd.f32 %v1705_v4, %v692_v28  ;;  %v2968_v4 = vld [vmem:[#allocation5_spill] sm:$0xff]  ;;  %v1911_v10 = vadd.f32 %v1910_v18, %v2970_v54  ;;  %v1332_v54 = vld [vmem:[#allocation2 + $0x38] sm:$0xff] }
 0x175   : > { %v2895_v16 = vpop.f32.mrf.mxu1  ;;  %v997_v57 = vadd.f32 %v1811_v47, %v892_v58  ;;  %v1817_v48 = vadd.f32 %v2969_v5, %v2968_v4  ;;  %v1082_v52 = vadd.f32 %v1855_v39, %v977_v9  ;;  %v1861_v27 = vadd.f32 %v1860_v11, %v1859_v29 }
 0x176   : > { %v1862_v6 = vpop.f32.mrf.mxu0  ;;  %v902_v7 = vadd.f32 %v1761_v37, %v797_v60  ;;  %v1002_v24 = vadd.f32 %v1814_v3, %v897_v61  ;;  %v2973_v26 = vld [vmem:[#allocation10_spill] sm:$0xff]  ;;  %v1326_v60 = vld [vmem:[#allocation2] sm:$0xff] }
 0x177   : > { %v1918_v20 = vpop.f32.mrf.mxu1  ;;  %v1092_v56 = vadd.f32 %v1861_v27, %v987_v21  ;;  %v2976_v39 = vld [vmem:[#allocation11_spill] sm:$0xff] }
 0x178   : > { %v1863_v30 = vpop.f32.mrf.mxu0  ;;  %v2974_v22 = vld [vmem:[#allocation12_spill] sm:$0xff]  ;;  %v1007_v38 = vadd.f32 %v1817_v48, %v902_v7 }
 0x179   : > { %v1919_v2 = vpop.f32.mrf.mxu1  ;;  %v1864_v59 = vadd.f32 %v1863_v30, %v1862_v6  ;;  %v1908_v6 = vadd.f32 %v2972_v19, %v2971_v17  ;;  %v982_v30 = vadd.f32 %v1802_v43, %v877_v63  ;;  %v1858_v25 = vadd.f32 %v2974_v22, %v2973_v26 }
 0x17a   : > { %v1865_v40 = vpop.f32.mrf.mxu0  ;;  %v1920_v32 = vadd.f32 %v1919_v2, %v1918_v20  ;;  %v1330_v20 = vld [vmem:[#allocation2 + $0x20] sm:$0xff] }
 0x17b   : > { %v1921_v42 = vpop.f32.mrf.mxu1  ;;  %v1097_v31 = vadd.f32 %v1864_v59, %v992_v53  ;;  %v2975_v58 = vld [vmem:[#allocation14_spill] sm:$0xff]  ;;  %v1182_v34 = vadd.f32 %v1908_v6, %v1077_v15  ;;  %v1087_v9 = vadd.f32 %v1858_v25, %v982_v30 }
 0x17c   : > { %v1866_v62 = vpop.f32.mrf.mxu0  ;;  %v1917_v11 = vadd.f32 %v2895_v16, %v2975_v58  ;;  %v1329_v16 = vld [vmem:[#allocation2 + $0x8] sm:$0xff] }
 0x17d   : > { %v1922_v13 = vpop.f32.mrf.mxu1  ;;  %v1867_v41 = vadd.f32 %v1866_v62, %v1865_v40  ;;  %v1202_v55 = vadd.f32 %v1920_v32, %v1097_v31  ;;  %v1331_v58 = vld [vmem:[#allocation2 + $0x28] sm:$0xff] }
 0x17e   : > { %v1868_v46 = vpop.f32.mrf.mxu0  ;;  %v1923_v14 = vadd.f32 %v1922_v13, %v1921_v42  ;;  %v1187_v42 = vadd.f32 %v1911_v10, %v1082_v52  ;;  %v1197_v0 = vadd.f32 %v1917_v11, %v1092_v56  ;;  %v1328_v52 = vld [vmem:[#allocation2 + $0x10] sm:$0xff] }
 0x17f   : > { %v1924_v49 = vpop.f32.mrf.mxu1  ;;  %v1102_v12 = vadd.f32 %v1867_v41, %v997_v57  ;;  %v2977_v41 = vld [vmem:[#allocation13_spill] sm:$0xff] }
 0x180   : > { %v1869_v50 = vpop.f32.mrf.mxu0  ;;  %v1914_v63 = vadd.f32 %v2977_v41, %v2976_v39 }
 0x181   : > { %v1925_v8 = vpop.f32.mrf.mxu1  ;;  %v1870_v33 = vadd.f32 %v1869_v50, %v1868_v46  ;;  %v1207_v44 = vadd.f32 %v1923_v14, %v1102_v12  ;;  %v1325_v46 = vld [vmem:[#allocation2 + $0x30] sm:$0xff] }
 0x182   : > { %v1871_v35 = vpop.f32.mrf.mxu0  ;;  %v1926_v23 = vadd.f32 %v1925_v8, %v1924_v49  ;;  %v1192_v8 = vadd.f32 %v1914_v63, %v1087_v9 }
 0x183   : > { %v1927_v28 = vpop.f32.mrf.mxu1  ;;  %v1107_v43 = vadd.f32 %v1870_v33, %v1002_v24  ;;  %v2055_v24 = vmov 0.0  }
 0x184   : > { %v1872_v36 = vpop.f32.mrf.mxu0 }
 0x185   : > { %v1928_v18 = vpop.f32.mrf.mxu1  ;;  %v1873_v40 = vadd.f32 %v1872_v36, %v1871_v35  ;;  %v1212_v14 = vadd.f32 %v1926_v23, %v1107_v43 }
 0x186   : > { %v1929_v29 = vadd.f32 %v1928_v18, %v1927_v28  ;;  %v1952_v47 = vpop.f32.mrf.mxu0 }
 0x187   : > { %v1958_v2 = vpop.f32.mrf.mxu1  ;;  %v1112_v37 = vadd.f32 %v1873_v40, %v1007_v38  ;;  %v1292_v62 = vadd.f32 %v1952_v47, %v1187_v42  ;;  %v1327_v38 = vld [vmem:[#allocation2 + $0x18] sm:$0xff] }
 0x188   : > { %v1312_v13 = vadd.f32 %v1958_v2, %v1207_v44  ;;  %v1286_v45 = vpop.f32.mrf.mxu0 }
 0x189   : > { %v1306_v51 = vpop.f32.mrf.mxu1  ;;  %v1334_v53 = vsub.f32 %v1292_v62, %v1326_v60  ;;  %v1287_v59 = vadd.f32 %v1286_v45, %v1182_v34  ;;  %v1217_v3 = vadd.f32 %v1929_v29, %v1112_v37 }
 0x18a   : > { %v1338_v57 = vsub.f32 %v1312_v13, %v1330_v20  ;;  %v1307_v61 = vadd.f32 %v1306_v51, %v1202_v55  ;;  %v1955_v1 = vpop.f32.mrf.mxu0 }
 0x18b   : > { %v1961_v7 = vpop.f32.mrf.mxu1  ;;  %v1342_v4 = vmul.f32 0.5, %v1334_v53  ;;  %v1333_v48 = vsub.f32 %v1287_v59, %v1325_v46  ;;  %v1302_v10 = vadd.f32 %v1955_v1, %v1197_v0 }
 0x18c   : > { %v1346_v5 = vmul.f32 0.5, %v1338_v57  ;;  %v1337_v50 = vsub.f32 %v1307_v61, %v1329_v16  ;;  %v1322_v49 = vadd.f32 %v1961_v7, %v1217_v3  ;;  %v1296_v12 = vpop.f32.mrf.mxu0 }
 0x18d   : > { %v1316_v15 = vpop.f32.mrf.mxu1  ;;  %v1350_v17 = vadd.f32 %v1342_v4, %v1326_v60  ;;  %v1341_v6 = vmul.f32 0.5, %v1333_v48  ;;  %v1336_v35 = vsub.f32 %v1302_v10, %v1328_v52  ;;  %v1297_v30 = vadd.f32 %v1296_v12, %v1192_v8 }
 0x18e   : > { %v1354_v19 = vadd.f32 %v1346_v5, %v1330_v20  ;;  %v1345_v27 = vmul.f32 0.5, %v1337_v50  ;;  %v1340_v28 = vsub.f32 %v1322_v49, %v1332_v54  ;;  %v1317_v31 = vadd.f32 %v1316_v15, %v1212_v14 }
 0x18f   : > { %vm1358_vm1 = vcmp.ge.f32.partialorder %v1350_v17, 1.0  ;;  %v1349_v32 = vadd.f32 %v1341_v6, %v1325_v46  ;;  %v1344_v25 = vmul.f32 0.5, %v1336_v35  ;;  %v1335_v20 = vsub.f32 %v1297_v30, %v1327_v38 }
 0x190   : > { %vm1362_vm2 = vcmp.ge.f32.partialorder %v1354_v19, 1.0  ;;  %v1353_v21 = vadd.f32 %v1345_v27, %v1329_v16  ;;  %v1585_v26 = vsel %vm1358_vm1, 1.0, %v2055_v24  ;;  %v1348_v33 = vmul.f32 0.5, %v1340_v28 }
 0x191   : > { %v1589_v22 = vsel %vm1362_vm2, 1.0, %v2055_v24  ;;  %v1382_v36 = vsub.f32 1.0, %v1585_v26  ;;  %1406 = vst [vmem:[%s2118_s8 + $0x8] sm:$0xff] %v1585_v26  ;;  %vm1357_vm3 = vcmp.ge.f32.partialorder %v1349_v32, 1.0  ;;  %v1352_v44 = vadd.f32 %v1344_v25, %v1328_v52 }
 0x192   : > { %v1386_v18 = vsub.f32 1.0, %v1589_v22  ;;  %1410 = vst [vmem:[%s2118_s8 + $0x28] sm:$0xff] %v1589_v22  ;;  %vm1361_vm4 = vcmp.ge.f32.partialorder %v1353_v21, 1.0  ;;  %v1584_v40 = vsel %vm1357_vm3, 1.0, %v2055_v24  ;;  %v1356_v56 = vadd.f32 %v1348_v33, %v1332_v54 }
 0x193   : > { %v1588_v42 = vsel %vm1361_vm4, 1.0, %v2055_v24  ;;  %v1390_v11 = vmul.f32 %v1382_v36, %v1350_v17  ;;  %v1381_v47 = vsub.f32 1.0, %v1584_v40  ;;  %1405 = vst [vmem:[%s2118_s8] sm:$0xff] %v1584_v40  ;;  %v1413_v60 = vadd.f32 %v1585_v26, %v1584_v40  ;;  %v1430_v17 = vld [vmem:[%s2128_s14] sm:$0xff] }
 0x194   : > { %v1394_v29 = vmul.f32 %v1386_v18, %v1354_v19  ;;  %1409 = vst [vmem:[%s2118_s8 + $0x20] sm:$0xff] %v1588_v42  ;;  %v1385_v2 = vsub.f32 1.0, %v1588_v42  ;;  %vm1360_vm5 = vcmp.ge.f32.partialorder %v1352_v44, 1.0  ;;  %vm1364_vm6 = vcmp.ge.f32.partialorder %v1356_v56, 1.0 }
 0x195   : > { %1398 = vst [vmem:[#allocation2] sm:$0xff] %v1390_v11  ;;  %v1389_v34 = vmul.f32 %v1381_v47, %v1349_v32  ;;  %v1587_v37 = vsel %vm1360_vm5, 1.0, %v2055_v24  ;;  %v1591_v62 = vsel %vm1364_vm6, 1.0, %v2055_v24  ;;  %v1339_v13 = vsub.f32 %v1317_v31, %v1331_v58 }
 0x196   : > { %1402 = vst [vmem:[#allocation2 + $0x20] sm:$0xff] %v1394_v29  ;;  %v1393_v55 = vmul.f32 %v1385_v2, %v1353_v21  ;;  %v1384_v9 = vsub.f32 1.0, %v1587_v37  ;;  %1408 = vst [vmem:[%s2118_s8 + $0x18] sm:$0xff] %v1587_v37  ;;  %v1388_v39 = vsub.f32 1.0, %v1591_v62  ;;  %v1343_v41 = vmul.f32 0.5, %v1335_v20 }
 0x197   : > { %1412 = vst [vmem:[%s2118_s8 + $0x38] sm:$0xff] %v1591_v62  ;;  %1397 = vst [vmem:[#allocation2 + $0x30] sm:$0xff] %v1389_v34  ;;  %v1347_v63 = vmul.f32 0.5, %v1339_v13  ;;  %v1428_v52 = vlaneseq  ;;  %v1431_v12 = vstv %s2036_s15 }
 0x198   : > { %1401 = vst [vmem:[#allocation2 + $0x8] sm:$0xff] %v1393_v55  ;;  %v1392_v43 = vmul.f32 %v1384_v9, %v1352_v44  ;;  %v1396_v23 = vmul.f32 %v1388_v39, %v1356_v56  ;;  %v1351_v45 = vadd.f32 %v1343_v41, %v1327_v38 }
 0x199   : > { %v1355_v46 = vadd.f32 %v1347_v63, %v1331_v58  ;;  %v1429_v49 = vshrl.u32 %v1428_v52, 7 }
 0x19a   : > { %1400 = vst [vmem:[#allocation2 + $0x10] sm:$0xff] %v1392_v43  ;;  %1404 = vst [vmem:[#allocation2 + $0x38] sm:$0xff] %v1396_v23  ;;  %vm1359_vm7 = vcmp.ge.f32.partialorder %v1351_v45, 1.0 }
 0x19b   : > { %v1586_v51 = vsel %vm1359_vm7, 1.0, %v2055_v24  ;;  %vm1363_vm8 = vcmp.ge.f32.partialorder %v1355_v46, 1.0  ;;  %vm1432_vm9 = vcmp.eq.s32.totalorder %v1429_v49, %v1431_v12 }
 0x19c   : > { %v1383_v16 = vsub.f32 1.0, %v1586_v51  ;;  %1407 = vst [vmem:[%s2118_s8 + $0x10] sm:$0xff] %v1586_v51  ;;  %v1414_v53 = vadd.f32 %v1586_v51, %v1413_v60  ;;  %v1590_v57 = vsel %vm1363_vm8, 1.0, %v2055_v24 }
 0x19d   : > { %v1387_v59 = vsub.f32 1.0, %v1590_v57  ;;  %1411 = vst [vmem:[%s2118_s8 + $0x30] sm:$0xff] %v1590_v57 }
 0x19e   : > { %v1391_v61 = vmul.f32 %v1383_v16, %v1351_v45  ;;  %v1415_v0 = vadd.f32 %v1587_v37, %v1414_v53 }
 0x19f   : > { %v1395_v1 = vmul.f32 %v1387_v59, %v1355_v46 }
 0x1a0   : > { %1399 = vst [vmem:[#allocation2 + $0x18] sm:$0xff] %v1391_v61  ;;  %v1416_v3 = vadd.f32 %v1588_v42, %v1415_v0 }
 0x1a1   : > { %1403 = vst [vmem:[#allocation2 + $0x28] sm:$0xff] %v1395_v1 }
 0x1a2   : > { %v1417_v7 = vadd.f32 %v1589_v22, %v1416_v3 }
 0x1a4   : > { %v1418_v4 = vadd.f32 %v1590_v57, %v1417_v7 }
 0x1a6   : > { %v1419_v5 = vadd.f32 %v1591_v62, %v1418_v4 }
 0x1a8   : > { %v1420_v48 = vrot.slane %v1419_v5, 4 }
 0x1aa   : > { %v1421_v50 = vadd.f32 %v1420_v48, %v1419_v5 }
 0x1ac   : > { %v1422_v54 = vrot.slane %v1421_v50, 2 }
 0x1ae   : > { %v1423_v10 = vadd.f32 %v1422_v54, %v1421_v50 }
 0x1b0   : > { %v1424_v8 = vrot.slane %v1423_v10, 1 }
 0x1b2   : > { %v1425_v14 = vadd.f32 %v1424_v8, %v1423_v10 }
 0x1b4   : > { %v1427_v15 = vmul.f32 0.015625, %v1425_v14 }
 0x1b6   : > { %v1435_v19 = vsel %vm1432_vm9, %v1427_v15, 0.0 }
 0x1b7   : > { %v1436_v6 = vadd.f32 %v1435_v19, %v1430_v17 }
 0x1b9   : > { %1437 = vst [vmem:[%s2128_s14] sm:$0xff] %v1436_v6 }
 0x1ba PF: > { %s15_s19 = sadd.s32 1, %s2052_s19   ;;  %s2978_s15 = smov %s2044_s17 }
 0x1bb   : > { %p12_p8 = scmp.ge.s32.totalorder %s15_s19, 18   ;;  %s2979_s16 = smov %s2048_s18 }
 0x1bc   : > { %s2980_s17 = smov %s2983_s20  ;;  %s2981_s18 = smov %s2987_s21 }
 0x1bd   :  { %14 = sbr.rel (!%p12_p8) target bundleno = 3 (0x3), region = 78 }

// kernel: sma_forward.3
= control target key start
LH: loop header
LB: loop body
LE: loop exit
PB: predicated region body
PF: predicated region fallthrough
CT: control target
= control target key end

     0   :  { %s1411_s9 = smov 0   ;;  %s2629_s0 = inlined_call_operand.vmem [shape: f32[16,64,128], index: 0, kind: input, shape index: {}]   ;;  %s2630_s1 = inlined_call_operand.vmem [shape: f32[16,128], index: 1, kind: input, shape index: {}]   ;;  %s2631_s2 = inlined_call_operand.vmem [shape: f32[16,64,32], index: 2, kind: output, shape index: {}]  }
   0x1 LB: > { %s1355_s10 = sadd.s32 4294967295, %s1390_s9   ;;  %p1359_p0 = scmp.ge.s32.totalorder %s1390_s9, 1  ;;  %s1390_s9 = sphi %s1411_s9, %s12_s9  }
   0x2   : > { %p123_p1 = scmp.lt.s32.totalorder %s1390_s9, 3 }
   0x4   : > { %p124_p2 = pnand %p1359_p0, %p123_p1 }
   0x6   : > { %127 = sbr.rel (%p124_p2) target bundleno = 524 (0x20c), region = 28 }
   0xb   : > { %s1360_s11 = sshll.u32 %s1355_s10, 3  ;;  %p158_p3 = scmp.lt.s32.totalorder %s1355_s10, 1  ;;  %v239_v0 = vlaneseq  ;;  %v1392_v1 = vmov 1966171168   ;;  %vm1220_vm0 = vcmask 261120  }
   0xc   : > { %p152_p4 = scmp.lt.s32.totalorder %s1360_s11, 15  ;;  %v237_v2 = vunpack.c.l.s4 %v1392_v1  ;;  %s1393_s20 = smov 96  }
   0xd   : > { %s2956_s10 = smov (!%p158_p3, %s1355_s10), 1  ;;  %v240_v3 = vshrl.u32 %v239_v0, 7  ;;  %s1394_s21 = smov 64  }
   0xe   : > { %s2958_s11 = smov (!%p152_p4, %s1360_s11), 15  ;;  %v238_v4 = vunpack.c.0.s8 %v237_v2  ;;  %s1363_s12 = sshll.u32 %s2956_s10, 3 }
   0xf   : > { %s1369_s13 = sshll.u32 %s2958_s11, 6  ;;  %s161_s16 = scalar_lea.vmem %s2630_s1, %s1363_s12  ;;  %v1432_v8 = vsub.s32 0, %v240_v3 }
  0x10   : > { %v241_v5 = vsub.s32 %v238_v4, %v240_v3  ;;  %v233_v6 = vld [vmem:[%s161_s16] sm:$0xff]  ;;  %s1430_s19 = scalar_lea.vmem %s2629_s0, %s1369_s13  ;;  %s1395_s22 = smov 32  }
  0x11   : > { %v235_v9 = vcombine.high %v233_v6, %v233_v6  ;;  %v171_v12 = vld [vmem:[%s1430_s19 + $0x10] sm:$0xff]  ;;  %v169_v13 = vld [vmem:[%s1430_s19] sm:$0xff]  ;;  %v172_v15 = vld [vmem:[%s1430_s19 + $0x18] sm:$0xff]  ;;  %s2298_s25 = scalar_lea.vmem %s2631_s2, %s1369_s13 }
  0x12   : > { %v242_v7 = vrot.slane %v233_v6, %v241_v5  ;;  %v170_v16 = vld [vmem:[%s1430_s19 + $0x8] sm:$0xff]  ;;  %v173_v24 = vld [vmem:[%s1430_s19 + $0x20] sm:$0xff]  ;;  %v176_v28 = vld [vmem:[%s1430_s19 + $0x38] sm:$0xff] }
  0x13   : > { %v249_v11 = vrot.slane %v235_v9, %v241_v5  ;;  %v174_v23 = vld [vmem:[%s1430_s19 + $0x28] sm:$0xff]  ;;  %v201_v30 = vld [vmem:[%s1430_s19 + $0x100] sm:$0xff]  ;;  %v204_v31 = vld [vmem:[%s1430_s19 + $0x118] sm:$0xff] }
  0x14   : > { %v1434_v10 = vrot.slane %v242_v7, %v241_v5  ;;  %v250_v17 = vcombine.high %v242_v7, %v242_v7  ;;  %v202_v29 = vld [vmem:[%s1430_s19 + $0x108] sm:$0xff]  ;;  %v203_v34 = vld [vmem:[%s1430_s19 + $0x110] sm:$0xff]  ;;  %v205_v39 = vld [vmem:[%s1430_s19 + $0x120] sm:$0xff] }
  0x15   : > { %v265_v18 = vrot.slane %v249_v11, %v241_v5  ;;  %v251_v27 = vcombine.high %v249_v11, %v249_v11  ;;  %v206_v35 = vld [vmem:[%s1430_s19 + $0x128] sm:$0xff]  ;;  %v175_v36 = vld [vmem:[%s1430_s19 + $0x30] sm:$0xff]  ;;  %v177_v40 = vld [vmem:[%s1430_s19 + $0x40] sm:$0xff] }
  0x16   : > { %v287_v14 = vrot.slane %v1434_v10, %v1432_v8  ;;  %v1456_v25 = vrot.slane %v250_v17, %v241_v5  ;;  %v178_v37 = vld [vmem:[%s1430_s19 + $0x48] sm:$0xff]  ;;  %v180_v41 = vld [vmem:[%s1430_s19 + $0x58] sm:$0xff]  ;;  %v207_v51 = vld [vmem:[%s1430_s19 + $0x130] sm:$0xff] }
  0x17   : > { %v303_v26 = vrot.slane %v265_v18, %v1432_v8  ;;  %v208_v44 = vld [vmem:[%s1430_s19 + $0x138] sm:$0xff]  ;;  %v1487_v45 = vrot.slane %v251_v27, %v241_v5  ;;  %v281_v46 = vcombine.high %v265_v18, %v265_v18  ;;  %v210_v52 = vld [vmem:[%s1430_s19 + $0x148] sm:$0xff]  ;;  %v209_v53 = vld [vmem:[%s1430_s19 + $0x140] sm:$0xff] }
  0x18   : > { %v1442_v19 = vmul.f32 %v287_v14, %v171_v12  ;;  %v1444_v20 = vmul.f32 %v287_v14, %v169_v13  ;;  %v1450_v21 = vmul.f32 %v287_v14, %v172_v15  ;;  %v1452_v22 = vmul.f32 %v287_v14, %v170_v16  ;;  %v212_v56 = vld [vmem:[%s1430_s19 + $0x158] sm:$0xff]  ;;  %v211_v57 = vld [vmem:[%s1430_s19 + $0x150] sm:$0xff]  ;;  %v214_v58 = vld [vmem:[%s1430_s19 + $0x168] sm:$0xff] }
  0x19   : > { %v1467_v32 = vmul.f32 %v287_v14, %v174_v23  ;;  %v1469_v33 = vmul.f32 %v287_v14, %v173_v24  ;;  %v1477_v38 = vrot.slane %v1456_v25, %v1432_v8  ;;  %v1482_v42 = vmul.f32 %v303_v26, %v202_v29  ;;  %v213_v59 = vld [vmem:[%s1430_s19 + $0x160] sm:$0xff]  ;;  %v216_v60 = vld [vmem:[%s1430_s19 + $0x178] sm:$0xff]  ;;  %v215_v1 = vld [vmem:[%s1430_s19 + $0x170] sm:$0xff] }
  0x1a   : > { %456 = vrot.lane.b32.xlu1 %v1442_v19, %s1393_s20  ;;  %452 = vrot.lane.b32.xlu0 %v1444_v20, %s1393_s20  ;;  %v1484_v43 = vmul.f32 %v303_v26, %v201_v30  ;;  %v1489_v47 = vmul.f32 %v303_v26, %v204_v31  ;;  %v1491_v48 = vmul.f32 %v303_v26, %v203_v34  ;;  %v218_v2 = vld [vmem:[%s1430_s19 + $0x188] sm:$0xff]  ;;  %v217_v3 = vld [vmem:[%s1430_s19 + $0x180] sm:$0xff] }
  0x1b   : > { %v1493_v49 = vmul.f32 %v303_v26, %v206_v35  ;;  %v1495_v50 = vmul.f32 %v303_v26, %v205_v39  ;;  %v1504_v54 = vmul.f32 %v287_v14, %v176_v28  ;;  %v1506_v55 = vmul.f32 %v287_v14, %v175_v36  ;;  %v220_v7 = vld [vmem:[%s1430_s19 + $0x198] sm:$0xff]  ;;  %v219_v9 = vld [vmem:[%s1430_s19 + $0x190] sm:$0xff]  ;;  %v222_v11 = vld [vmem:[%s1430_s19 + $0x1a8] sm:$0xff] }
  0x1c   : > { %v1514_v61 = vmul.f32 %v1477_v38, %v178_v37  ;;  %v1516_v62 = vmul.f32 %v303_v26, %v208_v44  ;;  %v1518_v63 = vmul.f32 %v303_v26, %v207_v51  ;;  %v307_v0 = vrot.slane %v1487_v45, %v1432_v8  ;;  %v221_v16 = vld [vmem:[%s1430_s19 + $0x1a0] sm:$0xff]  ;;  %v224_v17 = vld [vmem:[%s1430_s19 + $0x1b8] sm:$0xff]  ;;  %v179_v18 = vld [vmem:[%s1430_s19 + $0x50] sm:$0xff] }
  0x1d   : > { %v1526_v4 = vmul.f32 %v1477_v38, %v177_v40  ;;  %v1529_v5 = vmul.f32 %v1477_v38, %v180_v41  ;;  %v311_v6 = vrot.slane %v281_v46, %v1432_v8  ;;  %v283_v12 = vcombine.high %v1487_v45, %v1487_v45  ;;  %v223_v28 = vld [vmem:[%s1430_s19 + $0x1b0] sm:$0xff]  ;;  %v226_v35 = vld [vmem:[%s1430_s19 + $0x1c8] sm:$0xff]  ;;  %v225_v36 = vld [vmem:[%s1430_s19 + $0x1c0] sm:$0xff] }
  0x1e   : > { %458 = vrot.lane.b32.xlu1 %v1450_v21, %s1393_s20  ;;  %454 = vrot.lane.b32.xlu0 %v1452_v22, %s1393_s20  ;;  %v1541_v13 = vmul.f32 %v307_v0, %v210_v52  ;;  %v1543_v14 = vmul.f32 %v307_v0, %v209_v53  ;;  %v1545_v15 = vmul.f32 %v307_v0, %v212_v56  ;;  %v228_v37 = vld [vmem:[%s1430_s19 + $0x1d8] sm:$0xff]  ;;  %v227_v45 = vld [vmem:[%s1430_s19 + $0x1d0] sm:$0xff] }
  0x1f   : > { %v1550_v23 = vmul.f32 %v307_v0, %v211_v57  ;;  %v1552_v24 = vmul.f32 %v307_v0, %v214_v58  ;;  %v1554_v26 = vmul.f32 %v307_v0, %v213_v59  ;;  %v1556_v27 = vmul.f32 %v307_v0, %v216_v60  ;;  %v230_v46 = vld [vmem:[%s1430_s19 + $0x1e8] sm:$0xff]  ;;  %v229_v51 = vld [vmem:[%s1430_s19 + $0x1e0] sm:$0xff]  ;;  %v232_v57 = vld [vmem:[%s1430_s19 + $0x1f8] sm:$0xff] }
  0x20   : > { %v1559_v29 = vmul.f32 %v307_v0, %v215_v1  ;;  %v1561_v30 = vmul.f32 %v311_v6, %v218_v2  ;;  %v1563_v31 = vmul.f32 %v311_v6, %v217_v3  ;;  %v1565_v34 = vmul.f32 %v311_v6, %v220_v7  ;;  %v231_v58 = vld [vmem:[%s1430_s19 + $0x1f0] sm:$0xff]  ;;  %v182_v59 = vld [vmem:[%s1430_s19 + $0x68] sm:$0xff]  ;;  %v181_v60 = vld [vmem:[%s1430_s19 + $0x60] sm:$0xff] }
  0x21   : > { %v1570_v39 = vmul.f32 %v311_v6, %v219_v9  ;;  %v1572_v40 = vmul.f32 %v311_v6, %v222_v11  ;;  %v1574_v41 = vmul.f32 %v311_v6, %v221_v16  ;;  %v1576_v44 = vmul.f32 %v311_v6, %v224_v17 }
  0x22   : > { %462 = vrot.lane.b32.xlu1 %v1467_v32, %s1393_s20  ;;  %460 = vrot.lane.b32.xlu0 %v1469_v33, %s1393_s20  ;;  %v1586_v52 = vmul.f32 %v1477_v38, %v179_v18  ;;  %v1588_v53 = vmul.f32 %v311_v6, %v223_v28  ;;  %v315_v56 = vrot.slane %v283_v12, %v1432_v8  ;;  %v184_v18 = vld [vmem:[%s1430_s19 + $0x78] sm:$0xff]  ;;  %v183_v28 = vld [vmem:[%s1430_s19 + $0x70] sm:$0xff] }
  0x23   : > { %2661 = vst [vmem:[#allocation2_spill] sm:$0xff] %v1570_v39  ;;  %2662 = vst [vmem:[#allocation3_spill] sm:$0xff] %v1572_v40  ;;  %v1616_v12 = vmul.f32 %v1477_v38, %v182_v59  ;;  %v1619_v16 = vmul.f32 %v1477_v38, %v181_v60  ;;  %v280_v17 = vcombine.high %v1434_v10, %v1434_v10  ;;  %v185_v10 = vld [vmem:[%s1430_s19 + $0x80] sm:$0xff]  ;;  %v190_v59 = vld [vmem:[%s1430_s19 + $0xa8] sm:$0xff] }
  0x24   : > { %2663 = vst [vmem:[#allocation4_spill] sm:$0xff] %v1574_v41  ;;  %2664 = vst [vmem:[#allocation5_spill] sm:$0xff] %v1586_v52  ;;  %v1595_v0 = vmul.f32 %v315_v56, %v226_v35  ;;  %v1597_v1 = vmul.f32 %v315_v56, %v225_v36  ;;  %v1599_v2 = vmul.f32 %v315_v56, %v228_v37  ;;  %v189_v60 = vld [vmem:[%s1430_s19 + $0xa0] sm:$0xff] }
  0x25   : > { %2665 = vst [vmem:[#allocation6_spill] sm:$0xff] %v1588_v53  ;;  %v1601_v3 = vmul.f32 %v315_v56, %v227_v45  ;;  %v1603_v7 = vmul.f32 %v315_v56, %v230_v46  ;;  %v1605_v6 = vmul.f32 %v315_v56, %v229_v51  ;;  %v1607_v9 = vmul.f32 %v315_v56, %v232_v57  ;;  %v186_v45 = vld [vmem:[%s1430_s19 + $0x88] sm:$0xff]  ;;  %v187_v57 = vld [vmem:[%s1430_s19 + $0x90] sm:$0xff] }
  0x26   : > { %466 = vrot.lane.b32.xlu1 %v1504_v54, %s1393_s20  ;;  %464 = vrot.lane.b32.xlu0 %v1506_v55, %s1393_s20  ;;  %2666 = vst [vmem:[#allocation7_spill] sm:$0xff] %v1595_v0  ;;  %2667 = vst [vmem:[#allocation8_spill] sm:$0xff] %v1597_v1  ;;  %v1609_v11 = vmul.f32 %v315_v56, %v231_v58  ;;  %v1630_v35 = vmul.f32 %v1477_v38, %v184_v18  ;;  %v188_v56 = vld [vmem:[%s1430_s19 + $0x98] sm:$0xff] }
  0x27   : > { %2668 = vst [vmem:[#allocation9_spill] sm:$0xff] %v1601_v3  ;;  %2670 = vst [vmem:[#allocation11_spill] sm:$0xff] %v1616_v12  ;;  %v1633_v36 = vmul.f32 %v1477_v38, %v183_v28  ;;  %v295_v37 = vrot.slane %v280_v17, %v1432_v8  ;;  %v282_v28 = vcombine.high %v1456_v25, %v1456_v25 }
  0x28   : > { %2669 = vst [vmem:[#allocation10_spill] sm:$0xff] %v1609_v11  ;;  %2671 = vst [vmem:[#allocation12_spill] sm:$0xff] %v1619_v16 }
  0x29   : > { %2672 = vst [vmem:[#allocation13_spill] sm:$0xff] %v1633_v36  ;;  %v1642_v46 = vmul.f32 %v295_v37, %v186_v45  ;;  %v1644_v51 = vmul.f32 %v295_v37, %v185_v10  ;;  %v1652_v38 = vmul.f32 %v295_v37, %v188_v56  ;;  %v1654_v58 = vmul.f32 %v295_v37, %v187_v57  ;;  %v192_v45 = vld [vmem:[%s1430_s19 + $0xb8] sm:$0xff]  ;;  %v191_v10 = vld [vmem:[%s1430_s19 + $0xb0] sm:$0xff] }
  0x2a   : > { %470 = vrot.lane.b32.xlu1 %v1514_v61, %s1393_s20  ;;  %468 = vrot.lane.b32.xlu0 %v1526_v4, %s1393_s20  ;;  %v1662_v17 = vmul.f32 %v295_v37, %v190_v59  ;;  %v1664_v18 = vmul.f32 %v295_v37, %v189_v60  ;;  %v1674_v56 = vmul.f32 %v295_v37, %v192_v45  ;;  %v194_v60 = vld [vmem:[%s1430_s19 + $0xc8] sm:$0xff]  ;;  %v196_v45 = vld [vmem:[%s1430_s19 + $0xd8] sm:$0xff] }
  0x2b   : > { %2673 = vst [vmem:[#allocation14_spill] sm:$0xff] %v1642_v46  ;;  %2674 = vst [vmem:[#allocation15_spill] sm:$0xff] %v1644_v51  ;;  %v1676_v57 = vmul.f32 %v295_v37, %v191_v10  ;;  %v299_v59 = vrot.slane %v282_v28, %v1432_v8  ;;  %v198_v28 = vld [vmem:[%s1430_s19 + $0xe8] sm:$0xff]  ;;  %v197_v10 = vld [vmem:[%s1430_s19 + $0xe0] sm:$0xff] }
  0x2c   : > { %2675 = vst [vmem:[#allocation16_spill] sm:$0xff] %v1654_v58  ;;  %2676 = vst [vmem:[#allocation17_spill] sm:$0xff] %v1662_v17 }
  0x2d   : > { %2677 = vst [vmem:[#allocation18_spill] sm:$0xff] %v1664_v18  ;;  %2678 = vst [vmem:[#allocation19_spill] sm:$0xff] %v1676_v57  ;;  %v1685_v25 = vmul.f32 %v299_v59, %v194_v60  ;;  %v1695_v8 = vmul.f32 %v299_v59, %v196_v45  ;;  %v1707_v60 = vmul.f32 %v299_v59, %v197_v10 }
  0x2e   : > { %474 = vrot.lane.b32.xlu1 %v1529_v5, %s1393_s20  ;;  %472 = vrot.lane.b32.xlu0 %v1586_v52, %s1393_s20 }
  0x2f   : > { %2679 = vst [vmem:[#allocation20_spill] sm:$0xff] %v1685_v25 }
  0x32   : > { %478 = vrot.lane.b32.xlu1 %v1616_v12, %s1393_s20  ;;  %476 = vrot.lane.b32.xlu0 %v1619_v16, %s1393_s20 }
  0x36   : > { %482 = vrot.lane.b32.xlu1 %v1630_v35, %s1393_s20  ;;  %480 = vrot.lane.b32.xlu0 %v1633_v36, %s1393_s20 }
  0x3a   : > { %486 = vrot.lane.b32.xlu1 %v1642_v46, %s1393_s20  ;;  %484 = vrot.lane.b32.xlu0 %v1644_v51, %s1393_s20 }
  0x3e   : > { %490 = vrot.lane.b32.xlu1 %v1652_v38, %s1393_s20  ;;  %488 = vrot.lane.b32.xlu0 %v1654_v58, %s1393_s20  ;;  %v193_v58 = vld [vmem:[%s1430_s19 + $0xc0] sm:$0xff] }
  0x42   : > { %494 = vrot.lane.b32.xlu1 %v1662_v17, %s1393_s20  ;;  %492 = vrot.lane.b32.xlu0 %v1664_v18, %s1393_s20  ;;  %v1687_v18 = vmul.f32 %v299_v59, %v193_v58  ;;  %v195_v17 = vld [vmem:[%s1430_s19 + $0xd0] sm:$0xff]  ;;  %v1705_v58 = vmul.f32 %v299_v59, %v198_v28 }
  0x43   : > { %v1697_v37 = vmul.f32 %v299_v59, %v195_v17 }
  0x46   : > { %498 = vrot.lane.b32.xlu1 %v1674_v56, %s1393_s20  ;;  %496 = vrot.lane.b32.xlu0 %v1676_v57, %s1393_s20  ;;  %v199_v57 = vld [vmem:[%s1430_s19 + $0xf0] sm:$0xff] }
  0x47   : > { %v1717_v45 = vmul.f32 %v299_v59, %v199_v57 }
  0x4a   : > { %502 = vrot.lane.b32.xlu1 %v1685_v25, %s1393_s20  ;;  %500 = vrot.lane.b32.xlu0 %v1687_v18, %s1393_s20  ;;  %v200_v25 = vld [vmem:[%s1430_s19 + $0xf8] sm:$0xff] }
  0x4b   : > { %v1715_v17 = vmul.f32 %v299_v59, %v200_v25 }
  0x4e   : > { %506 = vrot.lane.b32.xlu1 %v1695_v8, %s1393_s20  ;;  %504 = vrot.lane.b32.xlu0 %v1697_v37, %s1393_s20 }
  0x52   : > { %510 = vrot.lane.b32.xlu1 %v1705_v58, %s1393_s20  ;;  %508 = vrot.lane.b32.xlu0 %v1707_v60, %s1393_s20 }
  0x56   : > { %514 = vrot.lane.b32.xlu1 %v1715_v17, %s1393_s20  ;;  %512 = vrot.lane.b32.xlu0 %v1717_v45, %s1393_s20 }
  0x5a   : > { %518 = vrot.lane.b32.xlu1 %v1482_v42, %s1393_s20  ;;  %516 = vrot.lane.b32.xlu0 %v1484_v43, %s1393_s20 }
  0x5e   : > { %522 = vrot.lane.b32.xlu1 %v1489_v47, %s1393_s20  ;;  %520 = vrot.lane.b32.xlu0 %v1491_v48, %s1393_s20 }
  0x62   : > { %526 = vrot.lane.b32.xlu1 %v1493_v49, %s1393_s20  ;;  %524 = vrot.lane.b32.xlu0 %v1495_v50, %s1393_s20 }
  0x66   : > { %530 = vrot.lane.b32.xlu1 %v1516_v62, %s1393_s20  ;;  %528 = vrot.lane.b32.xlu0 %v1518_v63, %s1393_s20 }
  0x6a   : > { %534 = vrot.lane.b32.xlu1 %v1541_v13, %s1393_s20  ;;  %532 = vrot.lane.b32.xlu0 %v1543_v14, %s1393_s20 }
  0x6e   : > { %538 = vrot.lane.b32.xlu1 %v1545_v15, %s1393_s20  ;;  %536 = vrot.lane.b32.xlu0 %v1550_v23, %s1393_s20 }
  0x72   : > { %542 = vrot.lane.b32.xlu1 %v1552_v24, %s1393_s20  ;;  %540 = vrot.lane.b32.xlu0 %v1554_v26, %s1393_s20 }
  0x76   : > { %546 = vrot.lane.b32.xlu1 %v1556_v27, %s1393_s20  ;;  %544 = vrot.lane.b32.xlu0 %v1559_v29, %s1393_s20 }
  0x7a   : > { %550 = vrot.lane.b32.xlu1 %v1561_v30, %s1393_s20  ;;  %548 = vrot.lane.b32.xlu0 %v1563_v31, %s1393_s20 }
  0x7e   : > { %554 = vrot.lane.b32.xlu1 %v1565_v34, %s1393_s20  ;;  %552 = vrot.lane.b32.xlu0 %v1570_v39, %s1393_s20 }
  0x82   : > { %558 = vrot.lane.b32.xlu1 %v1572_v40, %s1393_s20  ;;  %556 = vrot.lane.b32.xlu0 %v1574_v41, %s1393_s20 }
  0x86   : > { %562 = vrot.lane.b32.xlu1 %v1576_v44, %s1393_s20  ;;  %560 = vrot.lane.b32.xlu0 %v1588_v53, %s1393_s20 }
  0x8a   : > { %566 = vrot.lane.b32.xlu1 %v1595_v0, %s1393_s20  ;;  %564 = vrot.lane.b32.xlu0 %v1597_v1, %s1393_s20 }
  0x8c   : > { %v1775_v57 = vpop.permute.xlu1 %456  ;;  %v1777_v59 = vpop.permute.xlu0 %452 }
  0x8d   : > { %2680 = vst [vmem:[#allocation21_spill] sm:$0xff] %v1775_v57  ;;  %2681 = vst [vmem:[#allocation22_spill] sm:$0xff] %v1777_v59 }
  0x8e   : > { %570 = vrot.lane.b32.xlu1 %v1599_v2, %s1393_s20  ;;  %568 = vrot.lane.b32.xlu0 %v1601_v3, %s1393_s20 }
  0x90   : > { %v1783_v25 = vpop.permute.xlu1 %458  ;;  %v1785_v28 = vpop.permute.xlu0 %454 }
  0x91   : > { %2682 = vst [vmem:[#allocation23_spill] sm:$0xff] %v1783_v25  ;;  %2683 = vst [vmem:[#allocation24_spill] sm:$0xff] %v1785_v28 }
  0x92   : > { %574 = vrot.lane.b32.xlu1 %v1603_v7, %s1393_s20  ;;  %572 = vrot.lane.b32.xlu0 %v1605_v6, %s1393_s20 }
  0x94   : > { %v1791_v10 = vpop.permute.xlu1 %462  ;;  %v1793_v57 = vpop.permute.xlu0 %460 }
  0x95   : > { %2684 = vst [vmem:[#allocation25_spill] sm:$0xff] %v1791_v10  ;;  %2685 = vst [vmem:[#allocation26_spill] sm:$0xff] %v1793_v57 }
  0x96   : > { %578 = vrot.lane.b32.xlu1 %v1607_v9, %s1393_s20  ;;  %576 = vrot.lane.b32.xlu0 %v1609_v11, %s1393_s20 }
  0x98   : > { %v1799_v59 = vpop.permute.xlu1 %466  ;;  %v1801_v25 = vpop.permute.xlu0 %464 }
  0x99   : > { %2686 = vst [vmem:[#allocation27_spill] sm:$0xff] %v1799_v59  ;;  %2687 = vst [vmem:[#allocation28_spill] sm:$0xff] %v1801_v25 }
  0x9a   : > { %710 = vrot.lane.b32.xlu1 %v1452_v22, %s1394_s21  ;;  %708 = vrot.lane.b32.xlu0 %v1444_v20, %s1394_s21 }
  0x9c   : > { %v1807_v10 = vpop.permute.xlu1 %470  ;;  %v1809_v57 = vpop.permute.xlu0 %468 }
  0x9d   : > { %2688 = vst [vmem:[#allocation29_spill] sm:$0xff] %v1807_v10  ;;  %2689 = vst [vmem:[#allocation30_spill] sm:$0xff] %v1809_v57 }
  0x9e   : > { %714 = vrot.lane.b32.xlu1 %v1450_v21, %s1394_s21  ;;  %712 = vrot.lane.b32.xlu0 %v1442_v19, %s1394_s21 }
  0xa0   : > { %v1815_v59 = vpop.permute.xlu1 %474  ;;  %v1817_v25 = vpop.permute.xlu0 %472 }
  0xa1   : > { %2690 = vst [vmem:[#allocation31_spill] sm:$0xff] %v1815_v59  ;;  %2691 = vst [vmem:[#allocation32_spill] sm:$0xff] %v1817_v25 }
  0xa2   : > { %718 = vrot.lane.b32.xlu1 %v1467_v32, %s1394_s21  ;;  %716 = vrot.lane.b32.xlu0 %v1469_v33, %s1394_s21 }
  0xa4   : > { %v1823_v28 = vpop.permute.xlu1 %478  ;;  %v1825_v10 = vpop.permute.xlu0 %476 }
  0xa5   : > { %2692 = vst [vmem:[#allocation33_spill] sm:$0xff] %v1823_v28  ;;  %2693 = vst [vmem:[#allocation34_spill] sm:$0xff] %v1825_v10 }
  0xa6   : > { %722 = vrot.lane.b32.xlu1 %v1504_v54, %s1394_s21  ;;  %720 = vrot.lane.b32.xlu0 %v1506_v55, %s1394_s21 }
  0xa8   : > { %v1831_v57 = vpop.permute.xlu1 %482  ;;  %v1833_v59 = vpop.permute.xlu0 %480 }
  0xa9   : > { %2694 = vst [vmem:[#allocation35_spill] sm:$0xff] %v1831_v57  ;;  %2695 = vst [vmem:[#allocation36_spill] sm:$0xff] %v1833_v59 }
  0xaa   : > { %726 = vrot.lane.b32.xlu1 %v1514_v61, %s1394_s21  ;;  %724 = vrot.lane.b32.xlu0 %v1526_v4, %s1394_s21 }
  0xac   : > { %v1839_v25 = vpop.permute.xlu1 %486  ;;  %v1841_v28 = vpop.permute.xlu0 %484 }
  0xad   : > { %2696 = vst [vmem:[#allocation37_spill] sm:$0xff] %v1839_v25  ;;  %2697 = vst [vmem:[#allocation38_spill] sm:$0xff] %v1841_v28 }
  0xae   : > { %730 = vrot.lane.b32.xlu1 %v1529_v5, %s1394_s21  ;;  %728 = vrot.lane.b32.xlu0 %v1586_v52, %s1394_s21 }
  0xb0   : > { %v1847_v10 = vpop.permute.xlu1 %490  ;;  %v1849_v57 = vpop.permute.xlu0 %488 }
  0xb1   : > { %2698 = vst [vmem:[#allocation39_spill] sm:$0xff] %v1847_v10  ;;  %2699 = vst [vmem:[#allocation40_spill] sm:$0xff] %v1849_v57 }
  0xb2   : > { %734 = vrot.lane.b32.xlu1 %v1616_v12, %s1394_s21  ;;  %732 = vrot.lane.b32.xlu0 %v1619_v16, %s1394_s21 }
  0xb4   : > { %v1855_v59 = vpop.permute.xlu1 %494  ;;  %v1857_v25 = vpop.permute.xlu0 %492 }
  0xb5   : > { %2700 = vst [vmem:[#allocation41_spill] sm:$0xff] %v1855_v59  ;;  %2701 = vst [vmem:[#allocation42_spill] sm:$0xff] %v1857_v25  ;;  %v2706_v25 = vld [vmem:[#allocation16_spill] sm:$0xff] }
  0xb6   : > { %738 = vrot.lane.b32.xlu1 %v1630_v35, %s1394_s21  ;;  %736 = vrot.lane.b32.xlu0 %v1633_v36, %s1394_s21 }
  0xb8   : > { %v1863_v28 = vpop.permute.xlu1 %498  ;;  %v1865_v10 = vpop.permute.xlu0 %496 }
  0xb9   : > { %2702 = vst [vmem:[#allocation43_spill] sm:$0xff] %v1863_v28  ;;  %2703 = vst [vmem:[#allocation44_spill] sm:$0xff] %v1865_v10  ;;  %v2709_v10 = vld [vmem:[#allocation17_spill] sm:$0xff] }
  0xba   : > { %742 = vrot.lane.b32.xlu1 %v1642_v46, %s1394_s21  ;;  %740 = vrot.lane.b32.xlu0 %v1644_v51, %s1394_s21  ;;  %v2710_v46 = vld [vmem:[#allocation18_spill] sm:$0xff] }
  0xbc   : > { %v1871_v57 = vpop.permute.xlu1 %502  ;;  %v1873_v59 = vpop.permute.xlu0 %500 }
  0xbd   : > { %2704 = vst [vmem:[#allocation45_spill] sm:$0xff] %v1871_v57  ;;  %2705 = vst [vmem:[#allocation46_spill] sm:$0xff] %v1873_v59  ;;  %v2713_v59 = vld [vmem:[#allocation19_spill] sm:$0xff] }
  0xbe   : > { %746 = vrot.lane.b32.xlu1 %v1652_v38, %s1394_s21  ;;  %744 = vrot.lane.b32.xlu0 %v2706_v25, %s1394_s21 }
  0xc0   : > { %v1879_v36 = vpop.permute.xlu1 %506  ;;  %v1881_v28 = vpop.permute.xlu0 %504 }
  0xc1   : > { %2707 = vst [vmem:[#allocation47_spill] sm:$0xff] %v1879_v36  ;;  %2708 = vst [vmem:[#allocation48_spill] sm:$0xff] %v1881_v28  ;;  %v2716_v28 = vld [vmem:[#allocation20_spill] sm:$0xff] }
  0xc2   : > { %750 = vrot.lane.b32.xlu1 %v2709_v10, %s1394_s21  ;;  %748 = vrot.lane.b32.xlu0 %v2710_v46, %s1394_s21 }
  0xc4   : > { %v1887_v51 = vpop.permute.xlu1 %510  ;;  %v1889_v57 = vpop.permute.xlu0 %508 }
  0xc5   : > { %2711 = vst [vmem:[#allocation17_spill] sm:$0xff] %v1887_v51  ;;  %2712 = vst [vmem:[#allocation49_spill] sm:$0xff] %v1889_v57 }
  0xc6   : > { %754 = vrot.lane.b32.xlu1 %v1674_v56, %s1394_s21  ;;  %752 = vrot.lane.b32.xlu0 %v2713_v59, %s1394_s21 }
  0xc8   : > { %v1895_v25 = vpop.permute.xlu1 %514  ;;  %v1897_v36 = vpop.permute.xlu0 %512 }
  0xc9   : > { %2714 = vst [vmem:[#allocation19_spill] sm:$0xff] %v1895_v25  ;;  %2715 = vst [vmem:[#allocation50_spill] sm:$0xff] %v1897_v36 }
  0xca   : > { %758 = vrot.lane.b32.xlu1 %v2716_v28, %s1394_s21  ;;  %756 = vrot.lane.b32.xlu0 %v1687_v18, %s1394_s21 }
  0xcc   : > { %v1903_v46 = vpop.permute.xlu1 %518  ;;  %v1905_v51 = vpop.permute.xlu0 %516 }
  0xcd   : > { %2717 = vst [vmem:[#allocation20_spill] sm:$0xff] %v1903_v46  ;;  %2718 = vst [vmem:[#allocation51_spill] sm:$0xff] %v1905_v51 }
  0xce   : > { %762 = vrot.lane.b32.xlu1 %v1695_v8, %s1394_s21  ;;  %760 = vrot.lane.b32.xlu0 %v1697_v37, %s1394_s21 }
  0xd0   : > { %v1911_v57 = vpop.permute.xlu1 %522  ;;  %v1913_v25 = vpop.permute.xlu0 %520 }
  0xd1   : > { %2719 = vst [vmem:[#allocation52_spill] sm:$0xff] %v1911_v57  ;;  %2720 = vst [vmem:[#allocation53_spill] sm:$0xff] %v1913_v25 }
  0xd2   : > { %766 = vrot.lane.b32.xlu1 %v1705_v58, %s1394_s21  ;;  %764 = vrot.lane.b32.xlu0 %v1707_v60, %s1394_s21 }
  0xd4   : > { %v1919_v36 = vpop.permute.xlu1 %526  ;;  %v1921_v46 = vpop.permute.xlu0 %524 }
  0xd5   : > { %2721 = vst [vmem:[#allocation54_spill] sm:$0xff] %v1919_v36  ;;  %2722 = vst [vmem:[#allocation55_spill] sm:$0xff] %v1921_v46 }
  0xd6   : > { %770 = vrot.lane.b32.xlu1 %v1715_v17, %s1394_s21  ;;  %768 = vrot.lane.b32.xlu0 %v1717_v45, %s1394_s21 }
  0xd8   : > { %v1927_v51 = vpop.permute.xlu1 %530  ;;  %v1929_v57 = vpop.permute.xlu0 %528 }
  0xd9   : > { %2723 = vst [vmem:[#allocation56_spill] sm:$0xff] %v1927_v51  ;;  %2724 = vst [vmem:[#allocation57_spill] sm:$0xff] %v1929_v57 }
  0xda   : > { %774 = vrot.lane.b32.xlu1 %v1482_v42, %s1394_s21  ;;  %772 = vrot.lane.b32.xlu0 %v1484_v43, %s1394_s21 }
  0xdc   : > { %v1935_v25 = vpop.permute.xlu1 %534  ;;  %v1937_v36 = vpop.permute.xlu0 %532 }
  0xdd   : > { %2725 = vst [vmem:[#allocation58_spill] sm:$0xff] %v1935_v25  ;;  %2726 = vst [vmem:[#allocation59_spill] sm:$0xff] %v1937_v36 }
  0xde   : > { %778 = vrot.lane.b32.xlu1 %v1489_v47, %s1394_s21  ;;  %776 = vrot.lane.b32.xlu0 %v1491_v48, %s1394_s21 }
  0xe0   : > { %v1943_v46 = vpop.permute.xlu1 %538  ;;  %v1945_v51 = vpop.permute.xlu0 %536 }
  0xe1   : > { %2727 = vst [vmem:[#allocation60_spill] sm:$0xff] %v1943_v46  ;;  %2728 = vst [vmem:[#allocation61_spill] sm:$0xff] %v1945_v51 }
  0xe2   : > { %782 = vrot.lane.b32.xlu1 %v1493_v49, %s1394_s21  ;;  %780 = vrot.lane.b32.xlu0 %v1495_v50, %s1394_s21 }
  0xe4   : > { %v1951_v57 = vpop.permute.xlu1 %542  ;;  %v1953_v25 = vpop.permute.xlu0 %540 }
  0xe5   : > { %2729 = vst [vmem:[#allocation62_spill] sm:$0xff] %v1951_v57  ;;  %2730 = vst [vmem:[#allocation63_spill] sm:$0xff] %v1953_v25 }
  0xe6   : > { %786 = vrot.lane.b32.xlu1 %v1516_v62, %s1394_s21  ;;  %784 = vrot.lane.b32.xlu0 %v1518_v63, %s1394_s21 }
  0xe8   : > { %v1959_v36 = vpop.permute.xlu1 %546  ;;  %v1961_v46 = vpop.permute.xlu0 %544 }
  0xe9   : > { %2731 = vst [vmem:[#allocation64_spill] sm:$0xff] %v1959_v36  ;;  %2732 = vst [vmem:[#allocation65_spill] sm:$0xff] %v1961_v46 }
  0xea   : > { %790 = vrot.lane.b32.xlu1 %v1541_v13, %s1394_s21  ;;  %788 = vrot.lane.b32.xlu0 %v1543_v14, %s1394_s21 }
  0xec   : > { %v1967_v51 = vpop.permute.xlu1 %550  ;;  %v1969_v57 = vpop.permute.xlu0 %548 }
  0xed   : > { %2733 = vst [vmem:[#allocation66_spill] sm:$0xff] %v1967_v51  ;;  %2734 = vst [vmem:[#allocation67_spill] sm:$0xff] %v1969_v57 }
  0xee   : > { %794 = vrot.lane.b32.xlu1 %v1545_v15, %s1394_s21  ;;  %792 = vrot.lane.b32.xlu0 %v1550_v23, %s1394_s21 }
  0xf0   : > { %v1975_v25 = vpop.permute.xlu1 %554  ;;  %v1977_v36 = vpop.permute.xlu0 %552 }
  0xf1   : > { %2735 = vst [vmem:[#allocation68_spill] sm:$0xff] %v1975_v25  ;;  %2736 = vst [vmem:[#allocation69_spill] sm:$0xff] %v1977_v36 }
  0xf2   : > { %798 = vrot.lane.b32.xlu1 %v1552_v24, %s1394_s21  ;;  %796 = vrot.lane.b32.xlu0 %v1554_v26, %s1394_s21 }
  0xf4   : > { %v1983_v46 = vpop.permute.xlu1 %558  ;;  %v1985_v51 = vpop.permute.xlu0 %556 }
  0xf5   : > { %2737 = vst [vmem:[#allocation70_spill] sm:$0xff] %v1983_v46  ;;  %2738 = vst [vmem:[#allocation71_spill] sm:$0xff] %v1985_v51 }
  0xf6   : > { %802 = vrot.lane.b32.xlu1 %v1556_v27, %s1394_s21  ;;  %800 = vrot.lane.b32.xlu0 %v1559_v29, %s1394_s21 }
  0xf8   : > { %v1991_v57 = vpop.permute.xlu1 %562  ;;  %v1993_v25 = vpop.permute.xlu0 %560 }
  0xf9   : > { %2739 = vst [vmem:[#allocation72_spill] sm:$0xff] %v1991_v57  ;;  %2740 = vst [vmem:[#allocation73_spill] sm:$0xff] %v1993_v25 }
  0xfa   : > { %806 = vrot.lane.b32.xlu1 %v1561_v30, %s1394_s21  ;;  %804 = vrot.lane.b32.xlu0 %v1563_v31, %s1394_s21 }
  0xfc   : > { %v1999_v36 = vpop.permute.xlu1 %566  ;;  %v2001_v46 = vpop.permute.xlu0 %564 }
  0xfd   : > { %2741 = vst [vmem:[#allocation74_spill] sm:$0xff] %v1999_v36  ;;  %2742 = vst [vmem:[#allocation75_spill] sm:$0xff] %v2001_v46 }
  0xfe   : > { %810 = vrot.lane.b32.xlu1 %v1565_v34, %s1394_s21  ;;  %808 = vrot.lane.b32.xlu0 %v1570_v39, %s1394_s21 }
 0x100   : > { %v2007_v51 = vpop.permute.xlu1 %570  ;;  %v2009_v57 = vpop.permute.xlu0 %568 }
 0x101   : > { %2743 = vst [vmem:[#allocation76_spill] sm:$0xff] %v2007_v51  ;;  %2744 = vst [vmem:[#allocation77_spill] sm:$0xff] %v2009_v57 }
 0x102   : > { %814 = vrot.lane.b32.xlu1 %v1572_v40, %s1394_s21  ;;  %812 = vrot.lane.b32.xlu0 %v1574_v41, %s1394_s21 }
 0x104   : > { %v2015_v25 = vpop.permute.xlu1 %574  ;;  %v2017_v36 = vpop.permute.xlu0 %572 }
 0x105   : > { %2745 = vst [vmem:[#allocation78_spill] sm:$0xff] %v2015_v25  ;;  %2746 = vst [vmem:[#allocation79_spill] sm:$0xff] %v2017_v36 }
 0x106   : > { %818 = vrot.lane.b32.xlu1 %v1576_v44, %s1394_s21  ;;  %816 = vrot.lane.b32.xlu0 %v1588_v53, %s1394_s21 }
 0x108   : > { %v2023_v46 = vpop.permute.xlu1 %578  ;;  %v2025_v51 = vpop.permute.xlu0 %576 }
 0x109   : > { %2747 = vst [vmem:[#allocation80_spill] sm:$0xff] %v2023_v46  ;;  %2748 = vst [vmem:[#allocation81_spill] sm:$0xff] %v2025_v51 }
 0x10a   : > { %822 = vrot.lane.b32.xlu1 %v1595_v0, %s1394_s21  ;;  %820 = vrot.lane.b32.xlu0 %v1597_v1, %s1394_s21 }
 0x10c   : > { %v2031_v57 = vpop.permute.xlu1 %710  ;;  %v2033_v25 = vpop.permute.xlu0 %708 }
 0x10d   : > { %2749 = vst [vmem:[#allocation82_spill] sm:$0xff] %v2031_v57 }
 0x10e   : > { %826 = vrot.lane.b32.xlu1 %v1599_v2, %s1394_s21  ;;  %824 = vrot.lane.b32.xlu0 %v1601_v3, %s1394_s21 }
 0x110   : > { %v2039_v36 = vpop.permute.xlu1 %714  ;;  %v2041_v46 = vpop.permute.xlu0 %712 }
 0x111   : > { %2750 = vst [vmem:[#allocation83_spill] sm:$0xff] %v2039_v36 }
 0x112   : > { %830 = vrot.lane.b32.xlu1 %v1603_v7, %s1394_s21  ;;  %828 = vrot.lane.b32.xlu0 %v1605_v6, %s1394_s21 }
 0x114   : > { %v2047_v51 = vpop.permute.xlu1 %718  ;;  %v2049_v57 = vpop.permute.xlu0 %716 }
 0x115   : > { %2751 = vst [vmem:[#allocation84_spill] sm:$0xff] %v2047_v51  ;;  %2752 = vst [vmem:[#allocation85_spill] sm:$0xff] %v2049_v57 }
 0x116   : > { %834 = vrot.lane.b32.xlu1 %v1607_v9, %s1394_s21  ;;  %832 = vrot.lane.b32.xlu0 %v1609_v11, %s1394_s21 }
 0x118   : > { %v2055_v3 = vpop.permute.xlu1 %722  ;;  %v2057_v36 = vpop.permute.xlu0 %720 }
 0x119   : > { %2753 = vst [vmem:[#allocation86_spill] sm:$0xff] %v2055_v3  ;;  %2754 = vst [vmem:[#allocation87_spill] sm:$0xff] %v2057_v36 }
 0x11a   : > { %966 = vrot.lane.b32.xlu1 %v1452_v22, %s1395_s22  ;;  %964 = vrot.lane.b32.xlu0 %v1444_v20, %s1395_s22 }
 0x11c   : > { %v2063_v51 = vpop.permute.xlu1 %726  ;;  %v2065_v57 = vpop.permute.xlu0 %724 }
 0x11d   : > { %2755 = vst [vmem:[#allocation88_spill] sm:$0xff] %v2063_v51  ;;  %2756 = vst [vmem:[#allocation89_spill] sm:$0xff] %v2065_v57 }
 0x11e   : > { %970 = vrot.lane.b32.xlu1 %v1450_v21, %s1395_s22  ;;  %968 = vrot.lane.b32.xlu0 %v1442_v19, %s1395_s22 }
 0x120   : > { %v2071_v3 = vpop.permute.xlu1 %730  ;;  %v2073_v36 = vpop.permute.xlu0 %728 }
 0x121   : > { %2757 = vst [vmem:[#allocation90_spill] sm:$0xff] %v2071_v3  ;;  %2758 = vst [vmem:[#allocation91_spill] sm:$0xff] %v2073_v36 }
 0x122   : > { %974 = vrot.lane.b32.xlu1 %v1467_v32, %s1395_s22  ;;  %972 = vrot.lane.b32.xlu0 %v1469_v33, %s1395_s22 }
 0x124   : > { %v2079_v11 = vpop.permute.xlu1 %734  ;;  %v2081_v51 = vpop.permute.xlu0 %732 }
 0x125   : > { %2759 = vst [vmem:[#allocation92_spill] sm:$0xff] %v2079_v11  ;;  %2760 = vst [vmem:[#allocation93_spill] sm:$0xff] %v2081_v51 }
 0x126   : > { %978 = vrot.lane.b32.xlu1 %v1504_v54, %s1395_s22  ;;  %976 = vrot.lane.b32.xlu0 %v1506_v55, %s1395_s22 }
 0x128   : > { %v2087_v57 = vpop.permute.xlu1 %738  ;;  %v2089_v3 = vpop.permute.xlu0 %736 }
 0x129   : > { %2761 = vst [vmem:[#allocation94_spill] sm:$0xff] %v2087_v57  ;;  %2762 = vst [vmem:[#allocation95_spill] sm:$0xff] %v2089_v3 }
 0x12a   : > { %982 = vrot.lane.b32.xlu1 %v1514_v61, %s1395_s22  ;;  %980 = vrot.lane.b32.xlu0 %v1526_v4, %s1395_s22 }
 0x12c   : > { %v2095_v36 = vpop.permute.xlu1 %742  ;;  %v2097_v11 = vpop.permute.xlu0 %740 }
 0x12d   : > { %2763 = vst [vmem:[#allocation96_spill] sm:$0xff] %v2095_v36  ;;  %2764 = vst [vmem:[#allocation97_spill] sm:$0xff] %v2097_v11  ;;  %v2769_v11 = vld [vmem:[#allocation13_spill] sm:$0xff] }
 0x12e   : > { %986 = vrot.lane.b32.xlu1 %v1529_v5, %s1395_s22  ;;  %984 = vrot.lane.b32.xlu0 %v1586_v52, %s1395_s22 }
 0x130   : > { %v2103_v51 = vpop.permute.xlu1 %746  ;;  %v2105_v57 = vpop.permute.xlu0 %744 }
 0x131   : > { %2765 = vst [vmem:[#allocation98_spill] sm:$0xff] %v2103_v51  ;;  %2766 = vst [vmem:[#allocation99_spill] sm:$0xff] %v2105_v57  ;;  %v2772_v57 = vld [vmem:[#allocation14_spill] sm:$0xff] }
 0x132   : > { %990 = vrot.lane.b32.xlu1 %v1616_v12, %s1395_s22  ;;  %988 = vrot.lane.b32.xlu0 %v1619_v16, %s1395_s22  ;;  %v2773_v12 = vld [vmem:[#allocation15_spill] sm:$0xff] }
 0x134   : > { %v2111_v3 = vpop.permute.xlu1 %750  ;;  %v2113_v36 = vpop.permute.xlu0 %748 }
 0x135   : > { %2767 = vst [vmem:[#allocation100_spill] sm:$0xff] %v2111_v3  ;;  %2768 = vst [vmem:[#allocation101_spill] sm:$0xff] %v2113_v36  ;;  %v2776_v36 = vld [vmem:[#allocation16_spill] sm:$0xff] }
 0x136   : > { %994 = vrot.lane.b32.xlu1 %v1630_v35, %s1395_s22  ;;  %992 = vrot.lane.b32.xlu0 %v2769_v11, %s1395_s22 }
 0x138   : > { %v2119_v52 = vpop.permute.xlu1 %754  ;;  %v2121_v51 = vpop.permute.xlu0 %752 }
 0x139   : > { %2770 = vst [vmem:[#allocation102_spill] sm:$0xff] %v2119_v52  ;;  %2771 = vst [vmem:[#allocation103_spill] sm:$0xff] %v2121_v51  ;;  %v2779_v51 = vld [vmem:[#allocation18_spill] sm:$0xff] }
 0x13a   : > { %998 = vrot.lane.b32.xlu1 %v2772_v57, %s1395_s22  ;;  %996 = vrot.lane.b32.xlu0 %v2773_v12, %s1395_s22 }
 0x13c   : > { %v2127_v16 = vpop.permute.xlu1 %758  ;;  %v2129_v3 = vpop.permute.xlu0 %756 }
 0x13d   : > { %2774 = vst [vmem:[#allocation14_spill] sm:$0xff] %v2127_v16  ;;  %2775 = vst [vmem:[#allocation104_spill] sm:$0xff] %v2129_v3 }
 0x13e   : > { %1002 = vrot.lane.b32.xlu1 %v1652_v38, %s1395_s22  ;;  %1000 = vrot.lane.b32.xlu0 %v2776_v36, %s1395_s22 }
 0x140   : > { %v2135_v11 = vpop.permute.xlu1 %762  ;;  %v2137_v52 = vpop.permute.xlu0 %760 }
 0x141   : > { %2777 = vst [vmem:[#allocation16_spill] sm:$0xff] %v2135_v11  ;;  %2778 = vst [vmem:[#allocation105_spill] sm:$0xff] %v2137_v52 }
 0x142   : > { %1006 = vrot.lane.b32.xlu1 %v2709_v10, %s1395_s22  ;;  %1004 = vrot.lane.b32.xlu0 %v2779_v51, %s1395_s22 }
 0x144   : > { %v2143_v12 = vpop.permute.xlu1 %766  ;;  %v2145_v16 = vpop.permute.xlu0 %764 }
 0x145   : > { %2780 = vst [vmem:[#allocation18_spill] sm:$0xff] %v2143_v12  ;;  %2781 = vst [vmem:[#allocation106_spill] sm:$0xff] %v2145_v16 }
 0x146   : > { %1010 = vrot.lane.b32.xlu1 %v1674_v56, %s1395_s22  ;;  %1008 = vrot.lane.b32.xlu0 %v2713_v59, %s1395_s22 }
 0x148   : > { %v2151_v3 = vpop.permute.xlu1 %770  ;;  %v2153_v11 = vpop.permute.xlu0 %768 }
 0x149   : > { %2782 = vst [vmem:[#allocation107_spill] sm:$0xff] %v2151_v3  ;;  %2783 = vst [vmem:[#allocation108_spill] sm:$0xff] %v2153_v11 }
 0x14a   : > { %1014 = vrot.lane.b32.xlu1 %v2716_v28, %s1395_s22  ;;  %1012 = vrot.lane.b32.xlu0 %v1687_v18, %s1395_s22 }
 0x14c   : > { %v2159_v52 = vpop.permute.xlu1 %774  ;;  %v2161_v12 = vpop.permute.xlu0 %772 }
 0x14d   : > { %2784 = vst [vmem:[#allocation109_spill] sm:$0xff] %v2159_v52  ;;  %2785 = vst [vmem:[#allocation110_spill] sm:$0xff] %v2161_v12 }
 0x14e   : > { %1018 = vrot.lane.b32.xlu1 %v1695_v8, %s1395_s22  ;;  %1016 = vrot.lane.b32.xlu0 %v1697_v37, %s1395_s22 }
 0x150   : > { %v2167_v16 = vpop.permute.xlu1 %778  ;;  %v2169_v3 = vpop.permute.xlu0 %776 }
 0x151   : > { %2786 = vst [vmem:[#allocation111_spill] sm:$0xff] %v2167_v16  ;;  %2787 = vst [vmem:[#allocation112_spill] sm:$0xff] %v2169_v3 }
 0x152   : > { %1022 = vrot.lane.b32.xlu1 %v1705_v58, %s1395_s22  ;;  %1020 = vrot.lane.b32.xlu0 %v1707_v60, %s1395_s22 }
 0x154   : > { %v2175_v11 = vpop.permute.xlu1 %782  ;;  %v2177_v52 = vpop.permute.xlu0 %780 }
 0x155   : > { %2788 = vst [vmem:[#allocation113_spill] sm:$0xff] %v2175_v11  ;;  %2789 = vst [vmem:[#allocation114_spill] sm:$0xff] %v2177_v52 }
 0x156   : > { %1026 = vrot.lane.b32.xlu1 %v1715_v17, %s1395_s22  ;;  %1024 = vrot.lane.b32.xlu0 %v1717_v45, %s1395_s22 }
 0x158   : > { %v2183_v12 = vpop.permute.xlu1 %786  ;;  %v2185_v16 = vpop.permute.xlu0 %784 }
 0x159   : > { %2790 = vst [vmem:[#allocation115_spill] sm:$0xff] %v2183_v12  ;;  %2791 = vst [vmem:[#allocation116_spill] sm:$0xff] %v2185_v16 }
 0x15a   : > { %1030 = vrot.lane.b32.xlu1 %v1482_v42, %s1395_s22  ;;  %1028 = vrot.lane.b32.xlu0 %v1484_v43, %s1395_s22 }
 0x15c   : > { %v2191_v3 = vpop.permute.xlu1 %790  ;;  %v2193_v11 = vpop.permute.xlu0 %788 }
 0x15d   : > { %2792 = vst [vmem:[#allocation117_spill] sm:$0xff] %v2191_v3  ;;  %2793 = vst [vmem:[#allocation118_spill] sm:$0xff] %v2193_v11 }
 0x15e   : > { %1034 = vrot.lane.b32.xlu1 %v1489_v47, %s1395_s22  ;;  %1032 = vrot.lane.b32.xlu0 %v1491_v48, %s1395_s22 }
 0x160   : > { %v2199_v52 = vpop.permute.xlu1 %794  ;;  %v2201_v12 = vpop.permute.xlu0 %792 }
 0x161   : > { %2794 = vst [vmem:[#allocation119_spill] sm:$0xff] %v2199_v52  ;;  %2795 = vst [vmem:[#allocation120_spill] sm:$0xff] %v2201_v12 }
 0x162   : > { %1038 = vrot.lane.b32.xlu1 %v1493_v49, %s1395_s22  ;;  %1036 = vrot.lane.b32.xlu0 %v1495_v50, %s1395_s22 }
 0x164   : > { %v2207_v16 = vpop.permute.xlu1 %798  ;;  %v2209_v3 = vpop.permute.xlu0 %796 }
 0x165   : > { %2796 = vst [vmem:[#allocation121_spill] sm:$0xff] %v2207_v16  ;;  %2797 = vst [vmem:[#allocation122_spill] sm:$0xff] %v2209_v3 }
 0x166   : > { %1042 = vrot.lane.b32.xlu1 %v1516_v62, %s1395_s22  ;;  %1040 = vrot.lane.b32.xlu0 %v1518_v63, %s1395_s22 }
 0x168   : > { %v2215_v11 = vpop.permute.xlu1 %802  ;;  %v2217_v52 = vpop.permute.xlu0 %800 }
 0x169   : > { %2798 = vst [vmem:[#allocation123_spill] sm:$0xff] %v2215_v11  ;;  %2799 = vst [vmem:[#allocation124_spill] sm:$0xff] %v2217_v52 }
 0x16a   : > { %1046 = vrot.lane.b32.xlu1 %v1541_v13, %s1395_s22  ;;  %1044 = vrot.lane.b32.xlu0 %v1543_v14, %s1395_s22 }
 0x16c   : > { %v2223_v12 = vpop.permute.xlu1 %806  ;;  %v2225_v16 = vpop.permute.xlu0 %804 }
 0x16d   : > { %2800 = vst [vmem:[#allocation125_spill] sm:$0xff] %v2223_v12  ;;  %2801 = vst [vmem:[#allocation126_spill] sm:$0xff] %v2225_v16 }
 0x16e   : > { %1050 = vrot.lane.b32.xlu1 %v1545_v15, %s1395_s22  ;;  %1048 = vrot.lane.b32.xlu0 %v1550_v23, %s1395_s22 }
 0x170   : > { %v2231_v3 = vpop.permute.xlu1 %810  ;;  %v2233_v11 = vpop.permute.xlu0 %808 }
 0x171   : > { %2802 = vst [vmem:[#allocation127_spill] sm:$0xff] %v2231_v3  ;;  %2803 = vst [vmem:[#allocation128_spill] sm:$0xff] %v2233_v11 }
 0x172   : > { %1054 = vrot.lane.b32.xlu1 %v1552_v24, %s1395_s22  ;;  %1052 = vrot.lane.b32.xlu0 %v1554_v26, %s1395_s22 }
 0x174   : > { %v2239_v52 = vpop.permute.xlu1 %814  ;;  %v2241_v12 = vpop.permute.xlu0 %812 }
 0x175   : > { %2804 = vst [vmem:[#allocation129_spill] sm:$0xff] %v2239_v52  ;;  %2805 = vst [vmem:[#allocation130_spill] sm:$0xff] %v2241_v12 }
 0x176   : > { %1058 = vrot.lane.b32.xlu1 %v1556_v27, %s1395_s22  ;;  %1056 = vrot.lane.b32.xlu0 %v1559_v29, %s1395_s22 }
 0x178   : > { %v2247_v16 = vpop.permute.xlu1 %818  ;;  %v2249_v3 = vpop.permute.xlu0 %816 }
 0x179   : > { %2806 = vst [vmem:[#allocation131_spill] sm:$0xff] %v2247_v16  ;;  %2807 = vst [vmem:[#allocation132_spill] sm:$0xff] %v2249_v3 }
 0x17a   : > { %1062 = vrot.lane.b32.xlu1 %v1561_v30, %s1395_s22  ;;  %1060 = vrot.lane.b32.xlu0 %v1563_v31, %s1395_s22 }
 0x17c   : > { %v2255_v11 = vpop.permute.xlu1 %822  ;;  %v2257_v52 = vpop.permute.xlu0 %820 }
 0x17d   : > { %2808 = vst [vmem:[#allocation133_spill] sm:$0xff] %v2255_v11  ;;  %2809 = vst [vmem:[#allocation134_spill] sm:$0xff] %v2257_v52 }
 0x17e   : > { %1066 = vrot.lane.b32.xlu1 %v1565_v34, %s1395_s22  ;;  %1064 = vrot.lane.b32.xlu0 %v1570_v39, %s1395_s22  ;;  %v2817_v39 = vld [vmem:[#allocation24_spill] sm:$0xff] }
 0x180   : > { %v2263_v12 = vpop.permute.xlu1 %826  ;;  %v2265_v3 = vpop.permute.xlu0 %824 }
 0x181   : > { %2810 = vst [vmem:[#allocation135_spill] sm:$0xff] %v2263_v12  ;;  %2811 = vst [vmem:[#allocation136_spill] sm:$0xff] %v2265_v3  ;;  %v2816_v3 = vld [vmem:[#allocation22_spill] sm:$0xff] }
 0x182   : > { %1070 = vrot.lane.b32.xlu1 %v1572_v40, %s1395_s22  ;;  %1068 = vrot.lane.b32.xlu0 %v1574_v41, %s1395_s22  ;;  %v644_v40 = vadd.f32 %v2816_v3, %v1444_v20  ;;  %v645_v41 = vadd.f32 %v2817_v39, %v1452_v22  ;;  %v2819_v39 = vld [vmem:[#allocation21_spill] sm:$0xff] }
 0x183   : > { %v646_v3 = vadd.f32 %v2819_v39, %v1442_v19 }
 0x184   : > { %v2271_v11 = vpop.permute.xlu1 %830  ;;  %v2273_v52 = vpop.permute.xlu0 %828 }
 0x185   : > { %2812 = vst [vmem:[#allocation137_spill] sm:$0xff] %v2271_v11  ;;  %2813 = vst [vmem:[#allocation138_spill] sm:$0xff] %v2273_v52  ;;  %v2818_v52 = vld [vmem:[#allocation82_spill] sm:$0xff] }
 0x186   : > { %1074 = vrot.lane.b32.xlu1 %v1576_v44, %s1395_s22  ;;  %1072 = vrot.lane.b32.xlu0 %v1588_v53, %s1395_s22  ;;  %v901_v11 = vadd.f32 %v2818_v52, %v645_v41  ;;  %v900_v53 = vadd.f32 %v2033_v25, %v644_v40  ;;  %v2821_v40 = vld [vmem:[#allocation9_spill] sm:$0xff]  ;;  %v2822_v25 = vld [vmem:[#allocation83_spill] sm:$0xff] }
 0x188   : > { %v2279_v12 = vpop.permute.xlu1 %834  ;;  %v2281_v16 = vpop.permute.xlu0 %832 }
 0x189   : > { %2814 = vst [vmem:[#allocation139_spill] sm:$0xff] %v2279_v12  ;;  %2815 = vst [vmem:[#allocation140_spill] sm:$0xff] %v2281_v16  ;;  %v2820_v16 = vld [vmem:[#allocation23_spill] sm:$0xff] }
 0x18a   : > { %1078 = vrot.lane.b32.xlu1 %v1595_v0, %s1395_s22  ;;  %1076 = vrot.lane.b32.xlu0 %v1597_v1, %s1395_s22  ;;  %v647_v12 = vadd.f32 %v2820_v16, %v1450_v21  ;;  %v902_v0 = vadd.f32 %v2041_v46, %v646_v3  ;;  %v2824_v16 = vld [vmem:[#allocation26_spill] sm:$0xff]  ;;  %v2826_v3 = vld [vmem:[#allocation85_spill] sm:$0xff] }
 0x18c   : > { %v967_v20 = vpop.permute.xlu1 %966  ;;  %v965_v22 = vpop.permute.xlu0 %964  ;;  %v903_v1 = vadd.f32 %v2822_v25, %v647_v12  ;;  %v2825_v12 = vld [vmem:[#allocation84_spill] sm:$0xff] }
 0x18d   : > { %v1157_v41 = vadd.f32 %v967_v20, %v901_v11  ;;  %v1156_v52 = vadd.f32 %v965_v22, %v900_v53  ;;  %v2823_v53 = vld [vmem:[#allocation25_spill] sm:$0xff]  ;;  %v648_v20 = vadd.f32 %v2824_v16, %v1469_v33 }
 0x18e   : > { %1082 = vrot.lane.b32.xlu1 %v1599_v2, %s1395_s22  ;;  %1080 = vrot.lane.b32.xlu0 %v2821_v40, %s1395_s22  ;;  %v649_v11 = vadd.f32 %v2823_v53, %v1467_v32  ;;  %v2829_v53 = vld [vmem:[#allocation10_spill] sm:$0xff] }
 0x18f   : > { %1222 = vst.msk [vmem:[%s2298_s25 + $0x8] sm:$0xff] %vm1220_vm0, %v1157_v41  ;;  %1221 = vst.msk [vmem:[%s2298_s25] sm:$0xff] %vm1220_vm0, %v1156_v52  ;;  %v904_v41 = vadd.f32 %v2826_v3, %v648_v20  ;;  %v2828_v52 = vld [vmem:[#allocation28_spill] sm:$0xff]  ;;  %v2831_v20 = vld [vmem:[#allocation87_spill] sm:$0xff] }
 0x190   : > { %v971_v19 = vpop.permute.xlu1 %970  ;;  %v969_v21 = vpop.permute.xlu0 %968  ;;  %v905_v46 = vadd.f32 %v2825_v12, %v649_v11  ;;  %v650_v25 = vadd.f32 %v2828_v52, %v1506_v55  ;;  %v2830_v11 = vld [vmem:[#allocation86_spill] sm:$0xff] }
 0x191   : > { %v1159_v22 = vadd.f32 %v971_v19, %v903_v1  ;;  %v1158_v39 = vadd.f32 %v969_v21, %v902_v0  ;;  %v2827_v0 = vld [vmem:[#allocation27_spill] sm:$0xff] }
 0x192   : > { %1086 = vrot.lane.b32.xlu1 %v1603_v7, %s1395_s22  ;;  %1084 = vrot.lane.b32.xlu0 %v1605_v6, %s1395_s22  ;;  %v651_v1 = vadd.f32 %v2827_v0, %v1504_v54 }
 0x193   : > { %1224 = vst.msk [vmem:[%s2298_s25 + $0x18] sm:$0xff] %vm1220_vm0, %v1159_v22  ;;  %1223 = vst.msk [vmem:[%s2298_s25 + $0x10] sm:$0xff] %vm1220_vm0, %v1158_v39  ;;  %v906_v22 = vadd.f32 %v2831_v20, %v650_v25  ;;  %v2832_v39 = vld [vmem:[#allocation29_spill] sm:$0xff]  ;;  %v2838_v20 = vld [vmem:[#allocation32_spill] sm:$0xff] }
 0x194   : > { %v975_v32 = vpop.permute.xlu1 %974  ;;  %v973_v33 = vpop.permute.xlu0 %972  ;;  %v907_v16 = vadd.f32 %v2830_v11, %v651_v1  ;;  %v653_v12 = vadd.f32 %v2832_v39, %v1514_v61  ;;  %v2835_v1 = vld [vmem:[#allocation89_spill] sm:$0xff]  ;;  %v2840_v39 = vld [vmem:[#allocation91_spill] sm:$0xff] }
 0x195   : > { %v1161_v19 = vadd.f32 %v975_v32, %v905_v46  ;;  %v1160_v21 = vadd.f32 %v973_v33, %v904_v41  ;;  %v2833_v46 = vld [vmem:[#allocation30_spill] sm:$0xff]  ;;  %v2834_v33 = vld [vmem:[#allocation88_spill] sm:$0xff]  ;;  %v2837_v11 = vld [vmem:[#allocation5_spill] sm:$0xff] }
 0x196   : > { %1090 = vrot.lane.b32.xlu1 %v1607_v9, %s1395_s22  ;;  %1088 = vrot.lane.b32.xlu0 %v2829_v53, %s1395_s22  ;;  %v652_v3 = vadd.f32 %v2833_v46, %v1526_v4  ;;  %v909_v0 = vadd.f32 %v2834_v33, %v653_v12  ;;  %v654_v4 = vadd.f32 %v2838_v20, %v2837_v11  ;;  %v2843_v33 = vld [vmem:[#allocation12_spill] sm:$0xff] }
 0x197   : > { %1226 = vst.msk [vmem:[%s2298_s25 + $0x28] sm:$0xff] %vm1220_vm0, %v1161_v19  ;;  %1225 = vst.msk [vmem:[%s2298_s25 + $0x20] sm:$0xff] %vm1220_vm0, %v1160_v21  ;;  %v2836_v21 = vld [vmem:[#allocation31_spill] sm:$0xff] }
 0x198   : > { %v979_v54 = vpop.permute.xlu1 %978  ;;  %v977_v55 = vpop.permute.xlu0 %976  ;;  %v908_v52 = vadd.f32 %v2835_v1, %v652_v3  ;;  %v655_v61 = vadd.f32 %v2836_v21, %v1529_v5  ;;  %v910_v12 = vadd.f32 %v2840_v39, %v654_v4  ;;  %v2844_v1 = vld [vmem:[#allocation34_spill] sm:$0xff]  ;;  %v2849_v39 = vld [vmem:[#allocation36_spill] sm:$0xff] }
 0x199   : > { %v1163_v41 = vadd.f32 %v979_v54, %v907_v16  ;;  %v1162_v32 = vadd.f32 %v977_v55, %v906_v22  ;;  %v2839_v54 = vld [vmem:[#allocation90_spill] sm:$0xff]  ;;  %v656_v21 = vadd.f32 %v2844_v1, %v2843_v33 }
 0x19a   : > { %v911_v55 = vadd.f32 %v2839_v54, %v655_v61  ;;  %v2846_v61 = vld [vmem:[#allocation93_spill] sm:$0xff] }
 0x19b   : > { %1228 = vst.msk [vmem:[%s2298_s25 + $0x38] sm:$0xff] %vm1220_vm0, %v1163_v41  ;;  %1227 = vst.msk [vmem:[%s2298_s25 + $0x30] sm:$0xff] %vm1220_vm0, %v1162_v32  ;;  %v2841_v41 = vld [vmem:[#allocation11_spill] sm:$0xff]  ;;  %v2842_v32 = vld [vmem:[#allocation33_spill] sm:$0xff]  ;;  %v912_v11 = vadd.f32 %v2846_v61, %v656_v21 }
 0x19c   : > { %v983_v25 = vpop.permute.xlu1 %982  ;;  %v981_v19 = vpop.permute.xlu0 %980  ;;  %v657_v5 = vadd.f32 %v2842_v32, %v2841_v41  ;;  %v2848_v54 = vld [vmem:[#allocation13_spill] sm:$0xff]  ;;  %v2851_v32 = vld [vmem:[#allocation95_spill] sm:$0xff] }
 0x19d   : > { %v1165_v16 = vadd.f32 %v983_v25, %v909_v0  ;;  %v1164_v22 = vadd.f32 %v981_v19, %v908_v52  ;;  %v2845_v25 = vld [vmem:[#allocation92_spill] sm:$0xff]  ;;  %v658_v41 = vadd.f32 %v2849_v39, %v2848_v54  ;;  %v2852_v21 = vld [vmem:[#allocation37_spill] sm:$0xff]  ;;  %v2857_v39 = vld [vmem:[#allocation39_spill] sm:$0xff] }
 0x19e   : > { %v913_v19 = vadd.f32 %v2845_v25, %v657_v5 }
 0x19f   : > { %1230 = vst.msk [vmem:[%s2298_s25 + $0x48] sm:$0xff] %vm1220_vm0, %v1165_v16  ;;  %1229 = vst.msk [vmem:[%s2298_s25 + $0x40] sm:$0xff] %vm1220_vm0, %v1164_v22  ;;  %v2847_v16 = vld [vmem:[#allocation35_spill] sm:$0xff]  ;;  %v914_v5 = vadd.f32 %v2851_v32, %v658_v41  ;;  %v2858_v41 = vld [vmem:[#allocation40_spill] sm:$0xff] }
 0x1a0   : > { %v987_v46 = vpop.permute.xlu1 %986  ;;  %v985_v3 = vpop.permute.xlu0 %984  ;;  %v659_v22 = vadd.f32 %v2847_v16, %v1630_v35  ;;  %v661_v35 = vadd.f32 %v2852_v21, %v2772_v57  ;;  %v663_v57 = vadd.f32 %v2857_v39, %v1652_v38 }
 0x1a1   : > { %v1167_v0 = vadd.f32 %v987_v46, %v911_v55  ;;  %v1166_v52 = vadd.f32 %v985_v3, %v910_v12  ;;  %v2850_v46 = vld [vmem:[#allocation94_spill] sm:$0xff] }
 0x1a2   : > { %v915_v3 = vadd.f32 %v2850_v46, %v659_v22 }
 0x1a3   : > { %1232 = vst.msk [vmem:[%s2298_s25 + $0x58] sm:$0xff] %vm1220_vm0, %v1167_v0  ;;  %1231 = vst.msk [vmem:[%s2298_s25 + $0x50] sm:$0xff] %vm1220_vm0, %v1166_v52  ;;  %v2853_v0 = vld [vmem:[#allocation15_spill] sm:$0xff]  ;;  %v2854_v52 = vld [vmem:[#allocation38_spill] sm:$0xff] }
 0x1a4   : > { %v991_v20 = vpop.permute.xlu1 %990  ;;  %v989_v4 = vpop.permute.xlu0 %988  ;;  %v660_v25 = vadd.f32 %v2854_v52, %v2853_v0  ;;  %v2862_v0 = vld [vmem:[#allocation42_spill] sm:$0xff] }
 0x1a5   : > { %v1169_v55 = vadd.f32 %v991_v20, %v913_v19  ;;  %v1168_v12 = vadd.f32 %v989_v4, %v912_v11  ;;  %v2855_v11 = vld [vmem:[#allocation96_spill] sm:$0xff]  ;;  %v2856_v4 = vld [vmem:[#allocation97_spill] sm:$0xff] }
 0x1a6   : > { %v917_v20 = vadd.f32 %v2855_v11, %v661_v35  ;;  %v916_v16 = vadd.f32 %v2856_v4, %v660_v25  ;;  %v2861_v35 = vld [vmem:[#allocation41_spill] sm:$0xff] }
 0x1a7   : > { %1234 = vst.msk [vmem:[%s2298_s25 + $0x68] sm:$0xff] %vm1220_vm0, %v1169_v55  ;;  %1233 = vst.msk [vmem:[%s2298_s25 + $0x60] sm:$0xff] %vm1220_vm0, %v1168_v12  ;;  %v662_v55 = vadd.f32 %v2858_v41, %v2776_v36  ;;  %v665_v38 = vadd.f32 %v2861_v35, %v2709_v10  ;;  %v664_v36 = vadd.f32 %v2862_v0, %v2779_v51  ;;  %v2864_v11 = vld [vmem:[#allocation101_spill] sm:$0xff]  ;;  %v2867_v41 = vld [vmem:[#allocation102_spill] sm:$0xff] }
 0x1a8   : > { %v995_v33 = vpop.permute.xlu1 %994  ;;  %v993_v1 = vpop.permute.xlu0 %992  ;;  %v2871_v35 = vld [vmem:[#allocation14_spill] sm:$0xff]  ;;  %v2872_v0 = vld [vmem:[#allocation104_spill] sm:$0xff] }
 0x1a9   : > { %v1171_v19 = vadd.f32 %v995_v33, %v915_v3  ;;  %v1170_v61 = vadd.f32 %v993_v1, %v914_v5  ;;  %v2859_v3 = vld [vmem:[#allocation98_spill] sm:$0xff]  ;;  %v2860_v5 = vld [vmem:[#allocation99_spill] sm:$0xff] }
 0x1aa   : > { %v919_v32 = vadd.f32 %v2859_v3, %v663_v57  ;;  %v918_v33 = vadd.f32 %v2860_v5, %v662_v55  ;;  %v2869_v5 = vld [vmem:[#allocation45_spill] sm:$0xff] }
 0x1ab   : > { %1236 = vst.msk [vmem:[%s2298_s25 + $0x78] sm:$0xff] %vm1220_vm0, %v1171_v19  ;;  %1235 = vst.msk [vmem:[%s2298_s25 + $0x70] sm:$0xff] %vm1220_vm0, %v1170_v61  ;;  %v2863_v19 = vld [vmem:[#allocation100_spill] sm:$0xff] }
 0x1ac   : > { %v999_v22 = vpop.permute.xlu1 %998  ;;  %v997_v54 = vpop.permute.xlu0 %996  ;;  %v921_v61 = vadd.f32 %v2863_v19, %v665_v38  ;;  %v2873_v19 = vld [vmem:[#allocation47_spill] sm:$0xff] }
 0x1ad   : > { %v1173_v12 = vadd.f32 %v999_v22, %v917_v20  ;;  %v1172_v46 = vadd.f32 %v997_v54, %v916_v16  ;;  %v920_v20 = vadd.f32 %v2864_v11, %v664_v36  ;;  %v2865_v22 = vld [vmem:[#allocation43_spill] sm:$0xff]  ;;  %v2866_v54 = vld [vmem:[#allocation44_spill] sm:$0xff] }
 0x1ae   : > { %v667_v10 = vadd.f32 %v2865_v22, %v1674_v56  ;;  %v666_v51 = vadd.f32 %v2866_v54, %v2713_v59  ;;  %v669_v56 = vadd.f32 %v2869_v5, %v2716_v28  ;;  %v671_v28 = vadd.f32 %v2873_v19, %v1695_v8  ;;  %v2876_v22 = vld [vmem:[#allocation105_spill] sm:$0xff]  ;;  %v2885_v19 = vld [vmem:[#allocation20_spill] sm:$0xff] }
 0x1af   : > { %1238 = vst.msk [vmem:[%s2298_s25 + $0x88] sm:$0xff] %vm1220_vm0, %v1173_v12  ;;  %1237 = vst.msk [vmem:[%s2298_s25 + $0x80] sm:$0xff] %vm1220_vm0, %v1172_v46  ;;  %v2868_v12 = vld [vmem:[#allocation103_spill] sm:$0xff] }
 0x1b0   : > { %v1003_v1 = vpop.permute.xlu1 %1002  ;;  %v1001_v21 = vpop.permute.xlu0 %1000  ;;  %v923_v55 = vadd.f32 %v2867_v41, %v667_v10  ;;  %v922_v46 = vadd.f32 %v2868_v12, %v666_v51  ;;  %v925_v38 = vadd.f32 %v2871_v35, %v669_v56  ;;  %v2879_v12 = vld [vmem:[#allocation18_spill] sm:$0xff]  ;;  %v2883_v35 = vld [vmem:[#allocation107_spill] sm:$0xff] }
 0x1b1   : > { %v1175_v52 = vadd.f32 %v1003_v1, %v919_v32  ;;  %v1174_v25 = vadd.f32 %v1001_v21, %v918_v33  ;;  %v2870_v33 = vld [vmem:[#allocation46_spill] sm:$0xff] }
 0x1b2   : > { %v668_v59 = vadd.f32 %v2870_v33, %v1687_v18  ;;  %v2881_v33 = vld [vmem:[#allocation19_spill] sm:$0xff] }
 0x1b3   : > { %1240 = vst.msk [vmem:[%s2298_s25 + $0x98] sm:$0xff] %vm1220_vm0, %v1175_v52  ;;  %1239 = vst.msk [vmem:[%s2298_s25 + $0x90] sm:$0xff] %vm1220_vm0, %v1174_v25 }
 0x1b4   : > { %v1007_v4 = vpop.permute.xlu1 %1006  ;;  %v1005_v16 = vpop.permute.xlu0 %1004  ;;  %v924_v36 = vadd.f32 %v2872_v0, %v668_v59  ;;  %v2882_v59 = vld [vmem:[#allocation50_spill] sm:$0xff]  ;;  %v2884_v0 = vld [vmem:[#allocation108_spill] sm:$0xff] }
 0x1b5   : > { %v1177_v39 = vadd.f32 %v1007_v4, %v921_v61  ;;  %v1176_v57 = vadd.f32 %v1005_v16, %v920_v20  ;;  %v2874_v61 = vld [vmem:[#allocation48_spill] sm:$0xff] }
 0x1b6   : > { %v670_v18 = vadd.f32 %v2874_v61, %v1697_v37  ;;  %v2875_v4 = vld [vmem:[#allocation16_spill] sm:$0xff] }
 0x1b7   : > { %1242 = vst.msk [vmem:[%s2298_s25 + $0xa8] sm:$0xff] %vm1220_vm0, %v1177_v39  ;;  %1241 = vst.msk [vmem:[%s2298_s25 + $0xa0] sm:$0xff] %vm1220_vm0, %v1176_v57  ;;  %v927_v16 = vadd.f32 %v2875_v4, %v671_v28  ;;  %v2877_v39 = vld [vmem:[#allocation17_spill] sm:$0xff]  ;;  %v2886_v28 = vld [vmem:[#allocation51_spill] sm:$0xff] }
 0x1b8   : > { %v1011_v3 = vpop.permute.xlu1 %1010  ;;  %v1009_v32 = vpop.permute.xlu0 %1008  ;;  %v926_v10 = vadd.f32 %v2876_v22, %v670_v18  ;;  %v673_v8 = vadd.f32 %v2877_v39, %v1705_v58  ;;  %v2878_v57 = vld [vmem:[#allocation49_spill] sm:$0xff]  ;;  %v675_v58 = vadd.f32 %v2881_v33, %v1715_v17  ;;  %v677_v17 = vadd.f32 %v2885_v19, %v1482_v42  ;;  %v2888_v4 = vld [vmem:[#allocation110_spill] sm:$0xff]  ;;  %v2900_v19 = vld [vmem:[#allocation116_spill] sm:$0xff] }
 0x1b9   : > { %v1179_v1 = vadd.f32 %v1011_v3, %v923_v55  ;;  %v1178_v21 = vadd.f32 %v1009_v32, %v922_v46  ;;  %v672_v37 = vadd.f32 %v2878_v57, %v1707_v60  ;;  %v2880_v3 = vld [vmem:[#allocation106_spill] sm:$0xff]  ;;  %v674_v60 = vadd.f32 %v2882_v59, %v1717_v45  ;;  %v2891_v57 = vld [vmem:[#allocation111_spill] sm:$0xff]  ;;  %v2895_v33 = vld [vmem:[#allocation113_spill] sm:$0xff] }
 0x1ba   : > { %v929_v46 = vadd.f32 %v2879_v12, %v673_v8  ;;  %v676_v45 = vadd.f32 %v2886_v28, %v1484_v43  ;;  %v2896_v59 = vld [vmem:[#allocation114_spill] sm:$0xff] }
 0x1bb   : > { %1244 = vst.msk [vmem:[%s2298_s25 + $0xb8] sm:$0xff] %vm1220_vm0, %v1179_v1  ;;  %1243 = vst.msk [vmem:[%s2298_s25 + $0xb0] sm:$0xff] %vm1220_vm0, %v1178_v21  ;;  %v928_v32 = vadd.f32 %v2880_v3, %v672_v37  ;;  %v2893_v3 = vld [vmem:[#allocation54_spill] sm:$0xff] }
 0x1bc   : > { %v1015_v52 = vpop.permute.xlu1 %1014  ;;  %v1013_v25 = vpop.permute.xlu0 %1012 }
 0x1bd   : > { %v1181_v11 = vadd.f32 %v1015_v52, %v925_v38  ;;  %v1180_v20 = vadd.f32 %v1013_v25, %v924_v36  ;;  %v931_v38 = vadd.f32 %v2883_v35, %v675_v58  ;;  %v930_v36 = vadd.f32 %v2884_v0, %v674_v60  ;;  %v2897_v35 = vld [vmem:[#allocation56_spill] sm:$0xff] }
 0x1bf   : > { %1246 = vst.msk [vmem:[%s2298_s25 + $0xc8] sm:$0xff] %vm1220_vm0, %v1181_v11  ;;  %1245 = vst.msk [vmem:[%s2298_s25 + $0xc0] sm:$0xff] %vm1220_vm0, %v1180_v20  ;;  %v2887_v11 = vld [vmem:[#allocation109_spill] sm:$0xff] }
 0x1c0   : > { %v1019_v54 = vpop.permute.xlu1 %1018  ;;  %v1017_v51 = vpop.permute.xlu0 %1016  ;;  %v933_v20 = vadd.f32 %v2887_v11, %v677_v17 }
 0x1c1   : > { %v1183_v41 = vadd.f32 %v1019_v54, %v927_v16  ;;  %v1182_v55 = vadd.f32 %v1017_v51, %v926_v10  ;;  %v932_v16 = vadd.f32 %v2888_v4, %v676_v45  ;;  %v2889_v54 = vld [vmem:[#allocation52_spill] sm:$0xff]  ;;  %v2890_v51 = vld [vmem:[#allocation53_spill] sm:$0xff] }
 0x1c2   : > { %v679_v42 = vadd.f32 %v2889_v54, %v1489_v47  ;;  %v678_v43 = vadd.f32 %v2890_v51, %v1491_v48  ;;  %v681_v47 = vadd.f32 %v2893_v3, %v1493_v49  ;;  %v683_v49 = vadd.f32 %v2897_v35, %v1516_v62  ;;  %v2903_v4 = vld [vmem:[#allocation117_spill] sm:$0xff]  ;;  %v2905_v51 = vld [vmem:[#allocation60_spill] sm:$0xff]  ;;  %v2909_v3 = vld [vmem:[#allocation62_spill] sm:$0xff] }
 0x1c3   : > { %1248 = vst.msk [vmem:[%s2298_s25 + $0xd8] sm:$0xff] %vm1220_vm0, %v1183_v41  ;;  %1247 = vst.msk [vmem:[%s2298_s25 + $0xd0] sm:$0xff] %vm1220_vm0, %v1182_v55  ;;  %v2892_v41 = vld [vmem:[#allocation112_spill] sm:$0xff] }
 0x1c4   : > { %v1023_v5 = vpop.permute.xlu1 %1022  ;;  %v1021_v56 = vpop.permute.xlu0 %1020  ;;  %v935_v37 = vadd.f32 %v2891_v57, %v679_v42  ;;  %v934_v55 = vadd.f32 %v2892_v41, %v678_v43  ;;  %v937_v58 = vadd.f32 %v2895_v33, %v681_v47  ;;  %v2906_v43 = vld [vmem:[#allocation61_spill] sm:$0xff]  ;;  %v2907_v57 = vld [vmem:[#allocation119_spill] sm:$0xff]  ;;  %v2908_v41 = vld [vmem:[#allocation120_spill] sm:$0xff] }
 0x1c5   : > { %v1185_v1 = vadd.f32 %v1023_v5, %v929_v46  ;;  %v1184_v21 = vadd.f32 %v1021_v56, %v928_v32  ;;  %v2894_v32 = vld [vmem:[#allocation55_spill] sm:$0xff]  ;;  %v2912_v33 = vld [vmem:[#allocation122_spill] sm:$0xff] }
 0x1c6   : > { %v680_v48 = vadd.f32 %v2894_v32, %v1495_v50  ;;  %v2910_v47 = vld [vmem:[#allocation63_spill] sm:$0xff] }
 0x1c7   : > { %1250 = vst.msk [vmem:[%s2298_s25 + $0xe8] sm:$0xff] %vm1220_vm0, %v1185_v1  ;;  %1249 = vst.msk [vmem:[%s2298_s25 + $0xe0] sm:$0xff] %vm1220_vm0, %v1184_v21 }
 0x1c8   : > { %v1027_v52 = vpop.permute.xlu1 %1026  ;;  %v1025_v25 = vpop.permute.xlu0 %1024  ;;  %v936_v60 = vadd.f32 %v2896_v59, %v680_v48 }
 0x1c9   : > { %v1187_v61 = vadd.f32 %v1027_v52, %v931_v38  ;;  %v1186_v18 = vadd.f32 %v1025_v25, %v930_v36  ;;  %v2898_v38 = vld [vmem:[#allocation57_spill] sm:$0xff]  ;;  %v2899_v52 = vld [vmem:[#allocation115_spill] sm:$0xff] }
 0x1ca   : > { %v682_v50 = vadd.f32 %v2898_v38, %v1518_v63  ;;  %v939_v25 = vadd.f32 %v2899_v52, %v683_v49  ;;  %v2915_v38 = vld [vmem:[#allocation123_spill] sm:$0xff] }
 0x1cb   : > { %1252 = vst.msk [vmem:[%s2298_s25 + $0xf8] sm:$0xff] %vm1220_vm0, %v1187_v61  ;;  %1251 = vst.msk [vmem:[%s2298_s25 + $0xf0] sm:$0xff] %vm1220_vm0, %v1186_v18  ;;  %v2901_v61 = vld [vmem:[#allocation58_spill] sm:$0xff]  ;;  %v2902_v18 = vld [vmem:[#allocation59_spill] sm:$0xff] }
 0x1cc   : > { %v1031_v22 = vpop.permute.xlu1 %1030  ;;  %v1029_v10 = vpop.permute.xlu0 %1028  ;;  %v938_v17 = vadd.f32 %v2900_v19, %v682_v50  ;;  %v685_v62 = vadd.f32 %v2901_v61, %v1541_v13  ;;  %v684_v63 = vadd.f32 %v2902_v18, %v1543_v14  ;;  %v687_v13 = vadd.f32 %v2905_v51, %v1545_v15  ;;  %v2917_v19 = vld [vmem:[#allocation66_spill] sm:$0xff]  ;;  %v2919_v61 = vld [vmem:[#allocation125_spill] sm:$0xff] }
 0x1cd   : > { %v1189_v39 = vadd.f32 %v1031_v22, %v933_v20  ;;  %v1188_v8 = vadd.f32 %v1029_v10, %v932_v16  ;;  %v2904_v22 = vld [vmem:[#allocation118_spill] sm:$0xff]  ;;  %v686_v14 = vadd.f32 %v2906_v43, %v1550_v23  ;;  %v689_v15 = vadd.f32 %v2909_v3, %v1552_v24  ;;  %v2930_v3 = vld [vmem:[#allocation129_spill] sm:$0xff] }
 0x1ce   : > { %v941_v16 = vadd.f32 %v2903_v4, %v685_v62  ;;  %v940_v10 = vadd.f32 %v2904_v22, %v684_v63  ;;  %v688_v23 = vadd.f32 %v2910_v47, %v1554_v26  ;;  %v2920_v18 = vld [vmem:[#allocation126_spill] sm:$0xff]  ;;  %v2921_v4 = vld [vmem:[#allocation68_spill] sm:$0xff]  ;;  %v2923_v22 = vld [vmem:[#allocation69_spill] sm:$0xff] }
 0x1cf   : > { %1254 = vst.msk [vmem:[%s2298_s25 + $0x108] sm:$0xff] %vm1220_vm0, %v1189_v39  ;;  %1253 = vst.msk [vmem:[%s2298_s25 + $0x100] sm:$0xff] %vm1220_vm0, %v1188_v8  ;;  %v2931_v47 = vld [vmem:[#allocation130_spill] sm:$0xff] }
 0x1d0   : > { %v1035_v12 = vpop.permute.xlu1 %1034  ;;  %v1033_v46 = vpop.permute.xlu0 %1032 }
 0x1d1   : > { %v1191_v5 = vadd.f32 %v1035_v12, %v935_v37  ;;  %v1190_v56 = vadd.f32 %v1033_v46, %v934_v55  ;;  %v943_v37 = vadd.f32 %v2907_v57, %v687_v13  ;;  %v942_v55 = vadd.f32 %v2908_v41, %v686_v14  ;;  %v2925_v13 = vld [vmem:[#allocation128_spill] sm:$0xff]  ;;  %v2927_v57 = vld [vmem:[#allocation70_spill] sm:$0xff]  ;;  %v2929_v41 = vld [vmem:[#allocation71_spill] sm:$0xff] }
 0x1d3   : > { %1256 = vst.msk [vmem:[%s2298_s25 + $0x118] sm:$0xff] %vm1220_vm0, %v1191_v5  ;;  %1255 = vst.msk [vmem:[%s2298_s25 + $0x110] sm:$0xff] %vm1220_vm0, %v1190_v56  ;;  %v2911_v5 = vld [vmem:[#allocation121_spill] sm:$0xff] }
 0x1d4   : > { %v1039_v1 = vpop.permute.xlu1 %1038  ;;  %v1037_v21 = vpop.permute.xlu0 %1036  ;;  %v945_v56 = vadd.f32 %v2911_v5, %v689_v15  ;;  %v2932_v5 = vld [vmem:[#allocation72_spill] sm:$0xff] }
 0x1d5   : > { %v1193_v0 = vadd.f32 %v1039_v1, %v937_v58  ;;  %v1192_v36 = vadd.f32 %v1037_v21, %v936_v60  ;;  %v944_v58 = vadd.f32 %v2912_v33, %v688_v23  ;;  %v2913_v1 = vld [vmem:[#allocation64_spill] sm:$0xff]  ;;  %v2914_v21 = vld [vmem:[#allocation65_spill] sm:$0xff]  ;;  %v2933_v33 = vld [vmem:[#allocation6_spill] sm:$0xff] }
 0x1d6   : > { %v691_v24 = vadd.f32 %v2913_v1, %v1556_v27  ;;  %v690_v26 = vadd.f32 %v2914_v21, %v1559_v29  ;;  %v693_v27 = vadd.f32 %v2917_v19, %v1561_v30  ;;  %v695_v30 = vadd.f32 %v2921_v4, %v1565_v34 }
 0x1d7   : > { %1258 = vst.msk [vmem:[%s2298_s25 + $0x128] sm:$0xff] %vm1220_vm0, %v1193_v0  ;;  %1257 = vst.msk [vmem:[%s2298_s25 + $0x120] sm:$0xff] %vm1220_vm0, %v1192_v36  ;;  %v2916_v0 = vld [vmem:[#allocation124_spill] sm:$0xff] }
 0x1d8   : > { %v1043_v28 = vpop.permute.xlu1 %1042  ;;  %v1041_v45 = vpop.permute.xlu0 %1040  ;;  %v947_v50 = vadd.f32 %v2915_v38, %v691_v24  ;;  %v946_v36 = vadd.f32 %v2916_v0, %v690_v26  ;;  %v949_v62 = vadd.f32 %v2919_v61, %v693_v27  ;;  %v2935_v24 = vld [vmem:[#allocation131_spill] sm:$0xff]  ;;  %v2936_v26 = vld [vmem:[#allocation132_spill] sm:$0xff]  ;;  %v2938_v0 = vld [vmem:[#allocation74_spill] sm:$0xff] }
 0x1d9   : > { %v1195_v11 = vadd.f32 %v1043_v28, %v939_v25  ;;  %v1194_v20 = vadd.f32 %v1041_v45, %v938_v17  ;;  %v2918_v17 = vld [vmem:[#allocation67_spill] sm:$0xff] }
 0x1da   : > { %v692_v29 = vadd.f32 %v2918_v17, %v1563_v31  ;;  %v2941_v17 = vld [vmem:[#allocation133_spill] sm:$0xff] }
 0x1db   : > { %1260 = vst.msk [vmem:[%s2298_s25 + $0x138] sm:$0xff] %vm1220_vm0, %v1195_v11  ;;  %1259 = vst.msk [vmem:[%s2298_s25 + $0x130] sm:$0xff] %vm1220_vm0, %v1194_v20 }
 0x1dc   : > { %v1047_v54 = vpop.permute.xlu1 %1046  ;;  %v1045_v42 = vpop.permute.xlu0 %1044  ;;  %v948_v63 = vadd.f32 %v2920_v18, %v692_v29  ;;  %v2943_v18 = vld [vmem:[#allocation76_spill] sm:$0xff] }
 0x1dd   : > { %v1197_v39 = vadd.f32 %v1047_v54, %v941_v16  ;;  %v1196_v8 = vadd.f32 %v1045_v42, %v940_v10  ;;  %v2922_v16 = vld [vmem:[#allocation2_spill] sm:$0xff]  ;;  %v2924_v42 = vld [vmem:[#allocation127_spill] sm:$0xff] }
 0x1de   : > { %v694_v31 = vadd.f32 %v2923_v22, %v2922_v16  ;;  %v951_v51 = vadd.f32 %v2924_v42, %v695_v30  ;;  %v2945_v16 = vld [vmem:[#allocation135_spill] sm:$0xff] }
 0x1df   : > { %1262 = vst.msk [vmem:[%s2298_s25 + $0x148] sm:$0xff] %vm1220_vm0, %v1197_v39  ;;  %1261 = vst.msk [vmem:[%s2298_s25 + $0x140] sm:$0xff] %vm1220_vm0, %v1196_v8  ;;  %v2926_v8 = vld [vmem:[#allocation3_spill] sm:$0xff] }
 0x1e0   : > { %v1051_v12 = vpop.permute.xlu1 %1050  ;;  %v1049_v46 = vpop.permute.xlu0 %1048  ;;  %v950_v43 = vadd.f32 %v2925_v13, %v694_v31  ;;  %v697_v34 = vadd.f32 %v2927_v57, %v2926_v8  ;;  %v2946_v31 = vld [vmem:[#allocation136_spill] sm:$0xff]  ;;  %v2948_v13 = vld [vmem:[#allocation79_spill] sm:$0xff]  ;;  %v2950_v57 = vld [vmem:[#allocation138_spill] sm:$0xff] }
 0x1e1   : > { %v1199_v32 = vadd.f32 %v1051_v12, %v943_v37  ;;  %v1198_v48 = vadd.f32 %v1049_v46, %v942_v55  ;;  %v2928_v37 = vld [vmem:[#allocation4_spill] sm:$0xff] }
 0x1e2   : > { %v696_v55 = vadd.f32 %v2929_v41, %v2928_v37  ;;  %v953_v15 = vadd.f32 %v2930_v3, %v697_v34 }
 0x1e3   : > { %1264 = vst.msk [vmem:[%s2298_s25 + $0x158] sm:$0xff] %vm1220_vm0, %v1199_v32  ;;  %1263 = vst.msk [vmem:[%s2298_s25 + $0x150] sm:$0xff] %vm1220_vm0, %v1198_v48 }
 0x1e4   : > { %v1055_v59 = vpop.permute.xlu1 %1054  ;;  %v1053_v60 = vpop.permute.xlu0 %1052  ;;  %v952_v23 = vadd.f32 %v2931_v47, %v696_v55 }
 0x1e5   : > { %v1201_v35 = vadd.f32 %v1055_v59, %v945_v56  ;;  %v1200_v49 = vadd.f32 %v1053_v60, %v944_v58  ;;  %v699_v56 = vadd.f32 %v2932_v5, %v1576_v44  ;;  %v2934_v58 = vld [vmem:[#allocation73_spill] sm:$0xff] }
 0x1e6   : > { %v698_v59 = vadd.f32 %v2934_v58, %v2933_v33 }
 0x1e7   : > { %1266 = vst.msk [vmem:[%s2298_s25 + $0x168] sm:$0xff] %vm1220_vm0, %v1201_v35  ;;  %1265 = vst.msk [vmem:[%s2298_s25 + $0x160] sm:$0xff] %vm1220_vm0, %v1200_v49  ;;  %v955_v21 = vadd.f32 %v2935_v24, %v699_v56 }
 0x1e8   : > { %v1059_v52 = vpop.permute.xlu1 %1058  ;;  %v1057_v25 = vpop.permute.xlu0 %1056  ;;  %v954_v35 = vadd.f32 %v2936_v26, %v698_v59 }
 0x1e9   : > { %v1203_v28 = vadd.f32 %v1059_v52, %v947_v50  ;;  %v1202_v45 = vadd.f32 %v1057_v25, %v946_v36  ;;  %v2937_v50 = vld [vmem:[#allocation7_spill] sm:$0xff]  ;;  %v2939_v36 = vld [vmem:[#allocation8_spill] sm:$0xff] }
 0x1ea   : > { %v701_v44 = vadd.f32 %v2938_v0, %v2937_v50  ;;  %v2940_v52 = vld [vmem:[#allocation75_spill] sm:$0xff] }
 0x1eb   : > { %1268 = vst.msk [vmem:[%s2298_s25 + $0x178] sm:$0xff] %vm1220_vm0, %v1203_v28  ;;  %1267 = vst.msk [vmem:[%s2298_s25 + $0x170] sm:$0xff] %vm1220_vm0, %v1202_v45  ;;  %v700_v25 = vadd.f32 %v2940_v52, %v2939_v36  ;;  %v2942_v28 = vld [vmem:[#allocation134_spill] sm:$0xff] }
 0x1ec   : > { %v1063_v11 = vpop.permute.xlu1 %1062  ;;  %v1061_v20 = vpop.permute.xlu0 %1060  ;;  %v957_v29 = vadd.f32 %v2941_v17, %v701_v44 }
 0x1ed   : > { %v1205_v10 = vadd.f32 %v1063_v11, %v949_v62  ;;  %v1204_v54 = vadd.f32 %v1061_v20, %v948_v63  ;;  %v956_v45 = vadd.f32 %v2942_v28, %v700_v25  ;;  %v703_v63 = vadd.f32 %v2943_v18, %v1599_v2  ;;  %v2944_v11 = vld [vmem:[#allocation77_spill] sm:$0xff] }
 0x1ee   : > { %v702_v20 = vadd.f32 %v2944_v11, %v2821_v40  ;;  %v704_v40 = vadd.f32 %v2948_v13, %v1605_v6  ;;  %v2952_v6 = vld [vmem:[#allocation81_spill] sm:$0xff] }
 0x1ef   : > { %1270 = vst.msk [vmem:[%s2298_s25 + $0x188] sm:$0xff] %vm1220_vm0, %v1205_v10  ;;  %1269 = vst.msk [vmem:[%s2298_s25 + $0x180] sm:$0xff] %vm1220_vm0, %v1204_v54  ;;  %v959_v22 = vadd.f32 %v2945_v16, %v703_v63 }
 0x1f0   : > { %v1067_v14 = vpop.permute.xlu1 %1066  ;;  %v1065_v39 = vpop.permute.xlu0 %1064  ;;  %v958_v10 = vadd.f32 %v2946_v31, %v702_v20  ;;  %v960_v34 = vadd.f32 %v2950_v57, %v704_v40 }
 0x1f1   : > { %v1207_v12 = vadd.f32 %v1067_v14, %v951_v51  ;;  %v1206_v46 = vadd.f32 %v1065_v39, %v950_v43  ;;  %v2947_v51 = vld [vmem:[#allocation78_spill] sm:$0xff]  ;;  %v2949_v39 = vld [vmem:[#allocation137_spill] sm:$0xff] }
 0x1f2   : > { %v705_v2 = vadd.f32 %v2947_v51, %v1603_v7  ;;  %v2951_v7 = vld [vmem:[#allocation80_spill] sm:$0xff] }
 0x1f3   : > { %1272 = vst.msk [vmem:[%s2298_s25 + $0x198] sm:$0xff] %vm1220_vm0, %v1207_v12  ;;  %1271 = vst.msk [vmem:[%s2298_s25 + $0x190] sm:$0xff] %vm1220_vm0, %v1206_v46  ;;  %v707_v55 = vadd.f32 %v2951_v7, %v1607_v9  ;;  %v706_v12 = vadd.f32 %v2952_v6, %v2829_v53 }
 0x1f4   : > { %v1071_v32 = vpop.permute.xlu1 %1070  ;;  %v1069_v48 = vpop.permute.xlu0 %1068  ;;  %v961_v8 = vadd.f32 %v2949_v39, %v705_v2 }
 0x1f5   : > { %v1209_v60 = vadd.f32 %v1071_v32, %v953_v15  ;;  %v1208_v1 = vadd.f32 %v1069_v48, %v952_v23  ;;  %v2953_v15 = vld [vmem:[#allocation139_spill] sm:$0xff]  ;;  %v2954_v23 = vld [vmem:[#allocation140_spill] sm:$0xff] }
 0x1f6   : > { %v963_v47 = vadd.f32 %v2953_v15, %v707_v55  ;;  %v962_v32 = vadd.f32 %v2954_v23, %v706_v12 }
 0x1f7   : > { %1274 = vst.msk [vmem:[%s2298_s25 + $0x1a8] sm:$0xff] %vm1220_vm0, %v1209_v60  ;;  %1273 = vst.msk [vmem:[%s2298_s25 + $0x1a0] sm:$0xff] %vm1220_vm0, %v1208_v1 }
 0x1f8   : > { %v1075_v49 = vpop.permute.xlu1 %1074  ;;  %v1073_v38 = vpop.permute.xlu0 %1072 }
 0x1f9   : > { %v1211_v19 = vadd.f32 %v1075_v49, %v955_v21  ;;  %v1210_v27 = vadd.f32 %v1073_v38, %v954_v35 }
 0x1fb   : > { %1276 = vst.msk [vmem:[%s2298_s25 + $0x1b8] sm:$0xff] %vm1220_vm0, %v1211_v19  ;;  %1275 = vst.msk [vmem:[%s2298_s25 + $0x1b0] sm:$0xff] %vm1220_vm0, %v1210_v27 }
 0x1fc   : > { %v1079_v61 = vpop.permute.xlu1 %1078  ;;  %v1077_v62 = vpop.permute.xlu0 %1076 }
 0x1fd   : > { %v1213_v4 = vadd.f32 %v1079_v61, %v957_v29  ;;  %v1212_v30 = vadd.f32 %v1077_v62, %v956_v45 }
 0x1ff   : > { %1278 = vst.msk [vmem:[%s2298_s25 + $0x1c8] sm:$0xff] %vm1220_vm0, %v1213_v4  ;;  %1277 = vst.msk [vmem:[%s2298_s25 + $0x1c0] sm:$0xff] %vm1220_vm0, %v1212_v30 }
 0x200   : > { %v1083_v54 = vpop.permute.xlu1 %1082  ;;  %v1081_v42 = vpop.permute.xlu0 %1080 }
 0x201   : > { %v1215_v43 = vadd.f32 %v1083_v54, %v959_v22  ;;  %v1214_v14 = vadd.f32 %v1081_v42, %v958_v10 }
 0x203   : > { %1280 = vst.msk [vmem:[%s2298_s25 + $0x1d8] sm:$0xff] %vm1220_vm0, %v1215_v43  ;;  %1279 = vst.msk [vmem:[%s2298_s25 + $0x1d0] sm:$0xff] %vm1220_vm0, %v1214_v14 }
 0x204   : > { %v1087_v37 = vpop.permute.xlu1 %1086  ;;  %v1085_v41 = vpop.permute.xlu0 %1084 }
 0x205   : > { %v1217_v46 = vadd.f32 %v1087_v37, %v961_v8  ;;  %v1216_v3 = vadd.f32 %v1085_v41, %v960_v34 }
 0x207   : > { %1282 = vst.msk [vmem:[%s2298_s25 + $0x1e8] sm:$0xff] %vm1220_vm0, %v1217_v46  ;;  %1281 = vst.msk [vmem:[%s2298_s25 + $0x1e0] sm:$0xff] %vm1220_vm0, %v1216_v3 }
 0x208   : > { %v1091_v48 = vpop.permute.xlu1 %1090  ;;  %v1089_v5 = vpop.permute.xlu0 %1088 }
 0x209   : > { %v1219_v56 = vadd.f32 %v1091_v48, %v963_v47  ;;  %v1218_v33 = vadd.f32 %v1089_v5, %v962_v32 }
 0x20b   : > { %1284 = vst.msk [vmem:[%s2298_s25 + $0x1f8] sm:$0xff] %vm1220_vm0, %v1219_v56  ;;  %1283 = vst.msk [vmem:[%s2298_s25 + $0x1f0] sm:$0xff] %vm1220_vm0, %v1218_v33 }
 0x20c PF: > { %s12_s9 = sadd.s32 1, %s1390_s9  }
 0x20d   : > { %p9_p5 = scmp.ge.s32.totalorder %s12_s9, 4  }
 0x20f   :  { %11 = sbr.rel (!%p9_p5) target bundleno = 1 (0x1), region = 61 }

</bundles_post_ra>
